<compile_context>
chip_gen: v5e
topology: v5e:2x2
jax: 0.10.0
libtpu: 0.0.40
codegen_flags: <defaults>
</compile_context>

<pallas_src>
import numpy as np

import jax
import jax.numpy as jnp
from jax.experimental import pallas as pl
from jax.experimental.pallas import tpu as pltpu


def _round_up(n, m):
    return ((n + m - 1) // m) * m


# --------------------------------------------------------------------------
# Wrapper-side weight packing: one contiguous f32 slab + static row offsets
# --------------------------------------------------------------------------
def pack_weights(flat_weights, input_size, output_size, hidden_size,
                 num_stacks, preprocess=True):
    """Pack per-layer (wih_t, whh_t, bias) + (wlin_t, blin) into one slab.

    Sections are kept separate (wx_l, wh_l, b_l) so the kernel can issue
    independent MXU dots per activation chunk and avoid every lane-axis
    concatenation.  4H gate columns are permuted from the PyTorch order
    [i, f, g, o] to [i, f, o, g] (one sigmoid over 3H + one tanh over H).
    Every section is row-padded to a multiple of 8 so in-kernel static
    slices are sublane-aligned.
    """
    H = hidden_size
    slab_w = max(4 * H, output_size)
    perm = np.concatenate([np.arange(0, 2 * H),        # i, f
                           np.arange(3 * H, 4 * H),    # o
                           np.arange(2 * H, 3 * H)])   # g

    sections, offsets, row = [], {}, 0

    def _add(name, a):
        nonlocal row
        r, c = a.shape
        a = jnp.pad(a, ((0, _round_up(r, 8) - r), (0, slab_w - c)))
        offsets[name] = row
        sections.append(a)
        row += a.shape[0]

    for l in range(num_stacks):
        wih_t, whh_t, bias = flat_weights[3 * l: 3 * l + 3]
        _add(f"wx{l}", wih_t[:, perm])
        _add(f"wh{l}", whh_t[:, perm])
        _add(f"b{l}", bias[:, perm])
    wlin_t, blin = flat_weights[-2:]
    _add("wlin", wlin_t)
    _add("blin", blin)

    slab = jnp.concatenate(sections, axis=0).astype(jnp.float32)
    # TODO(synk): on v7x, store the slab as bf16 (f32 accumulation stays in
    # the MXU) to halve its resident VMEM footprint; skipped to keep the
    # 1e-5 f32 validation.
    return slab, offsets


# --------------------------------------------------------------------------
# Pallas kernel
# --------------------------------------------------------------------------
def _make_kernel(num_stacks, input_size, output_size, hidden_size,
                 offsets, preprocess, p, output_scale, lr):
    H = hidden_size
    L = num_stacks
    inv_p = 1.0 / float(p)
    sign_scale = float(np.exp(p))
    out_scale = float(output_scale) * float(lr)

    def kernel(xg_ref, hc_ref, w_ref, x_out_ref, hc_out_ref):
        # ---- unpack the packed (x | grads) input -------------------------
        x = xg_ref[:, :output_size].astype(jnp.float32)
        g = xg_ref[:, output_size:].astype(jnp.float32)

        # ---- LogAndSign preprocessing (elementwise, VPU/EUP) -------------
        if preprocess:
            clamp_log = jnp.clip(jnp.log(jnp.abs(g)) * inv_p, -1.0, 1.0)
            clamp_sign = jnp.clip(sign_scale * g, -1.0, 1.0)
            layer_in = [clamp_log, clamp_sign]
        else:
            layer_in = [g]

        # ---- stacked LSTM, single time step ------------------------------
        # Per layer: separate MXU dots per activation chunk (no lane concat),
        # gate columns in [i, f, o, g] order.
        # TODO(synk): on v6e/v7x compute the sigmoid/tanh in bf16 (EUP bf16
        # path ~2x) - skipped to preserve the f32 validation tolerance.
        h_top = None
        for l in range(L):                         # unrolled (num_stacks=2)
            base = l * 2 * H
            h_prev = hc_ref[:, base: base + H].astype(jnp.float32)
            c_prev = hc_ref[:, base + H: base + 2 * H].astype(jnp.float32)

            wx_off = offsets[f"wx{l}"]
            wh_off = offsets[f"wh{l}"]
            b_off = offsets[f"b{l}"]

            gates = w_ref[b_off: b_off + 1, : 4 * H]            # (1, 4H) bias
            r = 0
            for part in layer_in:
                k = part.shape[-1]
                gates = gates + jnp.dot(
                    part, w_ref[wx_off + r: wx_off + r + k, : 4 * H],
                    preferred_element_type=jnp.float32)
                r += k
            gates = gates + jnp.dot(
                h_prev, w_ref[wh_off: wh_off + H, : 4 * H],
                preferred_element_type=jnp.float32)             # (Bb, 4H)

            sig = jax.nn.sigmoid(gates[:, : 3 * H])             # i, f, o
            g_g = jnp.tanh(gates[:, 3 * H: 4 * H])              # g
            i_g = sig[:, :H]
            f_g = sig[:, H: 2 * H]
            o_g = sig[:, 2 * H: 3 * H]

            c_new = f_g * c_prev + i_g * g_g
            h_new = o_g * jnp.tanh(c_new)

            # two sliced stores into the lane-dense (Bb, L*2H) state block
            hc_out_ref[:, base: base + H] = h_new.astype(hc_out_ref.dtype)
            hc_out_ref[:, base + H: base + 2 * H] = c_new.astype(hc_out_ref.dtype)

            layer_in = [h_new]
            h_top = h_new

        # ---- Linear head + parameter update ------------------------------
        wl_off = offsets["wlin"]
        bl_off = offsets["blin"]
        upd = (jnp.dot(h_top, w_ref[wl_off: wl_off + H, : output_size],
                       preferred_element_type=jnp.float32)
               + w_ref[bl_off: bl_off + 1, : output_size]) * out_scale
        # TODO(synk): on v7x optionally pad x/x_new to 128 lanes so this
        # becomes an unmasked vst; skipped (hurts v5e HBM traffic).
        x_out_ref[...] = (x + upd).astype(x_out_ref.dtype)

    return kernel


# --------------------------------------------------------------------------
# block_b selection (perf review: large tiles; >=2 grid steps on v7x)
# --------------------------------------------------------------------------
def _pick_block_b(B, num_tensorcores=1, cap=1024):
    target = max(1, min(cap, B // max(1, num_tensorcores)))
    for bb in range(target, 0, -1):
        if B % bb == 0 and (bb == B or bb % 8 == 0):
            return bb
    return B


# --------------------------------------------------------------------------
# Wrapper
# --------------------------------------------------------------------------
def lstm_optimizee_forward(x, grads, hc, w_slab, offsets, *,
                           input_size, output_size, hidden_size, num_stacks,
                           preprocess=True, p=10.0, output_scale=1.0, lr=0.05,
                           block_b=None, num_tensorcores=1):
    """hc is the lane-dense packed state (B, num_stacks * 2 * hidden_size);
    pass it as bf16 on HBM-bound chips (v5e/v6e) - compute stays f32."""
    B = x.shape[0]
    L, H = num_stacks, hidden_size
    state_cols = 2 * H * L
    in_cols = grads.shape[-1]
    assert hc.shape == (B, state_cols)

    # single packed (x | grads) input: one DMA instead of two tiny ones
    xg = jnp.concatenate([x.astype(jnp.float32),
                          grads.astype(jnp.float32)], axis=-1)

    if block_b is None:
        # v5e/v6e (1 TC): full-B tile when it fits; v7x: pass
        # num_tensorcores=2 so the "parallel" batch axis keeps >=2 steps.
        block_b = _pick_block_b(B, num_tensorcores)
    assert B % block_b == 0
    assert block_b == B or block_b % 8 == 0
    grid = (B // block_b,)

    kernel = _make_kernel(num_stacks, input_size, output_size, hidden_size,
                          offsets, preprocess, p, output_scale, lr)

    in_specs = [
        pl.BlockSpec((block_b, output_size + in_cols), lambda i: (i, 0)),  # x|g
        pl.BlockSpec((block_b, state_cols), lambda i: (i, 0)),             # hc
        pl.BlockSpec(w_slab.shape, lambda i: (0, 0)),                      # W
    ]
    out_specs = (
        pl.BlockSpec((block_b, output_size), lambda i: (i, 0)),            # x'
        pl.BlockSpec((block_b, state_cols), lambda i: (i, 0)),             # hc'
    )
    out_shapes = (
        jax.ShapeDtypeStruct((B, output_size), jnp.float32),
        jax.ShapeDtypeStruct((B, state_cols), hc.dtype),
    )

    # VMEM budget: double-buffered I/O tiles + the (double-buffered) weight
    # slab.  Only raise the scoped limit when the default would be exceeded.
    hc_bytes = jnp.dtype(hc.dtype).itemsize
    vmem_est = (2 * (block_b * (output_size + in_cols) * 4
                     + block_b * output_size * 4
                     + 2 * block_b * state_cols * hc_bytes)
                + 2 * int(np.prod(w_slab.shape)) * 4)
    cparams = dict(dimension_semantics=("parallel",))
    if vmem_est > 30 * (1 << 20):
        cparams["vmem_limit_bytes"] = int(min(vmem_est * 5 // 4, 100 << 20))

    return pl.pallas_call(
        kernel,
        grid=grid,
        in_specs=in_specs,
        out_specs=out_specs,
        out_shape=out_shapes,
        input_output_aliases={1: 1},     # hc -> hc_new (donated)
        compiler_params=pltpu.CompilerParams(**cparams),
    )(xg, hc, w_slab)


# --------------------------------------------------------------------------
# Deterministic parameter init (PyTorch-style uniform(-1/sqrt(H), 1/sqrt(H)))
# Returned in PyTorch layout (transposed, gate order i,f,g,o) for reference.
# --------------------------------------------------------------------------
def init_params(key, input_size, output_size, hidden_size, num_stacks,
                preprocess=True):
    input_flag = 2 if preprocess else 1
    k = 1.0 / np.sqrt(hidden_size)
    flat = []
    for l in range(num_stacks):
        in_l = input_size * input_flag if l == 0 else hidden_size
        key, k1, k2, k3, k4 = jax.random.split(key, 5)
        wih = jax.random.uniform(k1, (4 * hidden_size, in_l), jnp.float32, -k, k)
        whh = jax.random.uniform(k2, (4 * hidden_size, hidden_size),
                                 jnp.float32, -k, k)
        b_ih = jax.random.uniform(k3, (4 * hidden_size,), jnp.float32, -k, k)
        b_hh = jax.random.uniform(k4, (4 * hidden_size,), jnp.float32, -k, k)
        flat += [wih.T, whh.T, (b_ih + b_hh)[None, :]]
    key, k1, k2 = jax.random.split(key, 3)
    wlin = jax.random.uniform(k1, (output_size, hidden_size), jnp.float32, -k, k)
    blin = jax.random.uniform(k2, (output_size,), jnp.float32, -k, k)
    flat += [wlin.T, blin[None, :]]
    return flat


# --------------------------------------------------------------------------
# Pure-JAX reference (mirrors the PyTorch semantics) for validation
# --------------------------------------------------------------------------
def reference_forward(x, grads, h0, c0, flat_weights, num_stacks,
                      hidden_size, p=10.0, output_scale=1.0, lr=0.05):
    H = hidden_size
    inv_p = 1.0 / float(p)
    sign_scale = float(np.exp(p))
    clamp_log = jnp.clip(jnp.log(jnp.abs(grads)) * inv_p, -1.0, 1.0)
    clamp_sign = jnp.clip(sign_scale * grads, -1.0, 1.0)
    inp = jnp.concatenate([clamp_log, clamp_sign], axis=-1)
    h_list, c_list = [], []
    for l in range(num_stacks):
        wih_t, whh_t, bias = flat_weights[3 * l:3 * l + 3]
        gates = inp @ wih_t + h0[l] @ whh_t + bias       # gate order i,f,g,o
        i_g = jax.nn.sigmoid(gates[:, 0 * H:1 * H])
        f_g = jax.nn.sigmoid(gates[:, 1 * H:2 * H])
        g_g = jnp.tanh(gates[:, 2 * H:3 * H])
        o_g = jax.nn.sigmoid(gates[:, 3 * H:4 * H])
        c_new = f_g * c0[l] + i_g * g_g
        h_new = o_g * jnp.tanh(c_new)
        h_list.append(h_new)
        c_list.append(c_new)
        inp = h_new
    wlin_t, blin = flat_weights[-2:]
    update = (inp @ wlin_t + blin) * (output_scale * lr)
    return x + update, jnp.stack(h_list), jnp.stack(c_list)


# --------------------------------------------------------------------------
if __name__ == "__main__":
    # Shapes consistent with the module (batchsize=128); L*2H = 128 so the
    # packed state block is exactly lane-dense.
    input_size = 16
    output_size = 16
    hidden_size = 32
    num_stacks = 2
    batch = 128

    key = jax.random.PRNGKey(0)
    key, kx, kg, kh, kc = jax.random.split(key, 5)
    x = jax.random.normal(kx, (batch, output_size), jnp.float32)
    grads = jax.random.normal(kg, (batch, input_size), jnp.float32) * 0.1
    # non-zero prev_state exercises the Whh / cell paths
    h0 = jax.random.normal(kh, (num_stacks, batch, hidden_size), jnp.float32) * 0.1
    c0 = jax.random.normal(kc, (num_stacks, batch, hidden_size), jnp.float32) * 0.1

    flat_weights = init_params(key, input_size, output_size, hidden_size,
                               num_stacks, preprocess=True)
    w_slab, offsets = pack_weights(flat_weights, input_size, output_size,
                                   hidden_size, num_stacks, preprocess=True)

    # lane-dense packed state: (B, L*2H) ordered [h0|c0|h1|c1]
    hc = jnp.concatenate(
        [jnp.concatenate([h0[l], c0[l]], axis=-1) for l in range(num_stacks)],
        axis=-1)

    # reference first (hc is donated to the aliased kernel call)
    x_ref, h_ref, c_ref = reference_forward(
        x, grads, h0, c0, flat_weights, num_stacks, hidden_size)

    x_new, hc_next = jax.block_until_ready(
        lstm_optimizee_forward(
            x, grads, hc, w_slab, offsets,
            input_size=input_size, output_size=output_size,
            hidden_size=hidden_size, num_stacks=num_stacks,
            num_tensorcores=1))        # pass 2 on v7x to keep grid >= 2

    H = hidden_size
    np.testing.assert_allclose(np.asarray(x_new), np.asarray(x_ref),
                               rtol=1e-5, atol=1e-5)
    for l in range(num_stacks):
        base = l * 2 * H
        np.testing.assert_allclose(np.asarray(hc_next[:, base:base + H]),
                                   np.asarray(h_ref[l]), rtol=1e-5, atol=1e-5)
        np.testing.assert_allclose(np.asarray(hc_next[:, base + H:base + 2 * H]),
                                   np.asarray(c_ref[l]), rtol=1e-5, atol=1e-5)

    print("KERNEL_OK")
</pallas_src>

<mosaic_0001>
module attributes {stable_mosaic.version = 11 : i64} {
  func.func @kernel(%arg0: i32, %arg1: memref<128x32xf32, #tpu.memory_space<vmem>>, %arg2: memref<128x128xf32, #tpu.memory_space<vmem>>, %arg3: memref<184x128xf32, #tpu.memory_space<vmem>>, %arg4: memref<128x16xf32, #tpu.memory_space<vmem>>, %arg5: memref<128x128xf32, #tpu.memory_space<vmem>>) attributes {dimension_semantics = [#tpu.dimension_semantics<parallel>], iteration_bounds = array<i64: 1>, scalar_prefetch = 0 : i64, scratch_operands = 0 : i64, tpu.core_type = #tpu.core_type<tc>, window_params = [{transform_indices = @transform_0, window_bounds = array<i64: 128, 32>}, {transform_indices = @transform_1, window_bounds = array<i64: 128, 128>}, {pipeline_mode = #tpu.pipeline_mode<synchronous>, transform_indices = @transform_2, window_bounds = array<i64: 184, 128>}, {transform_indices = @transform_3, window_bounds = array<i64: 128, 16>}, {transform_indices = @transform_4, window_bounds = array<i64: 128, 128>}]} {
    %c0 = arith.constant 0 : index
    %c0_0 = arith.constant 0 : index
    %0 = vector.load %arg1[%c0, %c0_0] : memref<128x32xf32, #tpu.memory_space<vmem>>, vector<128x16xf32>
    %c0_1 = arith.constant 0 : index
    %c16 = arith.constant 16 : index
    %1 = vector.load %arg1[%c0_1, %c16] : memref<128x32xf32, #tpu.memory_space<vmem>>, vector<128x16xf32>
    %2 = math.absf %1 : vector<128x16xf32>
    %3 = math.log %2 : vector<128x16xf32>
    %cst = arith.constant 1.000000e-01 : f32
    %4 = vector.broadcast %cst : f32 to vector<128x16xf32>
    %5 = arith.mulf %3, %4 : vector<128x16xf32>
    %cst_2 = arith.constant -1.000000e+00 : f32
    %cst_3 = arith.constant 1.000000e+00 : f32
    %6 = vector.broadcast %cst_2 : f32 to vector<128x16xf32>
    %7 = arith.maximumf %6, %5 : vector<128x16xf32>
    %8 = vector.broadcast %cst_3 : f32 to vector<128x16xf32>
    %9 = arith.minimumf %8, %7 : vector<128x16xf32>
    %cst_4 = arith.constant 22026.4648 : f32
    %10 = vector.broadcast %cst_4 : f32 to vector<128x16xf32>
    %11 = arith.mulf %10, %1 : vector<128x16xf32>
    %cst_5 = arith.constant -1.000000e+00 : f32
    %cst_6 = arith.constant 1.000000e+00 : f32
    %12 = vector.broadcast %cst_5 : f32 to vector<128x16xf32>
    %13 = arith.maximumf %12, %11 : vector<128x16xf32>
    %14 = vector.broadcast %cst_6 : f32 to vector<128x16xf32>
    %15 = arith.minimumf %14, %13 : vector<128x16xf32>
    %c0_7 = arith.constant 0 : index
    %c0_8 = arith.constant 0 : index
    %16 = vector.load %arg2[%c0_7, %c0_8] : memref<128x128xf32, #tpu.memory_space<vmem>>, vector<128x32xf32>
    %c0_9 = arith.constant 0 : index
    %c32 = arith.constant 32 : index
    %17 = vector.load %arg2[%c0_9, %c32] : memref<128x128xf32, #tpu.memory_space<vmem>>, vector<128x32xf32>
    %c64 = arith.constant 64 : index
    %c0_10 = arith.constant 0 : index
    %18 = vector.load %arg3[%c64, %c0_10] : memref<184x128xf32, #tpu.memory_space<vmem>>, vector<1x128xf32>
    %c0_11 = arith.constant 0 : index
    %c0_12 = arith.constant 0 : index
    %19 = vector.load %arg3[%c0_11, %c0_12] : memref<184x128xf32, #tpu.memory_space<vmem>>, vector<16x128xf32>
    %cst_13 = arith.constant dense<0.000000e+00> : vector<128x128xf32>
    %20 = tpu.matmul %9, %19, %cst_13 {dimension_numbers = #tpu.dot_dimension_numbers<[1], [0], [0], [1], [0, 0, 1, 1], [], []>} : vector<128x16xf32>, vector<16x128xf32>, vector<128x128xf32> -> vector<128x128xf32>
    %21 = vector.broadcast %18 : vector<1x128xf32> to vector<128x128xf32>
    %22 = arith.addf %21, %20 : vector<128x128xf32>
    %c16_14 = arith.constant 16 : index
    %c0_15 = arith.constant 0 : index
    %23 = vector.load %arg3[%c16_14, %c0_15] : memref<184x128xf32, #tpu.memory_space<vmem>>, vector<16x128xf32>
    %cst_16 = arith.constant dense<0.000000e+00> : vector<128x128xf32>
    %24 = tpu.matmul %15, %23, %cst_16 {dimension_numbers = #tpu.dot_dimension_numbers<[1], [0], [0], [1], [0, 0, 1, 1], [], []>} : vector<128x16xf32>, vector<16x128xf32>, vector<128x128xf32> -> vector<128x128xf32>
    %25 = arith.addf %22, %24 : vector<128x128xf32>
    %c32_17 = arith.constant 32 : index
    %c0_18 = arith.constant 0 : index
    %26 = vector.load %arg3[%c32_17, %c0_18] : memref<184x128xf32, #tpu.memory_space<vmem>>, vector<32x128xf32>
    %cst_19 = arith.constant dense<0.000000e+00> : vector<128x128xf32>
    %27 = tpu.matmul %16, %26, %cst_19 {dimension_numbers = #tpu.dot_dimension_numbers<[1], [0], [0], [1], [0, 0, 1, 1], [], []>} : vector<128x32xf32>, vector<32x128xf32>, vector<128x128xf32> -> vector<128x128xf32>
    %28 = arith.addf %25, %27 : vector<128x128xf32>
    %29 = vector.extract_strided_slice %28 {offsets = [0, 0], sizes = [128, 96], strides = [1, 1]} : vector<128x128xf32> to vector<128x96xf32>
    %30 = arith.negf %29 : vector<128x96xf32>
    %31 = math.exp %30 : vector<128x96xf32>
    %cst_20 = arith.constant 1.000000e+00 : f32
    %32 = vector.broadcast %cst_20 : f32 to vector<128x96xf32>
    %33 = arith.addf %32, %31 : vector<128x96xf32>
    %34 = arith.divf %32, %33 : vector<128x96xf32>
    %35 = vector.extract_strided_slice %28 {offsets = [0, 96], sizes = [128, 32], strides = [1, 1]} : vector<128x128xf32> to vector<128x32xf32>
    %36 = math.tanh %35 : vector<128x32xf32>
    %37 = vector.extract_strided_slice %34 {offsets = [0, 0], sizes = [128, 32], strides = [1, 1]} : vector<128x96xf32> to vector<128x32xf32>
    %38 = vector.extract_strided_slice %34 {offsets = [0, 32], sizes = [128, 32], strides = [1, 1]} : vector<128x96xf32> to vector<128x32xf32>
    %39 = vector.extract_strided_slice %34 {offsets = [0, 64], sizes = [128, 32], strides = [1, 1]} : vector<128x96xf32> to vector<128x32xf32>
    %40 = arith.mulf %38, %17 : vector<128x32xf32>
    %41 = arith.mulf %37, %36 : vector<128x32xf32>
    %42 = arith.addf %40, %41 : vector<128x32xf32>
    %43 = math.tanh %42 : vector<128x32xf32>
    %44 = arith.mulf %39, %43 : vector<128x32xf32>
    %c0_21 = arith.constant 0 : index
    %c0_22 = arith.constant 0 : index
    %45 = vector.load %arg5[%c0_21, %c0_22] : memref<128x128xf32, #tpu.memory_space<vmem>>, vector<128x32xf32>
    tpu.vector_store %arg5[%c0_21, %c0_22], %44 {strides = array<i32>} : memref<128x128xf32, #tpu.memory_space<vmem>>, vector<128x32xf32>,
    %c0_23 = arith.constant 0 : index
    %c32_24 = arith.constant 32 : index
    %46 = vector.load %arg5[%c0_23, %c32_24] : memref<128x128xf32, #tpu.memory_space<vmem>>, vector<128x32xf32>
    tpu.vector_store %arg5[%c0_23, %c32_24], %42 {strides = array<i32>} : memref<128x128xf32, #tpu.memory_space<vmem>>, vector<128x32xf32>,
    %c0_25 = arith.constant 0 : index
    %c64_26 = arith.constant 64 : index
    %47 = vector.load %arg2[%c0_25, %c64_26] : memref<128x128xf32, #tpu.memory_space<vmem>>, vector<128x32xf32>
    %c0_27 = arith.constant 0 : index
    %c96 = arith.constant 96 : index
    %48 = vector.load %arg2[%c0_27, %c96] : memref<128x128xf32, #tpu.memory_space<vmem>>, vector<128x32xf32>
    %c136 = arith.constant 136 : index
    %c0_28 = arith.constant 0 : index
    %49 = vector.load %arg3[%c136, %c0_28] : memref<184x128xf32, #tpu.memory_space<vmem>>, vector<1x128xf32>
    %c72 = arith.constant 72 : index
    %c0_29 = arith.constant 0 : index
    %50 = vector.load %arg3[%c72, %c0_29] : memref<184x128xf32, #tpu.memory_space<vmem>>, vector<32x128xf32>
    %cst_30 = arith.constant dense<0.000000e+00> : vector<128x128xf32>
    %51 = tpu.matmul %44, %50, %cst_30 {dimension_numbers = #tpu.dot_dimension_numbers<[1], [0], [0], [1], [0, 0, 1, 1], [], []>} : vector<128x32xf32>, vector<32x128xf32>, vector<128x128xf32> -> vector<128x128xf32>
    %52 = vector.broadcast %49 : vector<1x128xf32> to vector<128x128xf32>
    %53 = arith.addf %52, %51 : vector<128x128xf32>
    %c104 = arith.constant 104 : index
    %c0_31 = arith.constant 0 : index
    %54 = vector.load %arg3[%c104, %c0_31] : memref<184x128xf32, #tpu.memory_space<vmem>>, vector<32x128xf32>
    %cst_32 = arith.constant dense<0.000000e+00> : vector<128x128xf32>
    %55 = tpu.matmul %47, %54, %cst_32 {dimension_numbers = #tpu.dot_dimension_numbers<[1], [0], [0], [1], [0, 0, 1, 1], [], []>} : vector<128x32xf32>, vector<32x128xf32>, vector<128x128xf32> -> vector<128x128xf32>
    %56 = arith.addf %53, %55 : vector<128x128xf32>
    %57 = vector.extract_strided_slice %56 {offsets = [0, 0], sizes = [128, 96], strides = [1, 1]} : vector<128x128xf32> to vector<128x96xf32>
    %58 = arith.negf %57 : vector<128x96xf32>
    %59 = math.exp %58 : vector<128x96xf32>
    %cst_33 = arith.constant 1.000000e+00 : f32
    %60 = vector.broadcast %cst_33 : f32 to vector<128x96xf32>
    %61 = arith.addf %60, %59 : vector<128x96xf32>
    %62 = arith.divf %60, %61 : vector<128x96xf32>
    %63 = vector.extract_strided_slice %56 {offsets = [0, 96], sizes = [128, 32], strides = [1, 1]} : vector<128x128xf32> to vector<128x32xf32>
    %64 = math.tanh %63 : vector<128x32xf32>
    %65 = vector.extract_strided_slice %62 {offsets = [0, 0], sizes = [128, 32], strides = [1, 1]} : vector<128x96xf32> to vector<128x32xf32>
    %66 = vector.extract_strided_slice %62 {offsets = [0, 32], sizes = [128, 32], strides = [1, 1]} : vector<128x96xf32> to vector<128x32xf32>
    %67 = vector.extract_strided_slice %62 {offsets = [0, 64], sizes = [128, 32], strides = [1, 1]} : vector<128x96xf32> to vector<128x32xf32>
    %68 = arith.mulf %66, %48 : vector<128x32xf32>
    %69 = arith.mulf %65, %64 : vector<128x32xf32>
    %70 = arith.addf %68, %69 : vector<128x32xf32>
    %71 = math.tanh %70 : vector<128x32xf32>
    %72 = arith.mulf %67, %71 : vector<128x32xf32>
    %c0_34 = arith.constant 0 : index
    %c64_35 = arith.constant 64 : index
    %73 = vector.load %arg5[%c0_34, %c64_35] : memref<128x128xf32, #tpu.memory_space<vmem>>, vector<128x32xf32>
    tpu.vector_store %arg5[%c0_34, %c64_35], %72 {strides = array<i32>} : memref<128x128xf32, #tpu.memory_space<vmem>>, vector<128x32xf32>,
    %c0_36 = arith.constant 0 : index
    %c96_37 = arith.constant 96 : index
    %74 = vector.load %arg5[%c0_36, %c96_37] : memref<128x128xf32, #tpu.memory_space<vmem>>, vector<128x32xf32>
    tpu.vector_store %arg5[%c0_36, %c96_37], %70 {strides = array<i32>} : memref<128x128xf32, #tpu.memory_space<vmem>>, vector<128x32xf32>,
    %c144 = arith.constant 144 : index
    %c0_38 = arith.constant 0 : index
    %75 = vector.load %arg3[%c144, %c0_38] : memref<184x128xf32, #tpu.memory_space<vmem>>, vector<32x16xf32>
    %cst_39 = arith.constant dense<0.000000e+00> : vector<128x16xf32>
    %76 = tpu.matmul %72, %75, %cst_39 {dimension_numbers = #tpu.dot_dimension_numbers<[1], [0], [0], [1], [0, 0, 1, 1], [], []>} : vector<128x32xf32>, vector<32x16xf32>, vector<128x16xf32> -> vector<128x16xf32>
    %c176 = arith.constant 176 : index
    %c0_40 = arith.constant 0 : index
    %77 = vector.load %arg3[%c176, %c0_40] : memref<184x128xf32, #tpu.memory_space<vmem>>, vector<1x16xf32>
    %78 = vector.broadcast %77 : vector<1x16xf32> to vector<128x16xf32>
    %79 = arith.addf %76, %78 : vector<128x16xf32>
    %cst_41 = arith.constant 5.000000e-02 : f32
    %80 = vector.broadcast %cst_41 : f32 to vector<128x16xf32>
    %81 = arith.mulf %79, %80 : vector<128x16xf32>
    %82 = arith.addf %0, %81 : vector<128x16xf32>
    %c0_42 = arith.constant 0 : index
    %c0_43 = arith.constant 0 : index
    %83 = vector.load %arg4[%c0_42, %c0_43] : memref<128x16xf32, #tpu.memory_space<vmem>>, vector<128x16xf32>
    tpu.vector_store %arg4[%c0_42, %c0_43], %82 {strides = array<i32>} : memref<128x16xf32, #tpu.memory_space<vmem>>, vector<128x16xf32>,
    return
  }
  func.func @transform_0(%arg0: i32) -> (i32, i32) {
    %c0_i32 = arith.constant 0 : i32
    %c0_i32_0 = arith.constant 0 : i32
    return %arg0, %c0_i32 : i32, i32
  }
  func.func @transform_1(%arg0: i32) -> (i32, i32) {
    %c0_i32 = arith.constant 0 : i32
    %c0_i32_0 = arith.constant 0 : i32
    return %arg0, %c0_i32 : i32, i32
  }
  func.func @transform_2(%arg0: i32) -> (i32, i32) {
    %c0_i32 = arith.constant 0 : i32
    %c0_i32_0 = arith.constant 0 : i32
    %c0_i32_1 = arith.constant 0 : i32
    return %c0_i32, %c0_i32_0 : i32, i32
  }
  func.func @transform_3(%arg0: i32) -> (i32, i32) {
    %c0_i32 = arith.constant 0 : i32
    %c0_i32_0 = arith.constant 0 : i32
    return %arg0, %c0_i32 : i32, i32
  }
  func.func @transform_4(%arg0: i32) -> (i32, i32) {
    %c0_i32 = arith.constant 0 : i32
    %c0_i32_0 = arith.constant 0 : i32
    return %arg0, %c0_i32 : i32, i32
  }
}

</mosaic_0001>

<bundles_post_ra>
// kernel: tpu_custom_call.1
= control target key start
LH: loop header
LB: loop body
LE: loop exit
PB: predicated region body
PF: predicated region fallthrough
CT: control target
= control target key end

     0   :  { %s3040_s5 = smov 112   ;;  %vm243_vm0 = vcmask 130048   ;;  %vm525_vm1 = vcmask 261120   ;;  %s3041_s20 = smov 32   ;;  %s4767_s0 = inlined_call_operand.vmem [shape: f32[128,32], index: 0, kind: input, shape index: {}]   ;;  %s4768_s2 = inlined_call_operand.vmem [shape: f32[184,128], index: 2, kind: input, shape index: {}]   ;;  %s4769_s1 = inlined_call_operand.vmem [shape: f32[128,128], index: 1, kind: input, shape index: {}, may-alias: {1,4}]   ;;  %s4770_s4 = inlined_call_operand.vmem [shape: f32[128,128], index: 4, kind: output, shape index: {1}, may-alias: {1,4}]   ;;  %s4771_s3 = inlined_call_operand.vmem [shape: f32[128,16], index: 3, kind: output, shape index: {0}]  }
   0x1   :  { %v3071_v0 = vld [vmem:[%s4767_s0 + $0x40] sm:$0xff]  ;;  %v3076_v1 = vld [vmem:[%s4767_s0 + $0x50] sm:$0xff]  ;;  %v3081_v2 = vld [vmem:[%s4767_s0 + $0x48] sm:$0xff]  ;;  %s3042_s23 = smov 64  }
   0x2   :  { %v40_v3 = vand.u32 2147483647, %v3071_v0  ;;  %v42_v4 = vand.u32 2147483647, %v3076_v1  ;;  %v41_v5 = vand.u32 2147483647, %v3081_v2 }
   0x3   :  { %v3089_v6 = vld [vmem:[%s4767_s0 + $0x58] sm:$0xff]  ;;  %v3094_v7 = vld [vmem:[%s4767_s0 + $0x70] sm:$0xff]  ;;  %v3107_v12 = vld [vmem:[%s4767_s0 + $0x60] sm:$0xff] }
   0x4   :  { %2727 = vlog2.f32 %v40_v3  ;;  %v43_v8 = vand.u32 2147483647, %v3089_v6  ;;  %v46_v9 = vand.u32 2147483647, %v3094_v7  ;;  %v3101_v10 = vld [vmem:[%s4767_s0 + $0x78] sm:$0xff]  ;;  %v3113_v24 = vld [vmem:[%s4767_s0 + $0x8] sm:$0xff] }
   0x5   :  { %2729 = vlog2.f32 %v42_v4  ;;  %v47_v11 = vand.u32 2147483647, %v3101_v10  ;;  %v44_v14 = vand.u32 2147483647, %v3107_v12  ;;  %v33_v29 = vand.u32 2147483647, %v3113_v24 }
   0x6   :  { %2731 = vlog2.f32 %v41_v5  ;;  %v3121_v34 = vld [vmem:[%s4767_s0 + $0x68] sm:$0xff]  ;;  %v18_v35 = vld [vmem:[%s4767_s0 + $0x10] sm:$0xff]  ;;  %v16_v45 = vld [vmem:[%s4767_s0] sm:$0xff] }
   0x7   :  { %2733 = vlog2.f32 %v43_v8  ;;  %v45_v41 = vand.u32 2147483647, %v3121_v34  ;;  %v34_v42 = vand.u32 2147483647, %v18_v35  ;;  %v32_v47 = vand.u32 2147483647, %v16_v45 }
   0x8   :  { %2735 = vlog2.f32 %v46_v9  ;;  %v20_v53 = vld [vmem:[%s4767_s0 + $0x20] sm:$0xff]  ;;  %v128_v56 = vmul.f32 22026.465, %v16_v45  ;;  %v21_v62 = vld [vmem:[%s4767_s0 + $0x28] sm:$0xff] }
   0x9   :  { %2737 = vlog2.f32 %v44_v14  ;;  %v36_v58 = vand.u32 2147483647, %v20_v53  ;;  %v37_v9 = vand.u32 2147483647, %v21_v62 }
   0xa   :  { %v2728_v13 = vpop.eup %2727  ;;  %2739 = vlog2.f32 %v47_v11  ;;  %v2573_v3 = vclamps-f32 %v128_v56, 1.0 }
   0xb   :  { %v2730_v15 = vpop.eup %2729  ;;  %v65_v16 = vmul.f32 0.6931472, %v2728_v13  ;;  %2741 = vlog2.f32 %v33_v29  ;;  %v19_v13 = vld [vmem:[%s4767_s0 + $0x18] sm:$0xff] }
   0xc   :  { %v2732_v17 = vpop.eup %2731  ;;  %v69_v18 = vmul.f32 0.6931472, %v2730_v15  ;;  %2743 = vlog2.f32 %v45_v41  ;;  %v130_v15 = vmul.f32 22026.465, %v18_v35  ;;  %v22_v35 = vld [vmem:[%s4767_s0 + $0x30] sm:$0xff] }
   0xd   :  { %v2734_v19 = vpop.eup %2733  ;;  %v88_v20 = vmul.f32 0.1, %v65_v16  ;;  %v67_v21 = vmul.f32 0.6931472, %v2732_v17  ;;  %2745 = vlog2.f32 %v34_v42  ;;  %v35_v16 = vand.u32 2147483647, %v19_v13 }
   0xe   :  { %v90_v22 = vmul.f32 0.1, %v69_v18  ;;  %v71_v23 = vmul.f32 0.6931472, %v2734_v19  ;;  %v2736_v27 = vpop.eup %2735  ;;  %2747 = vlog2.f32 %v32_v47  ;;  %v129_v19 = vmul.f32 22026.465, %v3113_v24 }
   0xf   :  { %v2565_v25 = vclamps-f32 %v88_v20, 1.0  ;;  %v89_v28 = vmul.f32 0.1, %v67_v21  ;;  %v2738_v30 = vpop.eup %2737  ;;  %v77_v37 = vmul.f32 0.6931472, %v2736_v27  ;;  %2749 = vlog2.f32 %v36_v58 }
  0x10   :  { %v2567_v26 = vclamps-f32 %v90_v22, 1.0  ;;  %v91_v31 = vmul.f32 0.1, %v71_v23  ;;  %v2740_v32 = vpop.eup %2739  ;;  %v73_v33 = vmul.f32 0.6931472, %v2738_v30  ;;  %2751 = vlog2.f32 %v37_v9  ;;  %v23_v22 = vld [vmem:[%s4767_s0 + $0x38] sm:$0xff] }
  0x11   :  { %227 = vrot.lane.b32.xlu0 %v2565_v25, %s3040_s5  ;;  %v2566_v36 = vclamps-f32 %v89_v28, 1.0  ;;  %v79_v40 = vmul.f32 0.6931472, %v2740_v32  ;;  %v94_v44 = vmul.f32 0.1, %v77_v37  ;;  %v2742_v48 = vpop.eup %2741  ;;  %2753 = vlog2.f32 %v35_v16  ;;  %v522_v16 = vld [vmem:[%s4768_s2 + $0x28] sm:$0xff] }
  0x12   :  { %231 = vrot.lane.b32.xlu1 %v2567_v26, %s3040_s5  ;;  %v92_v38 = vmul.f32 0.1, %v73_v33  ;;  %v2568_v39 = vclamps-f32 %v91_v31, 1.0  ;;  %v2744_v50 = vpop.eup %2743  ;;  %v51_v52 = vmul.f32 0.6931472, %v2742_v48  ;;  %v2575_v20 = vclamps-f32 %v130_v15, 1.0 }
  0x13   :  { %v95_v46 = vmul.f32 0.1, %v79_v40  ;;  %v2571_v49 = vclamps-f32 %v94_v44, 1.0  ;;  %v75_v54 = vmul.f32 0.6931472, %v2744_v50  ;;  %v2746_v55 = vpop.eup %2745  ;;  %v2574_v27 = vclamps-f32 %v129_v19, 1.0 }
  0x14   :  { %v2569_v43 = vclamps-f32 %v92_v38, 1.0  ;;  %v2748_v59 = vpop.eup %2747  ;;  %v81_v60 = vmul.f32 0.1, %v51_v52  ;;  %v53_v4 = vmul.f32 0.6931472, %v2746_v55 }
  0x15   :  { %v2572_v51 = vclamps-f32 %v95_v46, 1.0  ;;  %v93_v57 = vmul.f32 0.1, %v75_v54  ;;  %v49_v63 = vmul.f32 0.6931472, %v2748_v59  ;;  %v2750_v17 = vpop.eup %2749 }
  0x16   :  { %235 = vrot.lane.b32.xlu2 %v2569_v43, %s3040_s5  ;;  %v2558_v5 = vclamps-f32 %v81_v60, 1.0  ;;  %v82_v11 = vmul.f32 0.1, %v53_v4  ;;  %v57_v21 = vmul.f32 0.6931472, %v2750_v17  ;;  %v2752_v23 = vpop.eup %2751  ;;  %v194_v43 = vld [vmem:[%s4768_s2 + $0x8] sm:$0xff] }
  0x17   :  { %v2570_v61 = vclamps-f32 %v93_v57, 1.0  ;;  %v80_v8 = vmul.f32 0.1, %v49_v63  ;;  %v131_v25 = vmul.f32 22026.465, %v19_v13  ;;  %v2754_v28 = vpop.eup %2753  ;;  %2717 = vmatpush.msra.mxu2 %v194_v43  ;;  %290 = vmatpush.msra.mxu0 %v194_v43  ;;  %v3240_v43 = vld [vmem:[%s4769_s1 + $0x8] sm:$0xff] }
  0x18   :  { %v2559_v18 = vclamps-f32 %v82_v11, 1.0  ;;  %v39_v26 = vand.u32 2147483647, %v23_v22  ;;  %v84_v29 = vmul.f32 0.1, %v57_v21  ;;  %v523_v11 = vld [vmem:[%s4768_s2 + $0x30] sm:$0xff] }
  0x19   :  { %229 = vrot.lane.b32.xlu0 %v2566_v36, %s3040_s5  ;;  %v2557_v14 = vclamps-f32 %v80_v8, 1.0  ;;  %v55_v30 = vmul.f32 0.6931472, %v2754_v28  ;;  %v2576_v31 = vclamps-f32 %v131_v25, 1.0  ;;  %v59_v32 = vmul.f32 0.6931472, %v2752_v23 }
  0x1a   :  { %233 = vrot.lane.b32.xlu1 %v2568_v39, %s3040_s5  ;;  %2755 = vlog2.f32 %v39_v26  ;;  %v2561_v33 = vclamps-f32 %v84_v29, 1.0  ;;  %v38_v38 = vand.u32 2147483647, %v22_v35  ;;  %v133_v39 = vmul.f32 22026.465, %v21_v62  ;;  %v521_v21 = vld [vmem:[%s4768_s2 + $0x20] sm:$0xff] }
  0x1b   :  { %v83_v24 = vmul.f32 0.1, %v55_v30  ;;  %v85_v36 = vmul.f32 0.1, %v59_v32  ;;  %v132_v42 = vmul.f32 22026.465, %v20_v53 }
  0x1c   :  { %2757 = vlog2.f32 %v38_v38  ;;  %v2578_v44 = vclamps-f32 %v133_v39, 1.0  ;;  %v134_v47 = vmul.f32 22026.465, %v22_v35  ;;  %v136_v55 = vmul.f32 22026.465, %v3071_v0  ;;  %v359_v25 = vld [vmem:[%s4768_s2 + $0x18] sm:$0xff] }
  0x1d   :  { %v2560_v37 = vclamps-f32 %v83_v24, 1.0  ;;  %v2562_v41 = vclamps-f32 %v85_v36, 1.0  ;;  %v2577_v48 = vclamps-f32 %v132_v42, 1.0  ;;  %v137_v57 = vmul.f32 22026.465, %v3081_v2  ;;  %v358_v26 = vld [vmem:[%s4768_s2 + $0x10] sm:$0xff]  ;;  %2719 = vmatpush.msra.mxu3 %v359_v25  ;;  %454 = vmatpush.msra.mxu1 %v359_v25 }
  0x1e   :  { %237 = vrot.lane.b32.xlu2 %v2570_v61, %s3040_s5  ;;  %v2579_v52 = vclamps-f32 %v134_v47, 1.0  ;;  %v2581_v58 = vclamps-f32 %v136_v55, 1.0  ;;  %v135_v59 = vmul.f32 22026.465, %v23_v22  ;;  %v139_v61 = vmul.f32 22026.465, %v3089_v6 }
  0x1f   :  { %v2582_v60 = vclamps-f32 %v137_v57, 1.0  ;;  %v140_v63 = vmul.f32 22026.465, %v3107_v12  ;;  %v524_v12 = vld [vmem:[%s4768_s2 + $0x38] sm:$0xff]  ;;  %v143_v8 = vmul.f32 22026.465, %v3101_v10  ;;  %2720 = vmatpush.msra.mxu3 %v358_v26  ;;  %455 = vmatpush.msra.mxu1 %v358_v26 }
  0x20   :  { %v2756_v40 = vpop.eup %2755  ;;  %v2580_v62 = vclamps-f32 %v135_v59, 1.0  ;;  %v2584_v0 = vclamps-f32 %v139_v61, 1.0  ;;  %v141_v9 = vmul.f32 22026.465, %v3121_v34  ;;  %v3230_v39 = vld [vmem:[%s4769_s1] sm:$0xff]  ;;  %v3259_v47 = vld [vmem:[%s4769_s1 + $0x18] sm:$0xff] }
  0x21   :  { %239 = vrot.lane.b32.xlu0 %v2571_v49, %s3040_s5  ;;  %v63_v45 = vmul.f32 0.6931472, %v2756_v40  ;;  %v193_v49 = vld [vmem:[%s4768_s2] sm:$0xff]  ;;  %v2585_v2 = vclamps-f32 %v140_v63, 1.0  ;;  %v183_v55 = vld [vmem:[%s4769_s1 + $0x38] sm:$0xff] }
  0x22   :  { %241 = vrot.lane.b32.xlu1 %v2572_v51, %s3040_s5  ;;  %v2758_v46 = vpop.eup %2757  ;;  %2718 = vmatpush.msra.mxu2 %v193_v49 }
  0x23   :  { %v87_v50 = vmul.f32 0.1, %v63_v45  ;;  %v61_v51 = vmul.f32 0.6931472, %v2758_v46  ;;  %291 = vmatpush.msra.mxu0 %v193_v49  ;;  %v3250_v45 = vld [vmem:[%s4769_s1 + $0x10] sm:$0xff]  ;;  %v3267_v49 = vld [vmem:[%s4769_s1 + $0x20] sm:$0xff] }
  0x24   :  { %586 = vmatpush.msrb.mxu2 %v524_v12 }
  0x25   :  { %v86_v53 = vmul.f32 0.1, %v61_v51  ;;  %v2564_v54 = vclamps-f32 %v87_v50, 1.0  ;;  %v3275_v51 = vld [vmem:[%s4769_s1 + $0x28] sm:$0xff] }
  0x26   :  { %211 = vrot.lane.b32.xlu2 %v2557_v14, %s3040_s5  ;;  %587 = vmatpush.msrb.mxu2 %v523_v11 }
  0x27   :  { %v2563_v56 = vclamps-f32 %v86_v53, 1.0  ;;  %v3283_v53 = vld [vmem:[%s4769_s1 + $0x30] sm:$0xff] }
  0x28   :  { %588 = vmatpush.msrb.mxu2 %v522_v16 }
  0x29   :  { %376 = vrot.lane.b32.xlu0 %v2573_v3, %s3040_s5  ;;  %v138_v3 = vmul.f32 22026.465, %v3076_v1  ;;  %v2588_v1 = vclamps-f32 %v143_v8, 1.0 }
  0x2a   :  { %213 = vrot.lane.b32.xlu1 %v2558_v5, %s3040_s5  ;;  %v142_v5 = vmul.f32 22026.465, %v3094_v7  ;;  %v2586_v7 = vclamps-f32 %v141_v9, 1.0  ;;  %589 = vmatpush.msrb.mxu2 %v521_v21 }
  0x2b   :  { %v2583_v4 = vclamps-f32 %v138_v3, 1.0 }
  0x2c   :  { %v2587_v6 = vclamps-f32 %v142_v5, 1.0  ;;  %v190_v5 = vld [vmem:[%s4769_s1 + $0x70] sm:$0xff] }
  0x2e   :  { %378 = vrot.lane.b32.xlu2 %v2574_v27, %s3040_s5 }
  0x31   :  { %215 = vrot.lane.b32.xlu0 %v2559_v18, %s3040_s5 }
  0x32   :  { %380 = vrot.lane.b32.xlu1 %v2575_v20, %s3040_s5 }
  0x36   :  { %217 = vrot.lane.b32.xlu2 %v2560_v37, %s3040_s5 }
  0x39   :  { %382 = vrot.lane.b32.xlu0 %v2576_v31, %s3040_s5 }
  0x3a   :  { %219 = vrot.lane.b32.xlu1 %v2561_v33, %s3040_s5 }
  0x3e   :  { %384 = vrot.lane.b32.xlu2 %v2577_v48, %s3040_s5 }
  0x41   :  { %221 = vrot.lane.b32.xlu0 %v2562_v41, %s3040_s5 }
  0x42   :  { %386 = vrot.lane.b32.xlu1 %v2578_v44, %s3040_s5 }
  0x46   :  { %223 = vrot.lane.b32.xlu2 %v2563_v56, %s3040_s5  ;;  %v184_v56 = vld [vmem:[%s4769_s1 + $0x40] sm:$0xff] }
  0x49   :  { %388 = vrot.lane.b32.xlu0 %v2579_v52, %s3040_s5 }
  0x4a   :  { %225 = vrot.lane.b32.xlu1 %v2564_v54, %s3040_s5 }
  0x4e   :  { %390 = vrot.lane.b32.xlu2 %v2580_v62, %s3040_s5  ;;  %v187_v62 = vld [vmem:[%s4769_s1 + $0x58] sm:$0xff] }
  0x51   :  { %392 = vrot.lane.b32.xlu0 %v2581_v58, %s3040_s5  ;;  %v185_v58 = vld [vmem:[%s4769_s1 + $0x48] sm:$0xff] }
  0x52   :  { %394 = vrot.lane.b32.xlu1 %v2582_v60, %s3040_s5  ;;  %v186_v60 = vld [vmem:[%s4769_s1 + $0x50] sm:$0xff] }
  0x56   :  { %396 = vrot.lane.b32.xlu2 %v2583_v4, %s3040_s5 }
  0x59   :  { %398 = vrot.lane.b32.xlu0 %v2584_v0, %s3040_s5  ;;  %v188_v0 = vld [vmem:[%s4769_s1 + $0x60] sm:$0xff] }
  0x5a   :  { %400 = vrot.lane.b32.xlu1 %v2585_v2, %s3040_s5  ;;  %v189_v2 = vld [vmem:[%s4769_s1 + $0x68] sm:$0xff] }
  0x5e   :  { %402 = vrot.lane.b32.xlu2 %v2586_v7, %s3040_s5  ;;  %v3342_v7 = vld [vmem:[%s4768_s2 + $0x40] ss:$0 sm:$0xff] }
  0x61   :  { %404 = vrot.lane.b32.xlu0 %v2587_v6, %s3040_s5 }
  0x62   :  { %406 = vrot.lane.b32.xlu1 %v2588_v1, %s3040_s5  ;;  %v191_v1 = vld [vmem:[%s4769_s1 + $0x78] sm:$0xff] }
  0x70   :  { %v236_v13 = vpop.permute.xlu2 %235 }
  0x78   :  { %v238_v14 = vpop.permute.xlu2 %237 }
  0x80   :  { %v212_v34 = vpop.permute.xlu2 %211 }
  0x81   :  { %2589 = vmatmul.msk.f32.vlgmr.msra.gmra.mxu0 %vm243_vm0, %v212_v34 }
  0x83   :  { %v228_v15 = vpop.permute.xlu0 %227 }
  0x84   :  { %2597 = vmatmul.msk.f32.vlgmr.msra.gmra.mxu2 %vm243_vm0, %v228_v15  ;;  %v232_v10 = vpop.permute.xlu1 %231 }
  0x88   :  { %v379_v27 = vpop.permute.xlu2 %378 }
  0x8b   :  { %v230_v17 = vpop.permute.xlu0 %229 }
  0x8c   :  { %2598 = vmatmul.msk.f32.gmra.mxu2 %vm243_vm0, %v230_v17  ;;  %v234_v18 = vpop.permute.xlu1 %233 }
  0x90   :  { %v218_v30 = vpop.permute.xlu2 %217 }
  0x93   :  { %v240_v19 = vpop.permute.xlu0 %239 }
  0x94   :  { %2599 = vmatmul.msk.f32.gmra.mxu2 %vm243_vm0, %v232_v10  ;;  %v242_v20 = vpop.permute.xlu1 %241 }
  0x98   :  { %v385_v33 = vpop.permute.xlu2 %384 }
  0x9b   :  { %v377_v22 = vpop.permute.xlu0 %376 }
  0x9c   :  { %2600 = vmatmul.msk.f32.gmra.mxu2 %vm243_vm0, %v234_v18  ;;  %v214_v23 = vpop.permute.xlu1 %213  ;;  %2605 = vmatmul.msk.f32.vlgmr.msra.gmra.mxu1 %vm243_vm0, %v377_v22 }
  0x9d   :  { %2590 = vmatmul.msk.f32.gmra.mxu0 %vm243_vm0, %v214_v23 }
  0xa0   :  { %v224_v37 = vpop.permute.xlu2 %223 }
  0xa3   :  { %v216_v28 = vpop.permute.xlu0 %215 }
  0xa4   :  { %2601 = vmatmul.msk.f32.gmra.mxu2 %vm243_vm0, %v236_v13  ;;  %v381_v29 = vpop.permute.xlu1 %380  ;;  %2606 = vmatmul.msk.f32.gmra.mxu1 %vm243_vm0, %v379_v27 }
  0xa5   :  { %2591 = vmatmul.msk.f32.gmra.mxu0 %vm243_vm0, %v216_v28 }
  0xa8   :  { %v391_v41 = vpop.permute.xlu2 %390 }
  0xab   :  { %v383_v31 = vpop.permute.xlu0 %382 }
  0xac   :  { %2602 = vmatmul.msk.f32.gmra.mxu2 %vm243_vm0, %v238_v14  ;;  %v220_v32 = vpop.permute.xlu1 %219  ;;  %2607 = vmatmul.msk.f32.gmra.mxu1 %vm243_vm0, %v381_v29 }
  0xad   :  { %2592 = vmatmul.msk.f32.gmra.mxu0 %vm243_vm0, %v218_v30 }
  0xb0   :  { %v397_v44 = vpop.permute.xlu2 %396 }
  0xb3   :  { %v222_v24 = vpop.permute.xlu0 %221 }
  0xb4   :  { %2603 = vmatmul.msk.f32.gmra.mxu2 %vm243_vm0, %v240_v19  ;;  %v387_v35 = vpop.permute.xlu1 %386  ;;  %2608 = vmatmul.msk.f32.gmra.mxu1 %vm243_vm0, %v383_v31 }
  0xb5   :  { %2593 = vmatmul.msk.f32.gmra.mxu0 %vm243_vm0, %v220_v32 }
  0xb8   :  { %v403_v50 = vpop.permute.xlu2 %402 }
  0xbb   :  { %v389_v36 = vpop.permute.xlu0 %388 }
  0xbc   :  { %2604 = vmatmul.msk.f32.gmra.mxu2 %vm243_vm0, %v242_v20  ;;  %v226_v38 = vpop.permute.xlu1 %225  ;;  %2609 = vmatmul.msk.f32.gmra.mxu1 %vm243_vm0, %v385_v33 }
  0xbd   :  { %2594 = vmatmul.msk.f32.gmra.mxu0 %vm243_vm0, %v222_v24 }
  0xc3   :  { %v393_v40 = vpop.permute.xlu0 %392 }
  0xc4   :  { %2613 = vmatmul.msk.f32.vlgmr.msra.gmra.mxu3 %vm243_vm0, %v393_v40  ;;  %2621 = vmatmul.msk.f32.vlgmr.msrb.gmra.mxu2 %vm525_vm1, %v3230_v39  ;;  %v395_v42 = vpop.permute.xlu1 %394 }
  0xc5   :  { %2595 = vmatmul.msk.f32.gmra.mxu0 %vm243_vm0, %v224_v37  ;;  %2610 = vmatmul.msk.f32.gmra.mxu1 %vm243_vm0, %v387_v35 }
  0xcb   :  { %v399_v46 = vpop.permute.xlu0 %398 }
  0xcc   :  { %2614 = vmatmul.msk.f32.gmra.mxu3 %vm243_vm0, %v395_v42  ;;  %2622 = vmatmul.msk.f32.gmra.mxu2 %vm525_vm1, %v3240_v43  ;;  %v401_v48 = vpop.permute.xlu1 %400 }
  0xcd   :  { %2596 = vmatmul.msk.f32.gmra.mxu0 %vm243_vm0, %v226_v38  ;;  %2611 = vmatmul.msk.f32.gmra.mxu1 %vm243_vm0, %v389_v36 }
  0xd3   :  { %v405_v52 = vpop.permute.xlu0 %404 }
  0xd4   :  { %2615 = vmatmul.msk.f32.gmra.mxu3 %vm243_vm0, %v397_v44  ;;  %2623 = vmatmul.msk.f32.gmra.mxu2 %vm525_vm1, %v3250_v45  ;;  %v407_v54 = vpop.permute.xlu1 %406 }
  0xd5   :  { %2612 = vmatmul.msk.f32.gmra.mxu1 %vm243_vm0, %v391_v41 }
  0xdc   :  { %2616 = vmatmul.msk.f32.gmra.mxu3 %vm243_vm0, %v399_v46  ;;  %2624 = vmatmul.msk.f32.gmra.mxu2 %vm525_vm1, %v3259_v47 }
  0xe4   :  { %2617 = vmatmul.msk.f32.gmra.mxu3 %vm243_vm0, %v401_v48  ;;  %2625 = vmatmul.msk.f32.gmra.mxu2 %vm525_vm1, %v3267_v49 }
  0xec   :  { %2618 = vmatmul.msk.f32.gmra.mxu3 %vm243_vm0, %v403_v50  ;;  %2626 = vmatmul.msk.f32.gmra.mxu2 %vm525_vm1, %v3275_v51 }
  0xf4   :  { %2619 = vmatmul.msk.f32.gmra.mxu3 %vm243_vm0, %v405_v52  ;;  %2627 = vmatmul.msk.f32.gmra.mxu2 %vm525_vm1, %v3283_v53 }
  0xfc   :  { %2620 = vmatmul.msk.f32.gmra.mxu3 %vm243_vm0, %v407_v54  ;;  %2628 = vmatmul.msk.f32.gmra.mxu2 %vm525_vm1, %v183_v55 }
  0xfe   :  { %v293_v6 = vpop.f32.mrf.mxu0 }
  0xff   :  { %v342_v14 = vadd.f32 %v3342_v7, %v293_v6 }
 0x104   :  { %2629 = vmatmul.msk.f32.gmra.mxu2 %vm525_vm1, %v184_v56 }
 0x107   :  { %v3297_v57 = vpop.f32.mrf.mxu2 }
 0x10c   :  { %2630 = vmatmul.msk.f32.gmra.mxu2 %vm525_vm1, %v185_v58 }
 0x10f   :  { %v3303_v59 = vpop.f32.mrf.mxu2 }
 0x114   :  { %2631 = vmatmul.msk.f32.gmra.mxu2 %vm525_vm1, %v186_v60 }
 0x117   :  { %v3309_v61 = vpop.f32.mrf.mxu2 }
 0x119   :  { %v457_v12 = vpop.f32.mrf.mxu1 }
 0x11a   :  { %v296_v9 = vpop.f32.mrf.mxu0  ;;  %v505_v15 = vadd.f32 %v457_v12, %v342_v14 }
 0x11b   :  { %v343_v17 = vadd.f32 %v3342_v7, %v296_v9 }
 0x11c   :  { %2632 = vmatmul.msk.f32.gmra.mxu2 %vm525_vm1, %v187_v62 }
 0x11f   :  { %v3315_v63 = vpop.f32.mrf.mxu2 }
 0x121   :  { %v460_v13 = vpop.f32.mrf.mxu1 }
 0x122   :  { %v299_v10 = vpop.f32.mrf.mxu0  ;;  %v506_v19 = vadd.f32 %v460_v13, %v343_v17 }
 0x123   :  { %v344_v25 = vadd.f32 %v3342_v7, %v299_v10 }
 0x124   :  { %2633 = vmatmul.msk.f32.gmra.mxu2 %vm525_vm1, %v188_v0 }
 0x127   :  { %v3321_v3 = vpop.f32.mrf.mxu2 }
 0x129   :  { %v463_v18 = vpop.f32.mrf.mxu1 }
 0x12a   :  { %v302_v21 = vpop.f32.mrf.mxu0  ;;  %v507_v27 = vadd.f32 %v463_v18, %v344_v25 }
 0x12b   :  { %v345_v31 = vadd.f32 %v3342_v7, %v302_v21 }
 0x12c   :  { %2634 = vmatmul.msk.f32.gmra.mxu2 %vm525_vm1, %v189_v2 }
 0x12f   :  { %v3327_v4 = vpop.f32.mrf.mxu2 }
 0x131   :  { %v466_v26 = vpop.f32.mrf.mxu1 }
 0x132   :  { %v305_v32 = vpop.f32.mrf.mxu0  ;;  %v508_v24 = vadd.f32 %v466_v26, %v345_v31 }
 0x133   :  { %v346_v38 = vadd.f32 %v3342_v7, %v305_v32 }
 0x134   :  { %2635 = vmatmul.msk.f32.gmra.mxu2 %vm525_vm1, %v190_v5 }
 0x137   :  { %v3333_v8 = vpop.f32.mrf.mxu2 }
 0x139   :  { %v469_v33 = vpop.f32.mrf.mxu1 }
 0x13a   :  { %v308_v40 = vpop.f32.mrf.mxu0  ;;  %v509_v41 = vadd.f32 %v469_v33, %v346_v38 }
 0x13b   :  { %v347_v50 = vadd.f32 %v3342_v7, %v308_v40 }
 0x13c   :  { %2636 = vmatmul.msk.f32.gmra.mxu2 %vm525_vm1, %v191_v1 }
 0x13f   :  { %v3344_v11 = vpop.f32.mrf.mxu2 }
 0x142   :  { %v472_v44 = vpop.f32.mrf.mxu1  ;;  %v311_v54 = vpop.f32.mrf.mxu0 }
 0x143   :  { %v510_v52 = vadd.f32 %v472_v44, %v347_v50  ;;  %v348_v60 = vadd.f32 %v3342_v7, %v311_v54 }
 0x147   :  { %v591_v16 = vpop.f32.mrf.mxu2 }
 0x148   :  { %v639_v34 = vadd.f32 %v591_v16, %v505_v15 }
 0x14a   :  { %2759 = vtanh.f32 %v639_v34  ;;  %v475_v62 = vpop.f32.mrf.mxu1  ;;  %v2637_v12 = vmul.f32 -1.442695, %v639_v34  ;;  %v314_v18 = vpop.f32.mrf.mxu0 }
 0x14b   :  { %v511_v0 = vadd.f32 %v475_v62, %v348_v60  ;;  %v349_v21 = vadd.f32 %v3342_v7, %v314_v18 }
 0x14f   :  { %v594_v20 = vpop.f32.mrf.mxu2 }
 0x150   :  { %v2760_v22 = vpop.eup %2759  ;;  %v640_v23 = vadd.f32 %v594_v20, %v506_v19 }
 0x151   :  { %1007 = vrot.lane.b32.xlu2 %v2760_v22, %s3041_s20 }
 0x152   :  { %2761 = vtanh.f32 %v640_v23  ;;  %v2638_v17 = vmul.f32 -1.442695, %v640_v23  ;;  %v478_v22 = vpop.f32.mrf.mxu1 }
 0x157   :  { %v597_v28 = vpop.f32.mrf.mxu2 }
 0x158   :  { %v2762_v29 = vpop.eup %2761  ;;  %v641_v30 = vadd.f32 %v597_v28, %v507_v27  ;;  %v512_v27 = vadd.f32 %v478_v22, %v349_v21 }
 0x159   :  { %1009 = vrot.lane.b32.xlu0 %v2762_v29, %s3041_s20 }
 0x15a   :  { %2763 = vtanh.f32 %v641_v30  ;;  %v2639_v29 = vmul.f32 -1.442695, %v641_v30 }
 0x15f   :  { %v600_v35 = vpop.f32.mrf.mxu2 }
 0x160   :  { %v2764_v36 = vpop.eup %2763  ;;  %v642_v37 = vadd.f32 %v600_v35, %v508_v24  ;;  %v3372_v35 = vpop.f32.mrf.mxu3 }
 0x161   :  { %1011 = vrot.lane.b32.xlu1 %v2764_v36, %s3041_s20 }
 0x162   :  { %2765 = vtanh.f32 %v642_v37  ;;  %v2640_v15 = vmul.f32 -1.442695, %v642_v37 }
 0x167   :  { %v603_v42 = vpop.f32.mrf.mxu2 }
 0x168   :  { %v2766_v46 = vpop.eup %2765  ;;  %v3354_v48 = vadd.f32 %v603_v42, %v509_v41 }
 0x169   :  { %1013 = vrot.lane.b32.xlu2 %v2766_v46, %s3041_s20 }
 0x16a   :  { %2767 = vtanh.f32 %v3354_v48 }
 0x16f   :  { %v606_v55 = vpop.f32.mrf.mxu2 }
 0x170   :  { %v2768_v56 = vpop.eup %2767  ;;  %v3359_v58 = vadd.f32 %v606_v55, %v510_v52  ;;  %v3386_v52 = vpop.f32.mrf.mxu3 }
 0x171   :  { %1015 = vrot.lane.b32.xlu0 %v2768_v56, %s3041_s20  ;;  %v2641_v56 = vmul.f32 -1.442695, %v3354_v48 }
 0x172   :  { %2769 = vtanh.f32 %v3359_v58  ;;  %v2642_v48 = vmul.f32 -1.442695, %v3359_v58 }
 0x177   :  { %v609_v2 = vpop.f32.mrf.mxu2 }
 0x178   :  { %v2770_v5 = vpop.eup %2769  ;;  %v3364_v6 = vadd.f32 %v609_v2, %v511_v0 }
 0x179   :  { %1017 = vrot.lane.b32.xlu1 %v2770_v5, %s3041_s20 }
 0x17a   :  { %2771 = vtanh.f32 %v3364_v6 }
 0x17b   :  { %2773 = vpow2.f32 %v2637_v12 }
 0x17f   :  { %v612_v34 = vpop.f32.mrf.mxu2 }
 0x180   :  { %v2772_v1 = vpop.eup %2771  ;;  %v3370_v24 = vadd.f32 %v612_v34, %v512_v27  ;;  %v2643_v27 = vmul.f32 -1.442695, %v3364_v6 }
 0x181   :  { %1019 = vrot.lane.b32.xlu0 %v2772_v1, %s3041_s20  ;;  %v2774_v9 = vpop.eup %2773 }
 0x182   :  { %v703_v13 = vadd.f32 1.0, %v2774_v9 }
 0x184   :  { %2775 = vrcp.f32 %v703_v13  ;;  %v730_v28 = vand.u32 2147483648, %v703_v13  ;;  %vm724_vm3 = vweird.f32 %v703_v13  ;;  %v728_v31 = vand.u32 2147483647, %v703_v13 }
 0x185   :  { %2777 = vpow2.f32 %v2640_v15  ;;  %v352_v15 = vadd.f32 %v3342_v7, %v3309_v61 }
 0x186   :  { %2779 = vpow2.f32 %v2638_v17  ;;  %v731_v33 = vor.u32 1.1754944e-38, %v730_v28  ;;  %vm729_vm5 = vcmp.eq.f32.partialorder %v728_v31, 8.507059e+37 }
 0x187   :  { %v3378_v40 = vpop.f32.mrf.mxu2 }
 0x18a   :  { %v2776_v14 = vpop.eup %2775 }
 0x18b   :  { %v720_v10 = vmul.f32 %v2776_v14, %v703_v13  ;;  %v2778_v19 = vpop.eup %2777  ;;  %vm725_vm2 = vweird.f32 %v2776_v14  ;;  %v487_v13 = vpop.f32.mrf.mxu3 }
 0x18c   :  { %v706_v25 = vadd.f32 1.0, %v2778_v19  ;;  %vm726_vm4 = vmor %vm724_vm3, %vm725_vm2  ;;  %v2780_v32 = vpop.eup %2779 }
 0x18d   :  { %v721_v16 = vsub.f32 1.0, %v720_v10  ;;  %v3374_v36 = vadd.f32 1.0, %v2780_v32  ;;  %v350_v32 = vadd.f32 %v3342_v7, %v3297_v57 }
 0x18e   :  { %2781 = vrcp.f32 %v706_v25  ;;  %vm769_vm6 = vweird.f32 %v706_v25  ;;  %v775_v2 = vand.u32 2147483648, %v706_v25  ;;  %v773_v12 = vand.u32 2147483647, %v706_v25 }
 0x18f   :  { %v722_v20 = vmul.f32 %v2776_v14, %v721_v16  ;;  %2783 = vpow2.f32 %v2639_v29  ;;  %v3389_v60 = vpop.f32.mrf.mxu2  ;;  %v745_v28 = vand.u32 2147483648, %v3374_v36  ;;  %vm739_vm11 = vweird.f32 %v3374_v36 }
 0x190   :  { %2785 = vtanh.f32 %v3370_v24  ;;  %v776_v10 = vor.u32 1.1754944e-38, %v775_v2  ;;  %vm774_vm9 = vcmp.eq.f32.partialorder %v773_v12, 8.507059e+37  ;;  %v743_v29 = vand.u32 2147483647, %v3374_v36 }
 0x191   :  { %v723_v26 = vadd.f32 %v2776_v14, %v722_v20  ;;  %2787 = vrcp.f32 %v3374_v36  ;;  %v515_v20 = vadd.f32 %v487_v13, %v352_v15 }
 0x192   :  { %vm744_vm13 = vcmp.eq.f32.partialorder %v743_v29, 8.507059e+37 }
 0x193   :  { %v727_v23 = vsel %vm726_vm4, %v2776_v14, %v723_v26 }
 0x194   :  { %v3376_v37 = vsel %vm729_vm5, %v731_v33, %v727_v23  ;;  %v2782_v41 = vpop.eup %2781  ;;  %v513_v33 = vadd.f32 %v3372_v35, %v350_v32 }
 0x195   :  { %v2784_v42 = vpop.eup %2783  ;;  %v765_v44 = vmul.f32 %v2782_v41, %v706_v25  ;;  %vm770_vm7 = vweird.f32 %v2782_v41 }
 0x196   :  { %v2786_v46 = vpop.eup %2785  ;;  %v3384_v50 = vadd.f32 1.0, %v2784_v42  ;;  %vm771_vm8 = vmor %vm769_vm6, %vm770_vm7 }
 0x197   :  { %v766_v54 = vsub.f32 1.0, %v765_v44  ;;  %v2788_v55 = vpop.eup %2787  ;;  %v621_v16 = vpop.f32.mrf.mxu2 }
 0x198   :  { %2789 = vrcp.f32 %v3384_v50  ;;  %v735_v0 = vmul.f32 %v2788_v55, %v3374_v36  ;;  %v3403_v34 = vadd.f32 %v621_v16, %v515_v20  ;;  %vm740_vm10 = vweird.f32 %v2788_v55  ;;  %v490_v16 = vpop.f32.mrf.mxu3 }
 0x199   :  { %v767_v62 = vmul.f32 %v2782_v41, %v766_v54  ;;  %2791 = vpow2.f32 %v2641_v56  ;;  %vm741_vm12 = vmor %vm739_vm11, %vm740_vm10  ;;  %vm754_vm14 = vweird.f32 %v3384_v50  ;;  %v3424_v36 = vadd.f32 %v3378_v40, %v513_v33 }
 0x19a   :  { %v736_v1 = vsub.f32 1.0, %v735_v0  ;;  %2793 = vpow2.f32 %v2642_v48  ;;  %v760_v42 = vand.u32 2147483648, %v3384_v50  ;;  %v758_v54 = vand.u32 2147483647, %v3384_v50 }
 0x19b   :  { %v768_v5 = vadd.f32 %v2782_v41, %v767_v62  ;;  %v351_v62 = vadd.f32 %v3342_v7, %v3303_v59 }
 0x19c   :  { %v737_v18 = vmul.f32 %v2788_v55, %v736_v1  ;;  %v761_v0 = vor.u32 1.1754944e-38, %v760_v42  ;;  %vm759_vm3 = vcmp.eq.f32.partialorder %v758_v54, 8.507059e+37 }
 0x19d   :  { %v772_v17 = vsel %vm771_vm8, %v2782_v41, %v768_v5  ;;  %v514_v5 = vadd.f32 %v3386_v52, %v351_v62 }
 0x19e   :  { %v3394_v9 = vpop.eup %2789  ;;  %v3405_v58 = vsel %vm774_vm9, %v776_v10, %v772_v17  ;;  %v738_v61 = vadd.f32 %v2788_v55, %v737_v18 }
 0x19f   :  { %v2792_v14 = vpop.eup %2791  ;;  %v750_v19 = vmul.f32 %v3394_v9, %v3384_v50  ;;  %vm755_vm15 = vweird.f32 %v3394_v9  ;;  %v3450_v1 = vadd.f32 %v3389_v60, %v514_v5  ;;  %v624_v52 = vpop.f32.mrf.mxu2 }
 0x1a0   :  { %v3401_v21 = vadd.f32 1.0, %v2792_v14  ;;  %v2794_v31 = vpop.eup %2793  ;;  %v742_v23 = vsel %vm741_vm12, %v2788_v55, %v738_v61  ;;  %vm3432_vm2 = vmor %vm754_vm14, %vm755_vm15 }
 0x1a1   :  { %v751_v26 = vsub.f32 1.0, %v750_v19 }
 0x1a2   :  { %2795 = vrcp.f32 %v3401_v21  ;;  %vm784_vm4 = vweird.f32 %v3401_v21  ;;  %v790_v17 = vand.u32 2147483648, %v3401_v21  ;;  %v788_v20 = vand.u32 2147483647, %v3401_v21 }
 0x1a3   :  { %2797 = vtanh.f32 %v3403_v34  ;;  %v752_v6 = vmul.f32 %v3394_v9, %v751_v26  ;;  %v353_v26 = vadd.f32 %v3342_v7, %v3315_v63 }
 0x1a4   :  { %2799 = vpow2.f32 %v2643_v27  ;;  %v791_v27 = vor.u32 1.1754944e-38, %v790_v17  ;;  %vm789_vm7 = vcmp.eq.f32.partialorder %v788_v20, 8.507059e+37 }
 0x1a5   :  { %v516_v32 = vadd.f32 %v490_v16, %v353_v26  ;;  %v355_v16 = vadd.f32 %v3342_v7, %v3327_v4  ;;  %v356_v4 = vadd.f32 %v3342_v7, %v3333_v8 }
 0x1a7   :  { %v3478_v33 = vadd.f32 %v624_v52, %v516_v32  ;;  %v357_v32 = vadd.f32 %v3342_v7, %v3344_v11 }
 0x1a8   :  { %v2796_v44 = vpop.eup %2795 }
 0x1a9   :  { %v2798_v55 = vpop.eup %2797  ;;  %v780_v2 = vmul.f32 %v2796_v44, %v3401_v21  ;;  %vm785_vm5 = vweird.f32 %v2796_v44 }
 0x1aa   :  { %v2800_v40 = vpop.eup %2799  ;;  %vm3465_vm6 = vmor %vm784_vm4, %vm785_vm5 }
 0x1ab   :  { %v1008_v38 = vpop.permute.xlu2 %1007  ;;  %v3447_v12 = vadd.f32 1.0, %v2800_v40  ;;  %v781_v15 = vsub.f32 1.0, %v780_v2 }
 0x1ac   :  { %v1055_v30 = vmul.f32 %v1008_v38, %v3376_v37  ;;  %v746_v38 = vor.u32 1.1754944e-38, %v745_v28  ;;  %v493_v28 = vpop.f32.mrf.mxu3 }
 0x1ad   :  { %v782_v60 = vmul.f32 %v2796_v44, %v781_v15  ;;  %vm814_vm12 = vweird.f32 %v3447_v12  ;;  %v818_v15 = vand.u32 2147483647, %v3447_v12 }
 0x1ae   :  { %1087 = vrot.lane.b32.xlu2 %v1055_v30, %s3041_s20  ;;  %v3419_v30 = vadd.f32 1.0, %v2794_v31  ;;  %v3426_v41 = vsel %vm744_vm13, %v746_v38, %v742_v23  ;;  %v627_v23 = vpop.f32.mrf.mxu2 }
 0x1af   :  { %v783_v19 = vadd.f32 %v2796_v44, %v782_v60  ;;  %vm819_vm15 = vcmp.eq.f32.partialorder %v818_v15, 8.507059e+37 }
 0x1b0   :  { %2801 = vrcp.f32 %v3419_v30  ;;  %vm799_vm8 = vweird.f32 %v3419_v30 }
 0x1b1   :  { %2803 = vtanh.f32 %v3424_v36  ;;  %v787_v29 = vsel %vm3465_vm6, %v2796_v44, %v783_v19 }
 0x1b2   :  { %2805 = vrcp.f32 %v3447_v12  ;;  %v3480_v38 = vsel %vm789_vm7, %v791_v27, %v787_v29 }
 0x1b3   :  { %2807 = vtanh.f32 %v3450_v1 }
 0x1b4   :  { %v496_v62 = vpop.f32.mrf.mxu3 }
 0x1b5   :  { %v518_v17 = vadd.f32 %v496_v62, %v355_v16  ;;  %v2648_v16 = vmul.f32 -1.442695, %v3478_v33 }
 0x1b6   :  { %1021 = vrot.lane.b32.xlu2 %v2786_v46, %s3041_s20  ;;  %v753_v46 = vadd.f32 %v3394_v9, %v752_v6  ;;  %v2802_v59 = vpop.eup %2801  ;;  %v2644_v6 = vmul.f32 -1.442695, %v3370_v24  ;;  %v354_v24 = vadd.f32 %v3342_v7, %v3321_v3  ;;  %v820_v3 = vand.u32 2147483648, %v3447_v12 }
 0x1b7   :  { %v2804_v10 = vpop.eup %2803  ;;  %vm800_vm9 = vweird.f32 %v2802_v59 }
 0x1b8   :  { %v757_v50 = vsel %vm3432_vm2, %v3394_v9, %v753_v46  ;;  %v795_v9 = vmul.f32 %v2802_v59, %v3419_v30  ;;  %v3462_v18 = vpop.eup %2805  ;;  %vm3485_vm10 = vmor %vm799_vm8, %vm800_vm9  ;;  %2809 = vpow2.f32 %v2644_v6  ;;  %v517_v40 = vadd.f32 %v493_v28, %v354_v24 }
 0x1b9   :  { %v3452_v13 = vsel %vm759_vm3, %v761_v0, %v757_v50  ;;  %v810_v21 = vmul.f32 %v3462_v18, %v3447_v12  ;;  %2811 = vtanh.f32 %v3478_v33  ;;  %vm815_vm13 = vweird.f32 %v3462_v18 }
 0x1ba   :  { %v3498_v0 = vadd.f32 %v627_v23, %v517_v40  ;;  %vm816_vm14 = vmor %vm814_vm12, %vm815_vm13  ;;  %v821_v52 = vor.u32 1.1754944e-38, %v820_v3  ;;  %v2646_v3 = vmul.f32 -1.442695, %v3450_v1  ;;  %v976_v33 = vmul.f32 %v3426_v41, %v3240_v43 }
 0x1bb   :  { %v811_v46 = vsub.f32 1.0, %v810_v21 }
 0x1bc   :  { %2813 = vtanh.f32 %v3498_v0 }
 0x1c3   :  { %v1014_v22 = vpop.permute.xlu2 %1013 }
 0x1c4   :  { %v1058_v25 = vmul.f32 %v1014_v22, %v3405_v58  ;;  %v796_v22 = vsub.f32 1.0, %v795_v9 }
 0x1c6   :  { %1093 = vrot.lane.b32.xlu2 %v1058_v25, %s3041_s20  ;;  %v2808_v25 = vpop.eup %2807  ;;  %v797_v31 = vmul.f32 %v2802_v59, %v796_v22  ;;  %v499_v22 = vpop.f32.mrf.mxu3 }
 0x1c7   :  { %v2810_v5 = vpop.eup %2809 }
 0x1c8   :  { %v798_v44 = vadd.f32 %v2802_v59, %v797_v31  ;;  %v710_v60 = vadd.f32 1.0, %v2810_v5 }
 0x1ca   :  { %v802_v56 = vsel %vm3485_vm10, %v2802_v59, %v798_v44  ;;  %2815 = vrcp.f32 %v710_v60  ;;  %v975_v44 = vmul.f32 %v3376_v37, %v3230_v39  ;;  %vm829_vm2 = vweird.f32 %v710_v60 }
 0x1cb   :  { %v1010_v57 = vpop.permute.xlu0 %1009  ;;  %v835_v7 = vand.u32 2147483648, %v710_v60  ;;  %v833_v54 = vand.u32 2147483647, %v710_v60 }
 0x1cc   :  { %v1056_v35 = vmul.f32 %v1010_v57, %v3426_v41  ;;  %v805_v57 = vand.u32 2147483648, %v3419_v30 }
 0x1cd   :  { %v836_v24 = vor.u32 1.1754944e-38, %v835_v7  ;;  %vm834_vm5 = vcmp.eq.f32.partialorder %v833_v54, 8.507059e+37 }
 0x1ce   :  { %1089 = vrot.lane.b32.xlu1 %v1056_v35, %s3041_s20  ;;  %1027 = vrot.lane.b32.xlu2 %v2798_v55, %s3041_s20  ;;  %v803_v35 = vand.u32 2147483647, %v3419_v30  ;;  %v806_v55 = vor.u32 1.1754944e-38, %v805_v57  ;;  %v812_v30 = vmul.f32 %v3462_v18, %v811_v46  ;;  %v502_v21 = vpop.f32.mrf.mxu3 }
 0x1cf   :  { %v520_v6 = vadd.f32 %v502_v21, %v357_v32 }
 0x1d0   :  { %vm804_vm11 = vcmp.eq.f32.partialorder %v803_v35, 8.507059e+37 }
 0x1d1   :  { %v3500_v2 = vsel %vm804_vm11, %v806_v55, %v802_v56 }
 0x1d3   :  { %v1012_v48 = vpop.permute.xlu1 %1011 }
 0x1d4   :  { %v1057_v14 = vmul.f32 %v1012_v48, %v3452_v13  ;;  %v630_v48 = vpop.f32.mrf.mxu2 }
 0x1d5   :  { %v3512_v19 = vadd.f32 %v630_v48, %v518_v17 }
 0x1d6   :  { %1023 = vrot.lane.b32.xlu1 %v2804_v10, %s3041_s20  ;;  %1091 = vrot.lane.b32.xlu0 %v1057_v14, %s3041_s20  ;;  %v813_v14 = vadd.f32 %v3462_v18, %v812_v30  ;;  %v2812_v10 = vpop.eup %2811 }
 0x1d7   :  { %v2814_v61 = vpop.eup %2813  ;;  %2817 = vtanh.f32 %v3512_v19 }
 0x1d8   :  { %v817_v9 = vsel %vm816_vm14, %v3462_v18, %v813_v14  ;;  %v519_v18 = vadd.f32 %v499_v22, %v356_v4  ;;  %v2816_v27 = vpop.eup %2815 }
 0x1d9   :  { %v3514_v20 = vsel %vm819_vm15, %v821_v52, %v817_v9  ;;  %v825_v31 = vmul.f32 %v2816_v27, %v710_v60  ;;  %vm830_vm3 = vweird.f32 %v2816_v27 }
 0x1da   :  { %vm831_vm4 = vmor %vm829_vm2, %vm830_vm3 }
 0x1dc   :  { %v633_v26 = vpop.f32.mrf.mxu2 }
 0x1dd   :  { %v3522_v28 = vadd.f32 %v633_v26, %v519_v18  ;;  %v2818_v29 = vpop.eup %2817 }
 0x1de   :  { %1025 = vrot.lane.b32.xlu0 %v2808_v25, %s3041_s20 }
 0x1df   :  { %2819 = vtanh.f32 %v3522_v28 }
 0x1e3   :  { %v1016_v63 = vpop.permute.xlu0 %1015 }
 0x1e4   :  { %v1059_v42 = vmul.f32 %v1016_v63, %v3480_v38  ;;  %v636_v23 = vpop.f32.mrf.mxu2  ;;  %v826_v63 = vsub.f32 1.0, %v825_v31 }
 0x1e5   :  { %v3528_v8 = vadd.f32 %v636_v23, %v520_v6  ;;  %v2820_v57 = vpop.eup %2819 }
 0x1e6   :  { %1095 = vrot.lane.b32.xlu1 %v1059_v42, %s3041_s20  ;;  %v827_v42 = vmul.f32 %v2816_v27, %v826_v63 }
 0x1e7   :  { %2821 = vtanh.f32 %v3528_v8 }
 0x1e8   :  { %v828_v46 = vadd.f32 %v2816_v27, %v827_v42 }
 0x1ea   :  { %v832_v56 = vsel %vm831_vm4, %v2816_v27, %v828_v46 }
 0x1eb   :  { %v1018_v50 = vpop.permute.xlu1 %1017  ;;  %v3538_v30 = vsel %vm834_vm5, %v836_v24, %v832_v56  ;;  %v2651_v56 = vmul.f32 -1.442695, %v3522_v28 }
 0x1ec   :  { %v1060_v59 = vmul.f32 %v1018_v50, %v3500_v2  ;;  %v2645_v50 = vmul.f32 -1.442695, %v3424_v36 }
 0x1ed   :  { %v2822_v55 = vpop.eup %2821 }
 0x1ee   :  { %1097 = vrot.lane.b32.xlu0 %v1060_v59, %s3041_s20  ;;  %1029 = vrot.lane.b32.xlu1 %v2812_v10, %s3041_s20  ;;  %v2647_v59 = vmul.f32 -1.442695, %v3403_v34  ;;  %v2649_v34 = vmul.f32 -1.442695, %v3498_v0 }
 0x1f3   :  { %v1020_v12 = vpop.permute.xlu0 %1019 }
 0x1f4   :  { %v1061_v25 = vmul.f32 %v1020_v12, %v3514_v20 }
 0x1f6   :  { %1031 = vrot.lane.b32.xlu1 %v2814_v61, %s3041_s20  ;;  %1099 = vrot.lane.b32.xlu2 %v1061_v25, %s3041_s20 }
 0x1fe   :  { %1033 = vrot.lane.b32.xlu1 %v2818_v29, %s3041_s20  ;;  %v2650_v29 = vmul.f32 -1.442695, %v3512_v19  ;;  %v977_v19 = vmul.f32 %v3452_v13, %v3250_v45 }
 0x206   :  { %1035 = vrot.lane.b32.xlu1 %v2820_v57, %s3041_s20 }
 0x208   :  { %v1088_v35 = vpop.permute.xlu2 %1087 }
 0x209   :  { %v3534_v11 = vadd.f32 %v1088_v35, %v975_v44 }
 0x20b   :  { %2823 = vtanh.f32 %v3534_v11 }
 0x20c   :  { %2825 = vpow2.f32 %v2645_v50  ;;  %v978_v50 = vmul.f32 %v3405_v58, %v3259_v47 }
 0x20d   :  { %2827 = vpow2.f32 %v2646_v3 }
 0x20e   :  { %1037 = vrot.lane.b32.xlu1 %v2822_v55, %s3041_s20 }
 0x210   :  { %v1022_v39 = vpop.permute.xlu2 %1021 }
 0x211   :  { %v2824_v40 = vpop.eup %2823  ;;  %v1062_v62 = vmul.f32 %v1022_v39, %v3538_v30 }
 0x212   :  { %1183 = vrot.lane.b32.xlu0 %v2824_v40, %s3041_s20  ;;  %v2826_v5 = vpop.eup %2825 }
 0x213   :  { %1101 = vrot.lane.b32.xlu2 %v1062_v62, %s3041_s20  ;;  %v711_v48 = vadd.f32 1.0, %v2826_v5  ;;  %v2828_v14 = vpop.eup %2827 }
 0x214   :  { %v3546_v15 = vadd.f32 1.0, %v2828_v14 }
 0x215   :  { %2829 = vrcp.f32 %v711_v48  ;;  %v850_v27 = vand.u32 2147483648, %v711_v48  ;;  %vm844_vm7 = vweird.f32 %v711_v48  ;;  %v848_v31 = vand.u32 2147483647, %v711_v48 }
 0x216   :  { %2831 = vpow2.f32 %v2647_v59  ;;  %v865_v45 = vand.u32 2147483648, %v3546_v15  ;;  %vm859_vm11 = vweird.f32 %v3546_v15  ;;  %v863_v39 = vand.u32 2147483647, %v3546_v15 }
 0x217   :  { %2833 = vrcp.f32 %v3546_v15  ;;  %v851_v6 = vor.u32 1.1754944e-38, %v850_v27  ;;  %vm849_vm9 = vcmp.eq.f32.partialorder %v848_v31, 8.507059e+37 }
 0x218   :  { %2835 = vpow2.f32 %v2648_v16  ;;  %vm864_vm13 = vcmp.eq.f32.partialorder %v863_v39, 8.507059e+37 }
 0x21b   :  { %v2830_v10 = vpop.eup %2829 }
 0x21c   :  { %v2832_v52 = vpop.eup %2831  ;;  %v840_v36 = vmul.f32 %v2830_v10, %v711_v48  ;;  %vm845_vm6 = vweird.f32 %v2830_v10  ;;  %v866_v48 = vor.u32 1.1754944e-38, %v865_v45 }
 0x21d   :  { %v3550_v60 = vadd.f32 1.0, %v2832_v52  ;;  %v3552_v9 = vpop.eup %2833  ;;  %vm846_vm8 = vmor %vm844_vm7, %vm845_vm6 }
 0x21e   :  { %v841_v1 = vsub.f32 1.0, %v840_v36  ;;  %v2836_v17 = vpop.eup %2835  ;;  %v855_v22 = vmul.f32 %v3552_v9, %v3546_v15  ;;  %vm860_vm10 = vweird.f32 %v3552_v9 }
 0x21f   :  { %2837 = vrcp.f32 %v3550_v60  ;;  %v3560_v25 = vadd.f32 1.0, %v2836_v17  ;;  %vm861_vm12 = vmor %vm859_vm11, %vm860_vm10  ;;  %vm874_vm15 = vweird.f32 %v3550_v60  ;;  %v878_v17 = vand.u32 2147483647, %v3550_v60 }
 0x220   :  { %v842_v12 = vmul.f32 %v2830_v10, %v841_v1  ;;  %2839 = vpow2.f32 %v2649_v34  ;;  %v856_v18 = vsub.f32 1.0, %v855_v22  ;;  %v1094_v40 = vpop.permute.xlu2 %1093  ;;  %v2652_v34 = vmul.f32 -1.442695, %v3528_v8 }
 0x221   :  { %v3601_v59 = vadd.f32 %v1094_v40, %v978_v50  ;;  %vm879_vm3 = vcmp.eq.f32.partialorder %v878_v17, 8.507059e+37  ;;  %vm889_vm5 = vweird.f32 %v3560_v25 }
 0x222   :  { %v843_v4 = vadd.f32 %v2830_v10, %v842_v12  ;;  %v857_v23 = vmul.f32 %v3552_v9, %v856_v18 }
 0x224   :  { %v847_v32 = vsel %vm846_vm8, %v2830_v10, %v843_v4  ;;  %v858_v24 = vadd.f32 %v3552_v9, %v857_v23 }
 0x225   :  { %v3564_v0 = vpop.eup %2837  ;;  %v3576_v57 = vsel %vm849_vm9, %v851_v6, %v847_v32  ;;  %v893_v6 = vand.u32 2147483647, %v3560_v25 }
 0x226   :  { %v2840_v43 = vpop.eup %2839  ;;  %v870_v21 = vmul.f32 %v3564_v0, %v3550_v60  ;;  %v862_v3 = vsel %vm861_vm12, %v3552_v9, %v858_v24  ;;  %vm875_vm14 = vweird.f32 %v3564_v0  ;;  %v880_v9 = vand.u32 2147483648, %v3550_v60 }
 0x227   :  { %v3574_v63 = vadd.f32 1.0, %v2840_v43  ;;  %v3605_v15 = vsel %vm864_vm13, %v866_v48, %v862_v3  ;;  %vm876_vm2 = vmor %vm874_vm15, %vm875_vm14  ;;  %v979_v60 = vmul.f32 %v3480_v38, %v3267_v49  ;;  %v895_v49 = vand.u32 2147483648, %v3560_v25 }
 0x228   :  { %v871_v7 = vsub.f32 1.0, %v870_v21  ;;  %v881_v8 = vor.u32 1.1754944e-38, %v880_v9  ;;  %v1028_v4 = vpop.permute.xlu2 %1027  ;;  %vm894_vm7 = vcmp.eq.f32.partialorder %v893_v6, 8.507059e+37  ;;  %v981_v48 = vmul.f32 %v3514_v20, %v3283_v53 }
 0x229   :  { %vm904_vm9 = vweird.f32 %v3574_v63  ;;  %v908_v3 = vand.u32 2147483647, %v3574_v63 }
 0x22a   :  { %v872_v28 = vmul.f32 %v3564_v0, %v871_v7  ;;  %v896_v7 = vor.u32 1.1754944e-38, %v895_v49 }
 0x22b   :  { %vm909_vm11 = vcmp.eq.f32.partialorder %v908_v3, 8.507059e+37 }
 0x22c   :  { %v873_v47 = vadd.f32 %v3564_v0, %v872_v28 }
 0x22e   :  { %v877_v22 = vsel %vm876_vm2, %v3564_v0, %v873_v47 }
 0x22f   :  { %v3628_v27 = vsel %vm879_vm3, %v881_v8, %v877_v22 }
 0x230   :  { %v1065_v31 = vmul.f32 %v1028_v4, %v3628_v27 }
 0x240   :  { %v1090_v61 = vpop.permute.xlu1 %1089 }
 0x241   :  { %v3562_v26 = vadd.f32 %v1090_v61, %v976_v33 }
 0x243   :  { %2841 = vtanh.f32 %v3562_v26 }
 0x244   :  { %2843 = vrcp.f32 %v3560_v25 }
 0x245   :  { %2845 = vpow2.f32 %v2650_v29 }
 0x248   :  { %v1024_v42 = vpop.permute.xlu1 %1023  ;;  %v1092_v44 = vpop.permute.xlu0 %1091 }
 0x249   :  { %v2842_v35 = vpop.eup %2841  ;;  %v1063_v46 = vmul.f32 %v1024_v42, %v3576_v57  ;;  %v3580_v54 = vadd.f32 %v1092_v44, %v977_v19 }
 0x24a   :  { %v3583_v55 = vpop.eup %2843  ;;  %1185 = vrot.lane.b32.xlu0 %v2842_v35, %s3041_s20 }
 0x24b   :  { %2847 = vtanh.f32 %v3580_v54  ;;  %1103 = vrot.lane.b32.xlu2 %v1063_v46, %s3041_s20  ;;  %v2846_v62 = vpop.eup %2845  ;;  %v885_v5 = vmul.f32 %v3583_v55, %v3560_v25  ;;  %vm890_vm4 = vweird.f32 %v3583_v55  ;;  %v980_v46 = vmul.f32 %v3500_v2, %v3275_v51 }
 0x24c   :  { %2849 = vrcp.f32 %v3574_v63  ;;  %v3603_v14 = vadd.f32 1.0, %v2846_v62  ;;  %vm891_vm6 = vmor %vm889_vm5, %vm890_vm4  ;;  %v910_v51 = vand.u32 2147483648, %v3574_v63 }
 0x24d   :  { %2851 = vpow2.f32 %v2651_v56  ;;  %v886_v36 = vsub.f32 1.0, %v885_v5 }
 0x24e   :  { %2853 = vtanh.f32 %v3601_v59  ;;  %v925_v22 = vand.u32 2147483648, %v3603_v14  ;;  %vm919_vm13 = vweird.f32 %v3603_v14 }
 0x24f   :  { %2855 = vrcp.f32 %v3603_v14  ;;  %v887_v33 = vmul.f32 %v3583_v55, %v886_v36 }
 0x250   :  { %v1026_v10 = vpop.permute.xlu0 %1025  ;;  %2857 = vpow2.f32 %v2652_v34  ;;  %v1100_v5 = vpop.permute.xlu2 %1099 }
 0x251   :  { %v2848_v16 = vpop.eup %2847  ;;  %v1064_v52 = vmul.f32 %v1026_v10, %v3605_v15  ;;  %v888_v21 = vadd.f32 %v3583_v55, %v887_v33  ;;  %v3673_v36 = vadd.f32 %v1100_v5, %v981_v48  ;;  %v923_v33 = vand.u32 2147483647, %v3603_v14 }
 0x252   :  { %v3610_v1 = vpop.eup %2849  ;;  %1187 = vrot.lane.b32.xlu0 %v2848_v16, %s3041_s20 }
 0x253   :  { %1105 = vrot.lane.b32.xlu2 %v1064_v52, %s3041_s20  ;;  %v2852_v12 = vpop.eup %2851  ;;  %v900_v61 = vmul.f32 %v3610_v1, %v3574_v63  ;;  %v892_v42 = vsel %vm891_vm6, %v3583_v55, %v888_v21  ;;  %vm905_vm8 = vweird.f32 %v3610_v1  ;;  %v911_v52 = vor.u32 1.1754944e-38, %v910_v51 }
 0x254   :  { %v3626_v18 = vadd.f32 1.0, %v2852_v12  ;;  %v2854_v0 = vpop.eup %2853  ;;  %v3652_v56 = vsel %vm894_vm7, %v896_v7, %v892_v42  ;;  %vm906_vm10 = vmor %vm904_vm9, %vm905_vm8  ;;  %vm924_vm15 = vcmp.eq.f32.partialorder %v923_v33, 8.507059e+37 }
 0x255   :  { %v901_v32 = vsub.f32 1.0, %v900_v61  ;;  %v3635_v23 = vpop.eup %2855  ;;  %v3015_v61 = vld [vmem:[%s4769_s1 + $0x38] sm:$0xff] }
 0x256   :  { %v2858_v19 = vpop.eup %2857  ;;  %v915_v35 = vmul.f32 %v3635_v23, %v3603_v14  ;;  %vm920_vm12 = vweird.f32 %v3635_v23  ;;  %v982_v8 = vmul.f32 %v3015_v61, %v3538_v30  ;;  %vm934_vm3 = vweird.f32 %v3626_v18 }
 0x257   :  { %v902_v44 = vmul.f32 %v3610_v1, %v901_v32  ;;  %v3650_v24 = vadd.f32 1.0, %v2858_v19  ;;  %vm921_vm14 = vmor %vm919_vm13, %vm920_vm12 }
 0x258   :  { %v1096_v29 = vpop.permute.xlu1 %1095  ;;  %v916_v50 = vsub.f32 1.0, %v915_v35 }
 0x259   :  { %v3632_v43 = vadd.f32 %v1096_v29, %v979_v60  ;;  %v903_v62 = vadd.f32 %v3610_v1, %v902_v44  ;;  %v938_v44 = vand.u32 2147483647, %v3626_v18  ;;  %vm949_vm7 = vweird.f32 %v3650_v24 }
 0x25a   :  { %1189 = vrot.lane.b32.xlu0 %v2854_v0, %s3041_s20  ;;  %v917_v16 = vmul.f32 %v3635_v23, %v916_v50  ;;  %v955_v50 = vand.u32 2147483648, %v3650_v24 }
 0x25b   :  { %2859 = vtanh.f32 %v3632_v43  ;;  %1107 = vrot.lane.b32.xlu2 %v1065_v31, %s3041_s20  ;;  %v907_v10 = vsel %vm906_vm10, %v3610_v1, %v903_v62  ;;  %v926_v31 = vor.u32 1.1754944e-38, %v925_v22  ;;  %vm939_vm5 = vcmp.eq.f32.partialorder %v938_v44, 8.507059e+37 }
 0x25c   :  { %2861 = vrcp.f32 %v3626_v18  ;;  %v3675_v9 = vsel %vm909_vm11, %v911_v52, %v907_v10  ;;  %v918_v12 = vadd.f32 %v3635_v23, %v917_v16  ;;  %v956_v51 = vor.u32 1.1754944e-38, %v955_v50 }
 0x25d   :  { %vm1327_vm10 = vcmask 523520  }
 0x25e   :  { %v922_v60 = vsel %vm921_vm14, %v3635_v23, %v918_v12  ;;  %v940_v23 = vand.u32 2147483648, %v3626_v18 }
 0x25f   :  { %v3694_v49 = vsel %vm924_vm15, %v926_v31, %v922_v60 }
 0x260   :  { %v1098_v45 = vpop.permute.xlu0 %1097  ;;  %v1030_v25 = vpop.permute.xlu1 %1029 }
 0x261   :  { %v2860_v39 = vpop.eup %2859  ;;  %v3655_v55 = vadd.f32 %v1098_v45, %v980_v46  ;;  %v1066_v40 = vmul.f32 %v1030_v25, %v3652_v56  ;;  %v941_v46 = vor.u32 1.1754944e-38, %v940_v23 }
 0x262   :  { %v2862_v28 = vpop.eup %2861  ;;  %1191 = vrot.lane.b32.xlu0 %v2860_v39, %s3041_s20 }
 0x263   :  { %2863 = vtanh.f32 %v3655_v55  ;;  %1109 = vrot.lane.b32.xlu1 %v1066_v40, %s3041_s20  ;;  %v930_v47 = vmul.f32 %v2862_v28, %v3626_v18  ;;  %vm935_vm2 = vweird.f32 %v2862_v28  ;;  %v953_v18 = vand.u32 2147483647, %v3650_v24 }
 0x264   :  { %2865 = vrcp.f32 %v3650_v24  ;;  %vm936_vm4 = vmor %vm934_vm3, %vm935_vm2 }
 0x265   :  { %v931_v53 = vsub.f32 1.0, %v930_v47  ;;  %2867 = vtanh.f32 %v3673_v36  ;;  %vm954_vm9 = vcmp.eq.f32.partialorder %v953_v18, 8.507059e+37 }
 0x267   :  { %v932_v29 = vmul.f32 %v2862_v28, %v931_v53 }
 0x268   :  { %v1032_v63 = vpop.permute.xlu1 %1031 }
 0x269   :  { %v2864_v34 = vpop.eup %2863  ;;  %v1067_v17 = vmul.f32 %v1032_v63, %v3675_v9  ;;  %v933_v19 = vadd.f32 %v2862_v28, %v932_v29 }
 0x26a   :  { %v2866_v1 = vpop.eup %2865  ;;  %1193 = vrot.lane.b32.xlu2 %v2864_v34, %s3041_s20  ;;  %v3017_v34 = vld [vmem:[%s4769_s1 + $0x48] sm:$0xff] }
 0x26b   :  { %1111 = vrot.lane.b32.xlu1 %v1067_v17, %s3041_s20  ;;  %v945_v0 = vmul.f32 %v2866_v1, %v3650_v24  ;;  %v2868_v14 = vpop.eup %2867  ;;  %v937_v35 = vsel %vm936_vm4, %v2862_v28, %v933_v19  ;;  %vm950_vm6 = vweird.f32 %v2866_v1  ;;  %v3016_v24 = vld [vmem:[%s4769_s1 + $0x40] sm:$0xff] }
 0x26c   :  { %v3703_v25 = vsel %vm939_vm5, %v941_v46, %v937_v35  ;;  %vm951_vm8 = vmor %vm949_vm7, %vm950_vm6  ;;  %v983_v47 = vmul.f32 %v3016_v24, %v3576_v57 }
 0x26d   :  { %v1102_v4 = vpop.permute.xlu2 %1101  ;;  %v946_v42 = vsub.f32 1.0, %v945_v0 }
 0x26e   :  { %v3692_v21 = vadd.f32 %v1102_v4, %v982_v8 }
 0x26f   :  { %v947_v7 = vmul.f32 %v2866_v1, %v946_v42 }
 0x270   :  { %v1034_v32 = vpop.permute.xlu1 %1033  ;;  %2869 = vtanh.f32 %v3692_v21 }
 0x271   :  { %v1068_v6 = vmul.f32 %v1034_v32, %v3694_v49  ;;  %v948_v62 = vadd.f32 %v2866_v1, %v947_v7 }
 0x272   :  { %1195 = vrot.lane.b32.xlu2 %v2868_v14, %s3041_s20 }
 0x273   :  { %1113 = vrot.lane.b32.xlu1 %v1068_v6, %s3041_s20  ;;  %v952_v28 = vsel %vm951_vm8, %v2866_v1, %v948_v62  ;;  %v3018_v1 = vld [vmem:[%s4769_s1 + $0x50] sm:$0xff] }
 0x274   :  { %v3711_v5 = vsel %vm954_vm9, %v956_v51, %v952_v28  ;;  %v985_v22 = vmul.f32 %v3018_v1, %v3628_v27  ;;  %v3021_v28 = vld [vmem:[%s4769_s1 + $0x68] sm:$0xff] }
 0x275   :  { %v988_v51 = vmul.f32 %v3021_v28, %v3694_v49 }
 0x276   :  { %v2870_v39 = vpop.eup %2869 }
 0x278   :  { %v1036_v45 = vpop.permute.xlu1 %1035 }
 0x279   :  { %v1069_v40 = vmul.f32 %v1036_v45, %v3703_v25 }
 0x27a   :  { %1197 = vrot.lane.b32.xlu2 %v2870_v39, %s3041_s20  ;;  %v1362_v39 = vld [vmem:[%s4768_s2 + $0x50] sm:$0xff] }
 0x27b   :  { %1115 = vrot.lane.b32.xlu1 %v1069_v40, %s3041_s20  ;;  %v1361_v40 = vld [vmem:[%s4768_s2 + $0x48] sm:$0xff] }
 0x280   :  { %v1038_v3 = vpop.permute.xlu1 %1037 }
 0x281   :  { %v1070_v48 = vmul.f32 %v1038_v3, %v3711_v5 }
 0x283   :  { %1117 = vrot.lane.b32.xlu1 %v1070_v48, %s3041_s20 }
 0x284   :  { %v1184_v10 = vpop.permute.xlu0 %1183 }
 0x285   :  { %v1231_v16 = vmul.f32 %v1184_v10, %v3376_v37  ;;  %v984_v37 = vmul.f32 %v3017_v34, %v3605_v15 }
 0x287   :  { %1263 = vrot.lane.b32.xlu0 %v1231_v16, %s3042_s23  ;;  %v3022_v16 = vld [vmem:[%s4769_s1 + $0x70] sm:$0xff] }
 0x288   :  { %v989_v24 = vmul.f32 %v3022_v16, %v3703_v25 }
 0x2a5   :  { %v1104_v52 = vpop.permute.xlu2 %1103 }
 0x2a6   :  { %v3721_v63 = vadd.f32 %v1104_v52, %v983_v47 }
 0x2a8   :  { %2871 = vtanh.f32 %v3721_v63 }
 0x2ad   :  { %v1106_v17 = vpop.permute.xlu2 %1105 }
 0x2ae   :  { %v2872_v12 = vpop.eup %2871  ;;  %v3728_v53 = vadd.f32 %v1106_v17, %v984_v37  ;;  %v3023_v37 = vld [vmem:[%s4769_s1 + $0x78] sm:$0xff] }
 0x2af   :  { %1199 = vrot.lane.b32.xlu2 %v2872_v12, %s3041_s20  ;;  %v990_v17 = vmul.f32 %v3023_v37, %v3711_v5  ;;  %v4059_v37 = vld [vmem:[%s4768_s2 + $0x88] ss:$0 sm:$0xff] }
 0x2b0   :  { %2873 = vtanh.f32 %v3728_v53 }
 0x2b5   :  { %v1108_v33 = vpop.permute.xlu2 %1107 }
 0x2b6   :  { %v2874_v61 = vpop.eup %2873  ;;  %v3736_v8 = vadd.f32 %v1108_v33, %v985_v22 }
 0x2b7   :  { %1201 = vrot.lane.b32.xlu2 %v2874_v61, %s3041_s20 }
 0x2b8   :  { %2875 = vtanh.f32 %v3736_v8 }
 0x2bc   :  { %v1186_v4 = vpop.permute.xlu0 %1185 }
 0x2bd   :  { %v1232_v60 = vmul.f32 %v1186_v4, %v3426_v41 }
 0x2be   :  { %v2876_v29 = vpop.eup %2875 }
 0x2bf   :  { %1265 = vrot.lane.b32.xlu0 %v1232_v60, %s3042_s23  ;;  %1203 = vrot.lane.b32.xlu1 %v2876_v29, %s3041_s20 }
 0x2c4   :  { %v1188_v0 = vpop.permute.xlu0 %1187  ;;  %v1194_v31 = vpop.permute.xlu2 %1193 }
 0x2c5   :  { %v1233_v32 = vmul.f32 %v1188_v0, %v3452_v13  ;;  %v1236_v14 = vmul.f32 %v1194_v31, %v3500_v2  ;;  %v1364_v13 = vld [vmem:[%s4768_s2 + $0x60] sm:$0xff]  ;;  %v1363_v2 = vld [vmem:[%s4768_s2 + $0x58] sm:$0xff] }
 0x2c6   :  { %1409 = vmatpush.msrb.mxu3 %v1364_v13 }
 0x2c7   :  { %1267 = vrot.lane.b32.xlu0 %v1233_v32, %s3042_s23  ;;  %1273 = vrot.lane.b32.xlu2 %v1236_v14, %s3042_s23 }
 0x2c8   :  { %1410 = vmatpush.msrb.mxu3 %v1363_v2 }
 0x2ca   :  { %1411 = vmatpush.msrb.mxu3 %v1362_v39 }
 0x2cc   :  { %v1190_v6 = vpop.permute.xlu0 %1189  ;;  %v1196_v19 = vpop.permute.xlu2 %1195  ;;  %1412 = vmatpush.msrb.mxu3 %v1361_v40 }
 0x2cd   :  { %v1234_v42 = vmul.f32 %v1190_v6, %v3405_v58  ;;  %v1237_v41 = vmul.f32 %v1196_v19, %v3514_v20  ;;  %v3019_v58 = vld [vmem:[%s4769_s1 + $0x58] sm:$0xff] }
 0x2ce   :  { %v986_v20 = vmul.f32 %v3019_v58, %v3652_v56 }
 0x2cf   :  { %1269 = vrot.lane.b32.xlu0 %v1234_v42, %s3042_s23  ;;  %1275 = vrot.lane.b32.xlu1 %v1237_v41, %s3042_s23  ;;  %v1479_v42 = vld [vmem:[%s4768_s2 + $0x68] sm:$0xff] }
 0x2d4   :  { %v1192_v23 = vpop.permute.xlu0 %1191  ;;  %v1198_v44 = vpop.permute.xlu2 %1197 }
 0x2d5   :  { %v1235_v35 = vmul.f32 %v1192_v23, %v3480_v38  ;;  %v1238_v7 = vmul.f32 %v1198_v44, %v3538_v30  ;;  %v1110_v46 = vpop.permute.xlu1 %1109  ;;  %v3020_v38 = vld [vmem:[%s4769_s1 + $0x60] sm:$0xff] }
 0x2d6   :  { %v3763_v45 = vadd.f32 %v1110_v46, %v986_v20  ;;  %v987_v30 = vmul.f32 %v3020_v38, %v3675_v9 }
 0x2d7   :  { %1271 = vrot.lane.b32.xlu0 %v1235_v35, %s3042_s23  ;;  %1277 = vrot.lane.b32.xlu1 %v1238_v7, %s3042_s23 }
 0x2d8   :  { %2877 = vtanh.f32 %v3763_v45 }
 0x2dd   :  { %v1112_v62 = vpop.permute.xlu1 %1111 }
 0x2de   :  { %v2878_v50 = vpop.eup %2877  ;;  %v3778_v18 = vadd.f32 %v1112_v62, %v987_v30 }
 0x2df   :  { %1205 = vrot.lane.b32.xlu0 %v2878_v50, %s3041_s20 }
 0x2e0   :  { %2879 = vtanh.f32 %v3778_v18 }
 0x2e5   :  { %v1114_v3 = vpop.permute.xlu1 %1113 }
 0x2e6   :  { %v2880_v48 = vpop.eup %2879  ;;  %v3786_v10 = vadd.f32 %v1114_v3, %v988_v51 }
 0x2e7   :  { %1207 = vrot.lane.b32.xlu0 %v2880_v48, %s3041_s20 }
 0x2e8   :  { %2881 = vtanh.f32 %v3786_v10 }
 0x2ed   :  { %v1116_v47 = vpop.permute.xlu1 %1115 }
 0x2ee   :  { %v2882_v52 = vpop.eup %2881  ;;  %v3794_v34 = vadd.f32 %v1116_v47, %v989_v24 }
 0x2ef   :  { %1209 = vrot.lane.b32.xlu0 %v2882_v52, %s3041_s20 }
 0x2f0   :  { %2883 = vtanh.f32 %v3794_v34 }
 0x2f5   :  { %v1118_v12 = vpop.permute.xlu1 %1117 }
 0x2f6   :  { %v2884_v1 = vpop.eup %2883  ;;  %v3802_v22 = vadd.f32 %v1118_v12, %v990_v17 }
 0x2f7   :  { %1211 = vrot.lane.b32.xlu0 %v2884_v1, %s3041_s20 }
 0x2f8   :  { %2885 = vtanh.f32 %v3802_v22 }
 0x2f9   :  { %v1264_v33 = vpop.permute.xlu0 %1263 }
 0x2fa   :  { %1311 = vst.msk [vmem:[%s4770_s4] sm:$0xff] %vm525_vm1, %v1264_v33  ;;  %2653 = vmatmul.msk.f32.vlgmr.msrb.gmra.mxu3 %vm525_vm1, %v1264_v33 }
 0x2fb   :  { %1328 = vst.msk [vmem:[%s4770_s4] sm:$0xff] %vm1327_vm10, %v3534_v11  ;;  %v1482_v11 = vld [vmem:[%s4768_s2 + $0x80] sm:$0xff] }
 0x2fc   :  { %1575 = vmatpush.msrb.mxu0 %v1482_v11 }
 0x2fe   :  { %v2886_v61 = vpop.eup %2885 }
 0x2ff   :  { %1213 = vrot.lane.b32.xlu0 %v2886_v61, %s3041_s20 }
 0x302   :  { %v1344_v4 = vld [vmem:[%s4769_s1] sm:$0xff] }
 0x303   :  { %1499 = vrot.lane.b32.xlu2 %v1344_v4, %s3042_s23 }
 0x309   :  { %v1200_v60 = vpop.permute.xlu2 %1199 }
 0x30a   :  { %v1239_v29 = vmul.f32 %v1200_v60, %v3576_v57  ;;  %v1481_v57 = vld [vmem:[%s4768_s2 + $0x78] sm:$0xff] }
 0x30b   :  { %1576 = vmatpush.msrb.mxu0 %v1481_v57 }
 0x30c   :  { %1279 = vrot.lane.b32.xlu1 %v1239_v29, %s3042_s23 }
 0x311   :  { %v1202_v0 = vpop.permute.xlu2 %1201 }
 0x312   :  { %v1240_v31 = vmul.f32 %v1202_v0, %v3605_v15 }
 0x314   :  { %1281 = vrot.lane.b32.xlu1 %v1240_v31, %s3042_s23 }
 0x321   :  { %v1274_v32 = vpop.permute.xlu2 %1273 }
 0x322   :  { %1316 = vst.msk [vmem:[%s4770_s4 + $0x28] sm:$0xff] %vm525_vm1, %v1274_v32 }
 0x323   :  { %1333 = vst.msk [vmem:[%s4770_s4 + $0x28] sm:$0xff] %vm1327_vm10, %v3655_v55  ;;  %v1480_v55 = vld [vmem:[%s4768_s2 + $0x70] sm:$0xff] }
 0x324   :  { %1577 = vmatpush.msrb.mxu0 %v1480_v55 }
 0x326   :  { %1578 = vmatpush.msrb.mxu0 %v1479_v42 }
 0x331   :  { %v1266_v15 = vpop.permute.xlu0 %1265  ;;  %v1204_v14 = vpop.permute.xlu1 %1203 }
 0x332   :  { %1312 = vst.msk [vmem:[%s4770_s4 + $0x8] sm:$0xff] %vm525_vm1, %v1266_v15  ;;  %v1241_v6 = vmul.f32 %v1204_v14, %v3628_v27  ;;  %2654 = vmatmul.msk.f32.gmra.mxu3 %vm525_vm1, %v1266_v15 }
 0x333   :  { %1329 = vst.msk [vmem:[%s4770_s4 + $0x8] sm:$0xff] %vm1327_vm10, %v3562_v26 }
 0x334   :  { %1283 = vrot.lane.b32.xlu1 %v1241_v6, %s3042_s23 }
 0x339   :  { %v1268_v19 = vpop.permute.xlu0 %1267 }
 0x33a   :  { %1313 = vst.msk [vmem:[%s4770_s4 + $0x10] sm:$0xff] %vm525_vm1, %v1268_v19  ;;  %2655 = vmatmul.msk.f32.gmra.mxu3 %vm525_vm1, %v1268_v19 }
 0x341   :  { %v1345_v27 = vld [vmem:[%s4769_s1 + $0x8] sm:$0xff]  ;;  %v1270_v41 = vpop.permute.xlu0 %1269  ;;  %v1276_v13 = vpop.permute.xlu1 %1275 }
 0x342   :  { %1330 = vst.msk [vmem:[%s4770_s4 + $0x10] sm:$0xff] %vm1327_vm10, %v3580_v54  ;;  %1501 = vrot.lane.b32.xlu2 %v1345_v27, %s3042_s23  ;;  %2656 = vmatmul.msk.f32.gmra.mxu3 %vm525_vm1, %v1270_v41 }
 0x349   :  { %v1349_v26 = vld [vmem:[%s4769_s1 + $0x28] sm:$0xff]  ;;  %v1272_v2 = vpop.permute.xlu0 %1271  ;;  %v1278_v23 = vpop.permute.xlu1 %1277 }
 0x34a   :  { %1509 = vrot.lane.b32.xlu1 %v1349_v26, %s3042_s23  ;;  %1314 = vst.msk [vmem:[%s4770_s4 + $0x18] sm:$0xff] %vm525_vm1, %v1270_v41  ;;  %2657 = vmatmul.msk.f32.gmra.mxu3 %vm525_vm1, %v1272_v2 }
 0x351   :  { %v1346_v54 = vld [vmem:[%s4769_s1 + $0x10] sm:$0xff] }
 0x352   :  { %1331 = vst.msk [vmem:[%s4770_s4 + $0x18] sm:$0xff] %vm1327_vm10, %v3601_v59  ;;  %1503 = vrot.lane.b32.xlu2 %v1346_v54, %s3042_s23  ;;  %2658 = vmatmul.msk.f32.gmra.mxu3 %vm525_vm1, %v1274_v32 }
 0x353   :  { %1317 = vst.msk [vmem:[%s4770_s4 + $0x30] sm:$0xff] %vm525_vm1, %v1276_v13 }
 0x354   :  { %1334 = vst.msk [vmem:[%s4770_s4 + $0x30] sm:$0xff] %vm1327_vm10, %v3673_v36  ;;  %v1206_v36 = vpop.permute.xlu0 %1205 }
 0x355   :  { %1315 = vst.msk [vmem:[%s4770_s4 + $0x20] sm:$0xff] %vm525_vm1, %v1272_v2  ;;  %v1242_v44 = vmul.f32 %v1206_v36, %v3652_v56 }
 0x357   :  { %1285 = vrot.lane.b32.xlu0 %v1242_v44, %s3042_s23 }
 0x35a   :  { %2659 = vmatmul.msk.f32.gmra.mxu3 %vm525_vm1, %v1276_v13 }
 0x35c   :  { %v1347_v59 = vld [vmem:[%s4769_s1 + $0x18] sm:$0xff]  ;;  %v1208_v58 = vpop.permute.xlu0 %1207 }
 0x35d   :  { %1332 = vst.msk [vmem:[%s4770_s4 + $0x20] sm:$0xff] %vm1327_vm10, %v3632_v43  ;;  %1505 = vrot.lane.b32.xlu2 %v1347_v59, %s3042_s23  ;;  %v1243_v20 = vmul.f32 %v1208_v58, %v3675_v9  ;;  %v3936_v56 = vpop.permute.xlu2 %1499 }
 0x35e   :  { %1318 = vst.msk [vmem:[%s4770_s4 + $0x38] sm:$0xff] %vm525_vm1, %v1278_v23  ;;  %2669 = vmatmul.msk.f32.vlgmr.msrb.gmra.mxu0 %vm525_vm1, %v3936_v56 }
 0x35f   :  { %1335 = vst.msk [vmem:[%s4770_s4 + $0x38] sm:$0xff] %vm1327_vm10, %v3692_v21 }
 0x362   :  { %2660 = vmatmul.msk.f32.gmra.mxu3 %vm525_vm1, %v1278_v23 }
 0x364   :  { %v1210_v35 = vpop.permute.xlu0 %1209 }
 0x365   :  { %v1244_v7 = vmul.f32 %v1210_v35, %v3694_v49 }
 0x366   :  { %v1348_v43 = vld [vmem:[%s4769_s1 + $0x20] sm:$0xff]  ;;  %v1350_v21 = vld [vmem:[%s4769_s1 + $0x30] sm:$0xff]  ;;  %v1351_v9 = vld [vmem:[%s4769_s1 + $0x38] sm:$0xff] }
 0x367   :  { %1507 = vrot.lane.b32.xlu2 %v1348_v43, %s3042_s23  ;;  %1511 = vrot.lane.b32.xlu0 %v1350_v21, %s3042_s23 }
 0x368   :  { %1289 = vrot.lane.b32.xlu1 %v1244_v7, %s3042_s23 }
 0x36c   :  { %v1212_v46 = vpop.permute.xlu0 %1211 }
 0x36d   :  { %v1245_v39 = vmul.f32 %v1212_v46, %v3703_v25 }
 0x36f   :  { %1287 = vrot.lane.b32.xlu2 %v1243_v20, %s3042_s23  ;;  %1291 = vrot.lane.b32.xlu0 %v1245_v39, %s3042_s23 }
 0x374   :  { %v1214_v40 = vpop.permute.xlu0 %1213 }
 0x375   :  { %v1246_v38 = vmul.f32 %v1214_v40, %v3711_v5 }
 0x377   :  { %1513 = vrot.lane.b32.xlu2 %v1351_v9, %s3042_s23 }
 0x37d   :  { %v1414_v12 = vpop.f32.mrf.mxu3 }
 0x37e   :  { %v1280_v49 = vpop.permute.xlu1 %1279  ;;  %v1463_v1 = vadd.f32 %v4059_v37, %v1414_v12 }
 0x37f   :  { %1293 = vrot.lane.b32.xlu2 %v1246_v38, %s3042_s23  ;;  %1319 = vst.msk [vmem:[%s4770_s4 + $0x40] sm:$0xff] %vm525_vm1, %v1280_v49  ;;  %2661 = vmatmul.msk.f32.gmra.mxu3 %vm525_vm1, %v1280_v49 }
 0x380   :  { %1336 = vst.msk [vmem:[%s4770_s4 + $0x40] sm:$0xff] %vm1327_vm10, %v3721_v63 }
 0x386   :  { %v1282_v25 = vpop.permute.xlu1 %1281 }
 0x387   :  { %1320 = vst.msk [vmem:[%s4770_s4 + $0x48] sm:$0xff] %vm525_vm1, %v1282_v25  ;;  %2662 = vmatmul.msk.f32.gmra.mxu3 %vm525_vm1, %v1282_v25 }
 0x38e   :  { %v1352_v5 = vld [vmem:[%s4769_s1 + $0x40] sm:$0xff] }
 0x38f   :  { %1337 = vst.msk [vmem:[%s4770_s4 + $0x48] sm:$0xff] %vm1327_vm10, %v3728_v53  ;;  %1515 = vrot.lane.b32.xlu1 %v1352_v5, %s3042_s23 }
 0x396   :  { %v1353_v63 = vld [vmem:[%s4769_s1 + $0x48] sm:$0xff] }
 0x397   :  { %1517 = vrot.lane.b32.xlu0 %v1353_v63, %s3042_s23 }
 0x39c   :  { %v3979_v30 = vpop.permute.xlu2 %1501 }
 0x39d   :  { %2670 = vmatmul.msk.f32.gmra.mxu0 %vm525_vm1, %v3979_v30 }
 0x3a6   :  { %v1284_v53 = vpop.permute.xlu1 %1283 }
 0x3a7   :  { %1321 = vst.msk [vmem:[%s4770_s4 + $0x50] sm:$0xff] %vm525_vm1, %v1284_v53  ;;  %2663 = vmatmul.msk.f32.gmra.mxu3 %vm525_vm1, %v1284_v53 }
 0x3a8   :  { %1338 = vst.msk [vmem:[%s4770_s4 + $0x50] sm:$0xff] %vm1327_vm10, %v3736_v8 }
 0x3ac   :  { %v3983_v62 = vpop.permute.xlu2 %1503 }
 0x3ad   :  { %2671 = vmatmul.msk.f32.gmra.mxu0 %vm525_vm1, %v3983_v62 }
 0x3af   :  { %v1354_v51 = vld [vmem:[%s4769_s1 + $0x50] sm:$0xff] }
 0x3b0   :  { %1519 = vrot.lane.b32.xlu1 %v1354_v51, %s3042_s23 }
 0x3b5   :  { %v1417_v0 = vpop.f32.mrf.mxu3 }
 0x3b6   :  { %v1464_v11 = vadd.f32 %v4059_v37, %v1417_v0 }
 0x3b7   :  { %v3987_v50 = vpop.permute.xlu2 %1505 }
 0x3b8   :  { %2672 = vmatmul.msk.f32.gmra.mxu0 %vm525_vm1, %v3987_v50 }
 0x3bc   :  { %v4009_v3 = vpop.permute.xlu1 %1509 }
 0x3bd   :  { %v1420_v31 = vpop.f32.mrf.mxu3 }
 0x3be   :  { %v1465_v15 = vadd.f32 %v4059_v37, %v1420_v31 }
 0x3c1   :  { %v4001_v28 = vpop.permute.xlu2 %1507 }
 0x3c2   :  { %2673 = vmatmul.msk.f32.gmra.mxu0 %vm525_vm1, %v4001_v28 }
 0x3c5   :  { %v1423_v14 = vpop.f32.mrf.mxu3 }
 0x3c6   :  { %v1466_v27 = vadd.f32 %v4059_v37, %v1423_v14 }
 0x3c9   :  { %v1288_v48 = vpop.permute.xlu2 %1287  ;;  %v1286_v24 = vpop.permute.xlu0 %1285 }
 0x3ca   :  { %2674 = vmatmul.msk.f32.gmra.mxu0 %vm525_vm1, %v4009_v3  ;;  %1323 = vst.msk [vmem:[%s4770_s4 + $0x60] sm:$0xff] %vm525_vm1, %v1288_v48  ;;  %2664 = vmatmul.msk.f32.gmra.mxu3 %vm525_vm1, %v1286_v24 }
 0x3cb   :  { %1340 = vst.msk [vmem:[%s4770_s4 + $0x60] sm:$0xff] %vm1327_vm10, %v3778_v18 }
 0x3cd   :  { %v1426_v54 = vpop.f32.mrf.mxu3 }
 0x3ce   :  { %v1467_v2 = vadd.f32 %v4059_v37, %v1426_v54 }
 0x3d1   :  { %v4026_v16 = vpop.permute.xlu2 %1513 }
 0x3d2   :  { %v1356_v8 = vld [vmem:[%s4769_s1 + $0x60] sm:$0xff]  ;;  %2665 = vmatmul.msk.f32.gmra.mxu3 %vm525_vm1, %v1288_v48 }
 0x3d3   :  { %1523 = vrot.lane.b32.xlu0 %v1356_v8, %s3042_s23  ;;  %1322 = vst.msk [vmem:[%s4770_s4 + $0x58] sm:$0xff] %vm525_vm1, %v1286_v24 }
 0x3d4   :  { %1339 = vst.msk [vmem:[%s4770_s4 + $0x58] sm:$0xff] %vm1327_vm10, %v3763_v45 }
 0x3d5   :  { %v1429_v58 = vpop.f32.mrf.mxu3 }
 0x3d6   :  { %v1468_v20 = vadd.f32 %v4059_v37, %v1429_v58 }
 0x3d9   :  { %v4038_v18 = vpop.permute.xlu0 %1511  ;;  %v1294_v47 = vpop.permute.xlu2 %1293 }
 0x3da   :  { %1326 = vst.msk [vmem:[%s4770_s4 + $0x78] sm:$0xff] %vm525_vm1, %v1294_v47  ;;  %2675 = vmatmul.msk.f32.gmra.mxu0 %vm525_vm1, %v4038_v18  ;;  %v1290_v45 = vpop.permute.xlu1 %1289 }
 0x3db   :  { %2666 = vmatmul.msk.f32.gmra.mxu3 %vm525_vm1, %v1290_v45 }
 0x3dd   :  { %v1432_v25 = vpop.f32.mrf.mxu3 }
 0x3de   :  { %v1469_v63 = vadd.f32 %v4059_v37, %v1432_v25 }
 0x3e1   :  { %v1355_v52 = vld [vmem:[%s4769_s1 + $0x58] sm:$0xff]  ;;  %v1292_v61 = vpop.permute.xlu0 %1291 }
 0x3e2   :  { %1343 = vst.msk [vmem:[%s4770_s4 + $0x78] sm:$0xff] %vm1327_vm10, %v3802_v22  ;;  %1521 = vrot.lane.b32.xlu2 %v1355_v52, %s3042_s23  ;;  %2676 = vmatmul.msk.f32.gmra.mxu0 %vm525_vm1, %v4026_v16  ;;  %v1580_v22 = vpop.f32.mrf.mxu0 }
 0x3e3   :  { %1324 = vst.msk [vmem:[%s4770_s4 + $0x68] sm:$0xff] %vm525_vm1, %v1290_v45  ;;  %v1628_v33 = vadd.f32 %v1580_v22, %v1463_v1  ;;  %2667 = vmatmul.msk.f32.gmra.mxu3 %vm525_vm1, %v1292_v61 }
 0x3e5   :  { %2887 = vtanh.f32 %v1628_v33  ;;  %v2685_v43 = vmul.f32 -1.442695, %v1628_v33  ;;  %v1435_v12 = vpop.f32.mrf.mxu3 }
 0x3ea   :  { %v1359_v17 = vld [vmem:[%s4769_s1 + $0x78] sm:$0xff] }
 0x3eb   :  { %1341 = vst.msk [vmem:[%s4770_s4 + $0x68] sm:$0xff] %vm1327_vm10, %v3786_v10  ;;  %1529 = vrot.lane.b32.xlu0 %v1359_v17, %s3042_s23  ;;  %v2888_v10 = vpop.eup %2887  ;;  %2668 = vmatmul.msk.f32.gmra.mxu3 %vm525_vm1, %v1294_v47 }
 0x3ec   :  { %1325 = vst.msk [vmem:[%s4770_s4 + $0x70] sm:$0xff] %vm525_vm1, %v1292_v61 }
 0x3f3   :  { %v1357_v4 = vld [vmem:[%s4769_s1 + $0x68] sm:$0xff] }
 0x3f4   :  { %1342 = vst.msk [vmem:[%s4770_s4 + $0x70] sm:$0xff] %vm1327_vm10, %v3794_v34  ;;  %1525 = vrot.lane.b32.xlu1 %v1357_v4, %s3042_s23  ;;  %v1470_v4 = vadd.f32 %v4059_v37, %v1435_v12 }
 0x3fb   :  { %v1358_v60 = vld [vmem:[%s4769_s1 + $0x70] sm:$0xff] }
 0x3fc   :  { %1527 = vrot.lane.b32.xlu2 %v1358_v60, %s3042_s23  ;;  %2012 = vrot.lane.b32.xlu1 %v2888_v10, %s3041_s20 }
 0x401   :  { %v4098_v29 = vpop.permute.xlu1 %1515 }
 0x402   :  { %2677 = vmatmul.msk.f32.gmra.mxu0 %vm525_vm1, %v4098_v29 }
 0x409   :  { %v4102_v34 = vpop.permute.xlu0 %1517 }
 0x40a   :  { %2678 = vmatmul.msk.f32.gmra.mxu0 %vm525_vm1, %v4102_v34 }
 0x41a   :  { %v1583_v32 = vpop.f32.mrf.mxu0 }
 0x41b   :  { %v1629_v57 = vadd.f32 %v1583_v32, %v1464_v11 }
 0x41d   :  { %2889 = vtanh.f32 %v1629_v57  ;;  %v2686_v5 = vmul.f32 -1.442695, %v1629_v57 }
 0x422   :  { %v4113_v26 = vpop.permute.xlu1 %1519 }
 0x423   :  { %v2890_v55 = vpop.eup %2889  ;;  %2679 = vmatmul.msk.f32.gmra.mxu0 %vm525_vm1, %v4113_v26 }
 0x424   :  { %2014 = vrot.lane.b32.xlu2 %v2890_v55, %s3041_s20 }
 0x42a   :  { %v1586_v6 = vpop.f32.mrf.mxu0 }
 0x42b   :  { %v4108_v19 = vadd.f32 %v1586_v6, %v1465_v15 }
 0x42d   :  { %2891 = vtanh.f32 %v4108_v19 }
 0x433   :  { %v2892_v41 = vpop.eup %2891 }
 0x434   :  { %2016 = vrot.lane.b32.xlu0 %v2892_v41, %s3041_s20 }
 0x435   :  { %v1589_v42 = vpop.f32.mrf.mxu0 }
 0x436   :  { %v4117_v13 = vadd.f32 %v1589_v42, %v1466_v27  ;;  %v2687_v42 = vmul.f32 -1.442695, %v4108_v19 }
 0x438   :  { %2893 = vtanh.f32 %v4117_v13 }
 0x43c   :  { %v4122_v23 = vpop.permute.xlu2 %1521 }
 0x43d   :  { %2680 = vmatmul.msk.f32.gmra.mxu0 %vm525_vm1, %v4122_v23 }
 0x43e   :  { %v2894_v36 = vpop.eup %2893 }
 0x43f   :  { %v1592_v59 = vpop.f32.mrf.mxu0  ;;  %2018 = vrot.lane.b32.xlu1 %v2894_v36, %s3041_s20 }
 0x440   :  { %v1632_v44 = vadd.f32 %v1592_v59, %v1467_v2 }
 0x442   :  { %2895 = vtanh.f32 %v1632_v44  ;;  %v2689_v15 = vmul.f32 -1.442695, %v1632_v44  ;;  %v2688_v44 = vmul.f32 -1.442695, %v4117_v13 }
 0x443   :  { %2897 = vpow2.f32 %v2685_v43 }
 0x445   :  { %v4128_v21 = vpop.permute.xlu0 %1523 }
 0x446   :  { %2681 = vmatmul.msk.f32.gmra.mxu0 %vm525_vm1, %v4128_v21 }
 0x447   :  { %v1595_v35 = vpop.f32.mrf.mxu0 }
 0x448   :  { %v2896_v7 = vpop.eup %2895  ;;  %v4132_v9 = vadd.f32 %v1595_v35, %v1468_v20  ;;  %v1438_v20 = vpop.f32.mrf.mxu3 }
 0x449   :  { %2020 = vrot.lane.b32.xlu2 %v2896_v7, %s3041_s20  ;;  %v2898_v46 = vpop.eup %2897  ;;  %v1471_v19 = vadd.f32 %v4059_v37, %v1438_v20 }
 0x44a   :  { %2899 = vtanh.f32 %v4132_v9  ;;  %v1692_v39 = vadd.f32 1.0, %v2898_v46 }
 0x44c   :  { %2901 = vrcp.f32 %v1692_v39  ;;  %v1719_v45 = vand.u32 2147483648, %v1692_v39  ;;  %vm1713_vm12 = vweird.f32 %v1692_v39  ;;  %v1717_v1 = vand.u32 2147483647, %v1692_v39 }
 0x44d   :  { %2903 = vpow2.f32 %v2686_v5 }
 0x44e   :  { %v1720_v10 = vor.u32 1.1754944e-38, %v1719_v45  ;;  %vm1718_vm14 = vcmp.eq.f32.partialorder %v1717_v1, 8.507059e+37 }
 0x450   :  { %v2900_v40 = vpop.eup %2899 }
 0x451   :  { %2022 = vrot.lane.b32.xlu0 %v2900_v40, %s3041_s20 }
 0x452   :  { %v2902_v38 = vpop.eup %2901 }
 0x453   :  { %v1709_v49 = vmul.f32 %v2902_v38, %v1692_v39  ;;  %vm1714_vm11 = vweird.f32 %v2902_v38  ;;  %v2904_v52 = vpop.eup %2903 }
 0x454   :  { %vm1715_vm13 = vmor %vm1713_vm12, %vm1714_vm11  ;;  %v1693_v22 = vadd.f32 1.0, %v2904_v52  ;;  %v2690_v52 = vmul.f32 -1.442695, %v4132_v9 }
 0x455   :  { %v1710_v53 = vsub.f32 1.0, %v1709_v49 }
 0x456   :  { %v4147_v60 = vpop.permute.xlu2 %1527  ;;  %v1734_v36 = vand.u32 2147483648, %v1693_v22  ;;  %vm1728_vm2 = vweird.f32 %v1693_v22  ;;  %v1732_v43 = vand.u32 2147483647, %v1693_v22 }
 0x457   :  { %v1598_v51 = vpop.f32.mrf.mxu0  ;;  %v1711_v8 = vmul.f32 %v2902_v38, %v1710_v53 }
 0x458   :  { %v4138_v48 = vadd.f32 %v1598_v51, %v1469_v63  ;;  %v1735_v7 = vor.u32 1.1754944e-38, %v1734_v36  ;;  %vm1733_vm4 = vcmp.eq.f32.partialorder %v1732_v43, 8.507059e+37 }
 0x459   :  { %v1712_v47 = vadd.f32 %v2902_v38, %v1711_v8 }
 0x45a   :  { %2905 = vtanh.f32 %v4138_v48  ;;  %v2691_v45 = vmul.f32 -1.442695, %v4138_v48 }
 0x45b   :  { %v1716_v61 = vsel %vm1715_vm13, %v2902_v38, %v1712_v47  ;;  %2907 = vrcp.f32 %v1693_v22 }
 0x45c   :  { %v4151_v11 = vsel %vm1718_vm14, %v1720_v10, %v1716_v61 }
 0x45d   :  { %v4158_v14 = vpop.permute.xlu0 %1529 }
 0x45f   :  { %v1601_v33 = vpop.f32.mrf.mxu0 }
 0x460   :  { %v2906_v17 = vpop.eup %2905  ;;  %v4149_v0 = vadd.f32 %v1601_v33, %v1470_v4 }
 0x461   :  { %2024 = vrot.lane.b32.xlu2 %v2906_v17, %s3041_s20  ;;  %v2908_v57 = vpop.eup %2907 }
 0x462   :  { %2909 = vtanh.f32 %v4149_v0  ;;  %v1724_v55 = vmul.f32 %v2908_v57, %v1693_v22  ;;  %vm1729_vm15 = vweird.f32 %v2908_v57 }
 0x463   :  { %2911 = vpow2.f32 %v2689_v15  ;;  %vm1730_vm3 = vmor %vm1728_vm2, %vm1729_vm15 }
 0x464   :  { %v1725_v27 = vsub.f32 1.0, %v1724_v55  ;;  %2913 = vpow2.f32 %v2687_v42 }
 0x466   :  { %v4141_v24 = vpop.permute.xlu1 %1525  ;;  %v1726_v54 = vmul.f32 %v2908_v57, %v1725_v27 }
 0x467   :  { %2682 = vmatmul.msk.f32.gmra.mxu0 %vm525_vm1, %v4141_v24 }
 0x468   :  { %v2910_v6 = vpop.eup %2909  ;;  %v1727_v59 = vadd.f32 %v2908_v57, %v1726_v54 }
 0x469   :  { %v2912_v41 = vpop.eup %2911 }
 0x46a   :  { %v1696_v2 = vadd.f32 1.0, %v2912_v41  ;;  %v2914_v58 = vpop.eup %2913  ;;  %v1731_v35 = vsel %vm1730_vm3, %v2908_v57, %v1727_v59  ;;  %v1441_v59 = vpop.f32.mrf.mxu3 }
 0x46b   :  { %v4165_v46 = vadd.f32 1.0, %v2914_v58  ;;  %v4168_v39 = vsel %vm1733_vm4, %v1735_v7, %v1731_v35  ;;  %v1472_v20 = vadd.f32 %v4059_v37, %v1441_v59  ;;  %v2692_v59 = vmul.f32 -1.442695, %v4149_v0 }
 0x46c   :  { %2915 = vrcp.f32 %v1696_v2  ;;  %v1779_v61 = vand.u32 2147483648, %v1696_v2  ;;  %vm1773_vm6 = vweird.f32 %v1696_v2  ;;  %v1777_v4 = vand.u32 2147483647, %v1696_v2 }
 0x46d   :  { %2917 = vpow2.f32 %v2688_v44  ;;  %vm1743_vm10 = vweird.f32 %v4165_v46  ;;  %v1747_v36 = vand.u32 2147483647, %v4165_v46 }
 0x46e   :  { %v2013_v31 = vpop.permute.xlu1 %2012  ;;  %2919 = vrcp.f32 %v4165_v46  ;;  %v1780_v48 = vor.u32 1.1754944e-38, %v1779_v61  ;;  %vm1778_vm8 = vcmp.eq.f32.partialorder %v1777_v4, 8.507059e+37 }
 0x46f   :  { %v2060_v32 = vmul.f32 %v2013_v31, %v4151_v11  ;;  %2683 = vmatmul.msk.f32.gmra.mxu0 %vm525_vm1, %v4147_v60  ;;  %vm1748_vm12 = vcmp.eq.f32.partialorder %v1747_v36, 8.507059e+37 }
 0x471   :  { %2092 = vrot.lane.b32.xlu1 %v2060_v32, %s3041_s20 }
 0x472   :  { %v2916_v49 = vpop.eup %2915 }
 0x473   :  { %v2918_v5 = vpop.eup %2917  ;;  %v1769_v63 = vmul.f32 %v2916_v49, %v1696_v2  ;;  %vm1774_vm5 = vweird.f32 %v2916_v49  ;;  %v1749_v2 = vand.u32 2147483648, %v4165_v46 }
 0x474   :  { %v4176_v53 = vadd.f32 1.0, %v2918_v5  ;;  %v2920_v51 = vpop.eup %2919  ;;  %vm1775_vm7 = vmor %vm1773_vm6, %vm1774_vm5 }
 0x475   :  { %v1770_v8 = vsub.f32 1.0, %v1769_v63  ;;  %v1739_v12 = vmul.f32 %v2920_v51, %v4165_v46  ;;  %vm1744_vm9 = vweird.f32 %v2920_v51  ;;  %v1750_v35 = vor.u32 1.1754944e-38, %v1749_v2  ;;  %v1444_v63 = vpop.f32.mrf.mxu3 }
 0x476   :  { %vm1745_vm11 = vmor %vm1743_vm10, %vm1744_vm9  ;;  %vm1758_vm14 = vweird.f32 %v4176_v53 }
 0x477   :  { %2684 = vmatmul.msk.f32.gmra.mxu0 %vm525_vm1, %v4158_v14  ;;  %v1771_v17 = vmul.f32 %v2916_v49, %v1770_v8  ;;  %v1740_v22 = vsub.f32 1.0, %v1739_v12 }
 0x479   :  { %2026 = vrot.lane.b32.xlu1 %v2910_v6, %s3041_s20  ;;  %v1772_v1 = vadd.f32 %v2916_v49, %v1771_v17  ;;  %v1741_v31 = vmul.f32 %v2920_v51, %v1740_v22  ;;  %v1473_v17 = vadd.f32 %v4059_v37, %v1444_v63 }
 0x47b   :  { %v1776_v10 = vsel %vm1775_vm7, %v2916_v49, %v1772_v1  ;;  %v1742_v41 = vadd.f32 %v2920_v51, %v1741_v31  ;;  %v1764_v49 = vand.u32 2147483648, %v4176_v53 }
 0x47c   :  { %v4186_v6 = vsel %vm1778_vm8, %v1780_v48, %v1776_v10 }
 0x47d   :  { %v1746_v43 = vsel %vm1745_vm11, %v2920_v51, %v1742_v41  ;;  %v1762_v51 = vand.u32 2147483647, %v4176_v53 }
 0x47e   :  { %v2015_v40 = vpop.permute.xlu2 %2014 }
 0x47f   :  { %v2061_v38 = vmul.f32 %v2015_v40, %v4168_v39  ;;  %v1604_v13 = vpop.f32.mrf.mxu0  ;;  %vm1763_vm2 = vcmp.eq.f32.partialorder %v1762_v51, 8.507059e+37 }
 0x480   :  { %v4171_v25 = vadd.f32 %v1604_v13, %v1471_v19  ;;  %v4200_v19 = vsel %vm1748_vm12, %v1750_v35, %v1746_v43 }
 0x481   :  { %2094 = vrot.lane.b32.xlu0 %v2061_v38, %s3041_s20 }
 0x482   :  { %2921 = vtanh.f32 %v4171_v25 }
 0x483   :  { %2923 = vrcp.f32 %v4176_v53 }
 0x484   :  { %2925 = vpow2.f32 %v2690_v52  ;;  %v1765_v52 = vor.u32 1.1754944e-38, %v1764_v49 }
 0x485   :  { %2927 = vpow2.f32 %v2691_v45 }
 0x487   :  { %v1607_v44 = vpop.f32.mrf.mxu0 }
 0x488   :  { %v2922_v47 = vpop.eup %2921  ;;  %v4198_v7 = vadd.f32 %v1607_v44, %v1472_v20 }
 0x489   :  { %2028 = vrot.lane.b32.xlu0 %v2922_v47, %s3041_s20  ;;  %v2924_v33 = vpop.eup %2923 }
 0x48a   :  { %v2926_v9 = vpop.eup %2925  ;;  %v1754_v32 = vmul.f32 %v2924_v33, %v4176_v53  ;;  %vm1759_vm13 = vweird.f32 %v2924_v33 }
 0x48b   :  { %v2928_v57 = vpop.eup %2927  ;;  %v4184_v15 = vadd.f32 1.0, %v2926_v9  ;;  %vm1760_vm15 = vmor %vm1758_vm14, %vm1759_vm13 }
 0x48c   :  { %v4188_v27 = vadd.f32 1.0, %v2928_v57  ;;  %v1755_v54 = vsub.f32 1.0, %v1754_v32 }
 0x48d   :  { %2929 = vrcp.f32 %v4184_v15  ;;  %vm1788_vm5 = vweird.f32 %v4184_v15  ;;  %v1792_v36 = vand.u32 2147483647, %v4184_v15 }
 0x48e   :  { %2931 = vrcp.f32 %v4188_v27  ;;  %v1756_v58 = vmul.f32 %v2924_v33, %v1755_v54  ;;  %v1794_v54 = vand.u32 2147483648, %v4184_v15  ;;  %v1809_v44 = vand.u32 2147483648, %v4188_v27 }
 0x48f   :  { %2933 = vtanh.f32 %v4198_v7  ;;  %vm1803_vm7 = vweird.f32 %v4188_v27  ;;  %v1807_v43 = vand.u32 2147483647, %v4188_v27  ;;  %vm1793_vm9 = vcmp.eq.f32.partialorder %v1792_v36, 8.507059e+37 }
 0x490   :  { %v1757_v46 = vadd.f32 %v2924_v33, %v1756_v58  ;;  %v1795_v35 = vor.u32 1.1754944e-38, %v1794_v54 }
 0x491   :  { %vm1808_vm10 = vcmp.eq.f32.partialorder %v1807_v43, 8.507059e+37 }
 0x492   :  { %v1761_v8 = vsel %vm1760_vm15, %v2924_v33, %v1757_v46  ;;  %v1447_v33 = vpop.f32.mrf.mxu3 }
 0x493   :  { %v2930_v13 = vpop.eup %2929  ;;  %v4211_v1 = vsel %vm1763_vm2, %v1765_v52, %v1761_v8  ;;  %v1474_v57 = vadd.f32 %v4059_v37, %v1447_v33  ;;  %v1980_v33 = vmul.f32 %v4151_v11, %v3936_v56 }
 0x494   :  { %v2932_v5 = vpop.eup %2931  ;;  %v1784_v47 = vmul.f32 %v2930_v13, %v4184_v15  ;;  %vm1789_vm3 = vweird.f32 %v2930_v13 }
 0x495   :  { %v1799_v45 = vmul.f32 %v2932_v5, %v4188_v27  ;;  %v2934_v53 = vpop.eup %2933  ;;  %vm1804_vm4 = vweird.f32 %v2932_v5  ;;  %vm1790_vm6 = vmor %vm1788_vm5, %vm1789_vm3 }
 0x496   :  { %v1785_v4 = vsub.f32 1.0, %v1784_v47  ;;  %vm1805_vm8 = vmor %vm1803_vm7, %vm1804_vm4 }
 0x497   :  { %v1800_v10 = vsub.f32 1.0, %v1799_v45 }
 0x498   :  { %v1786_v31 = vmul.f32 %v2930_v13, %v1785_v4 }
 0x499   :  { %v1801_v32 = vmul.f32 %v2932_v5, %v1800_v10  ;;  %v2694_v10 = vmul.f32 -1.442695, %v4198_v7 }
 0x49a   :  { %v1450_v58 = vpop.f32.mrf.mxu3 }
 0x49b   :  { %v1802_v2 = vadd.f32 %v2932_v5, %v1801_v32 }
 0x49d   :  { %v1806_v0 = vsel %vm1805_vm8, %v2932_v5, %v1802_v2 }
 0x4a0   :  { %v1610_v61 = vpop.f32.mrf.mxu0 }
 0x4a1   :  { %v4214_v9 = vadd.f32 %v1610_v61, %v1473_v17 }
 0x4a2   :  { %v1453_v61 = vpop.f32.mrf.mxu3 }
 0x4a3   :  { %v2021_v55 = vpop.permute.xlu2 %2020  ;;  %2935 = vtanh.f32 %v4214_v9 }
 0x4a4   :  { %v2064_v42 = vmul.f32 %v2021_v55, %v4186_v6  ;;  %v1787_v55 = vadd.f32 %v2930_v13, %v1786_v31  ;;  %v1476_v31 = vadd.f32 %v4059_v37, %v1453_v61 }
 0x4a6   :  { %2100 = vrot.lane.b32.xlu0 %v2064_v42, %s3041_s20  ;;  %v2017_v40 = vpop.permute.xlu0 %2016  ;;  %v1791_v20 = vsel %vm1790_vm6, %v2930_v13, %v1787_v55 }
 0x4a7   :  { %v2062_v38 = vmul.f32 %v2017_v40, %v4200_v19  ;;  %v1810_v40 = vor.u32 1.1754944e-38, %v1809_v44  ;;  %v4232_v15 = vsel %vm1793_vm9, %v1795_v35, %v1791_v20 }
 0x4a9   :  { %2096 = vrot.lane.b32.xlu2 %v2062_v38, %s3041_s20  ;;  %v2936_v42 = vpop.eup %2935  ;;  %v1475_v38 = vadd.f32 %v4059_v37, %v1450_v58  ;;  %v4235_v51 = vsel %vm1808_vm10, %v1810_v40, %v1806_v0 }
 0x4aa   :  { %v1456_v2 = vpop.f32.mrf.mxu3 }
 0x4ab   :  { %v1477_v43 = vadd.f32 %v4059_v37, %v1456_v2 }
 0x4b1   :  { %v2019_v12 = vpop.permute.xlu1 %2018  ;;  %2030 = vrot.lane.b32.xlu2 %v2934_v53, %s3041_s20 }
 0x4b2   :  { %v2063_v22 = vmul.f32 %v2019_v12, %v4211_v1 }
 0x4b4   :  { %2098 = vrot.lane.b32.xlu1 %v2063_v22, %s3041_s20  ;;  %v2693_v22 = vmul.f32 -1.442695, %v4171_v25 }
 0x4ba   :  { %v1613_v48 = vpop.f32.mrf.mxu0 }
 0x4bb   :  { %v4220_v41 = vadd.f32 %v1613_v48, %v1474_v57  ;;  %v2025_v27 = vpop.permute.xlu2 %2024 }
 0x4bc   :  { %2032 = vrot.lane.b32.xlu1 %v2936_v42, %s3041_s20  ;;  %v2066_v5 = vmul.f32 %v2025_v27, %v4235_v51 }
 0x4bd   :  { %2937 = vtanh.f32 %v4220_v41 }
 0x4be   :  { %2939 = vpow2.f32 %v2692_v59 }
 0x4c3   :  { %v2023_v46 = vpop.permute.xlu0 %2022  ;;  %v1616_v63 = vpop.f32.mrf.mxu0 }
 0x4c4   :  { %v2065_v49 = vmul.f32 %v2023_v46, %v4232_v15  ;;  %v2938_v8 = vpop.eup %2937  ;;  %v4237_v13 = vadd.f32 %v1616_v63, %v1475_v38  ;;  %2104 = vrot.lane.b32.xlu1 %v2066_v5, %s3041_s20 }
 0x4c5   :  { %2034 = vrot.lane.b32.xlu0 %v2938_v8, %s3041_s20  ;;  %v2940_v47 = vpop.eup %2939 }
 0x4c6   :  { %2102 = vrot.lane.b32.xlu2 %v2065_v49, %s3041_s20  ;;  %2941 = vtanh.f32 %v4237_v13  ;;  %v1699_v52 = vadd.f32 1.0, %v2940_v47  ;;  %v1459_v49 = vpop.f32.mrf.mxu3 }
 0x4c7   :  { %v1478_v8 = vadd.f32 %v4059_v37, %v1459_v49  ;;  %v1981_v37 = vmul.f32 %v4168_v39, %v3979_v30  ;;  %v1982_v30 = vmul.f32 %v4200_v19, %v3983_v62 }
 0x4c8   :  { %2943 = vrcp.f32 %v1699_v52  ;;  %v1824_v54 = vand.u32 2147483648, %v1699_v52  ;;  %vm1818_vm12 = vweird.f32 %v1699_v52  ;;  %v1822_v7 = vand.u32 2147483647, %v1699_v52 }
 0x4c9   :  { %2945 = vpow2.f32 %v2693_v22 }
 0x4ca   :  { %2947 = vpow2.f32 %v2694_v10  ;;  %v1825_v36 = vor.u32 1.1754944e-38, %v1824_v54  ;;  %vm1823_vm14 = vcmp.eq.f32.partialorder %v1822_v7, 8.507059e+37 }
 0x4cc   :  { %v2942_v45 = vpop.eup %2941 }
 0x4cd   :  { %2036 = vrot.lane.b32.xlu0 %v2942_v45, %s3041_s20 }
 0x4ce   :  { %v2944_v17 = vpop.eup %2943 }
 0x4cf   :  { %v1814_v12 = vmul.f32 %v2944_v17, %v1699_v52  ;;  %vm1819_vm11 = vweird.f32 %v2944_v17  ;;  %v2946_v42 = vpop.eup %2945 }
 0x4d0   :  { %vm1820_vm13 = vmor %vm1818_vm12, %vm1819_vm11  ;;  %v1700_v56 = vadd.f32 1.0, %v2946_v42  ;;  %v2948_v44 = vpop.eup %2947 }
 0x4d1   :  { %v1815_v4 = vsub.f32 1.0, %v1814_v12  ;;  %v1701_v63 = vadd.f32 1.0, %v2948_v44 }
 0x4d2   :  { %vm1833_vm2 = vweird.f32 %v1700_v56 }
 0x4d3   :  { %v1816_v53 = vmul.f32 %v2944_v17, %v1815_v4  ;;  %vm1848_vm6 = vweird.f32 %v1701_v63  ;;  %v1852_v62 = vand.u32 2147483647, %v1701_v63 }
 0x4d5   :  { %v1817_v55 = vadd.f32 %v2944_v17, %v1816_v53  ;;  %vm1853_vm8 = vcmp.eq.f32.partialorder %v1852_v62, 8.507059e+37 }
 0x4d7   :  { %v1821_v59 = vsel %vm1820_vm13, %v2944_v17, %v1817_v55  ;;  %v1837_v55 = vand.u32 2147483647, %v1700_v56 }
 0x4d8   :  { %v4257_v20 = vsel %vm1823_vm14, %v1825_v36, %v1821_v59 }
 0x4d9   :  { %vm1838_vm4 = vcmp.eq.f32.partialorder %v1837_v55, 8.507059e+37 }
 0x4e3   :  { %v2093_v32 = vpop.permute.xlu1 %2092 }
 0x4e4   :  { %v4250_v57 = vadd.f32 %v2093_v32, %v1980_v33  ;;  %v1619_v48 = vpop.f32.mrf.mxu0  ;;  %v1839_v32 = vand.u32 2147483648, %v1700_v56 }
 0x4e5   :  { %v4252_v25 = vadd.f32 %v1619_v48, %v1476_v31  ;;  %v2695_v48 = vmul.f32 -1.442695, %v4214_v9 }
 0x4e6   :  { %2949 = vtanh.f32 %v4250_v57  ;;  %v1840_v2 = vor.u32 1.1754944e-38, %v1839_v32 }
 0x4e7   :  { %2951 = vtanh.f32 %v4252_v25 }
 0x4e8   :  { %2953 = vrcp.f32 %v1700_v56 }
 0x4eb   :  { %v2027_v58 = vpop.permute.xlu1 %2026 }
 0x4ec   :  { %v2950_v35 = vpop.eup %2949  ;;  %v2067_v0 = vmul.f32 %v2027_v58, %v4257_v20  ;;  %v1622_v40 = vpop.f32.mrf.mxu0 }
 0x4ed   :  { %v2952_v38 = vpop.eup %2951  ;;  %v4260_v46 = vadd.f32 %v1622_v40, %v1477_v43  ;;  %2188 = vrot.lane.b32.xlu2 %v2950_v35, %s3041_s20  ;;  %v2696_v35 = vmul.f32 -1.442695, %v4220_v41  ;;  %v2697_v41 = vmul.f32 -1.442695, %v4237_v13  ;;  %v1983_v13 = vmul.f32 %v4211_v1, %v3987_v50 }
 0x4ee   :  { %2038 = vrot.lane.b32.xlu0 %v2952_v38, %s3041_s20  ;;  %2106 = vrot.lane.b32.xlu1 %v2067_v0, %s3041_s20  ;;  %v2954_v27 = vpop.eup %2953 }
 0x4ef   :  { %2955 = vtanh.f32 %v4260_v46  ;;  %v1829_v45 = vmul.f32 %v2954_v27, %v1700_v56  ;;  %vm1834_vm15 = vweird.f32 %v2954_v27  ;;  %v1854_v56 = vand.u32 2147483648, %v1701_v63 }
 0x4f0   :  { %2957 = vrcp.f32 %v1701_v63  ;;  %vm1835_vm3 = vmor %vm1833_vm2, %vm1834_vm15 }
 0x4f1   :  { %v1830_v17 = vsub.f32 1.0, %v1829_v45  ;;  %v1855_v38 = vor.u32 1.1754944e-38, %v1854_v56 }
 0x4f3   :  { %v1831_v61 = vmul.f32 %v2954_v27, %v1830_v17  ;;  %v2095_v53 = vpop.permute.xlu0 %2094 }
 0x4f4   :  { %v1625_v5 = vpop.f32.mrf.mxu0  ;;  %v4274_v10 = vadd.f32 %v2095_v53, %v1981_v37 }
 0x4f5   :  { %v2956_v47 = vpop.eup %2955  ;;  %v4267_v52 = vadd.f32 %v1625_v5, %v1478_v8  ;;  %v1832_v33 = vadd.f32 %v2954_v27, %v1831_v61 }
 0x4f6   :  { %2040 = vrot.lane.b32.xlu0 %v2956_v47, %s3041_s20  ;;  %v2958_v12 = vpop.eup %2957 }
 0x4f7   :  { %2959 = vtanh.f32 %v4267_v52  ;;  %v1844_v4 = vmul.f32 %v2958_v12, %v1701_v63  ;;  %v1836_v42 = vsel %vm1835_vm3, %v2954_v27, %v1832_v33  ;;  %vm1849_vm5 = vweird.f32 %v2958_v12 }
 0x4f8   :  { %2961 = vtanh.f32 %v4274_v10  ;;  %v4280_v7 = vsel %vm1838_vm4, %v1840_v2, %v1836_v42  ;;  %vm1850_vm7 = vmor %vm1848_vm6, %vm1849_vm5 }
 0x4f9   :  { %v1845_v31 = vsub.f32 1.0, %v1844_v4  ;;  %2963 = vpow2.f32 %v2695_v48 }
 0x4fb   :  { %v1846_v54 = vmul.f32 %v2958_v12, %v1845_v31  ;;  %v2029_v59 = vpop.permute.xlu0 %2028 }
 0x4fc   :  { %v2068_v9 = vmul.f32 %v2029_v59, %v4280_v7  ;;  %v1984_v59 = vmul.f32 %v4186_v6, %v4001_v28 }
 0x4fd   :  { %v2960_v22 = vpop.eup %2959  ;;  %v1847_v58 = vadd.f32 %v2958_v12, %v1846_v54 }
 0x4fe   :  { %2042 = vrot.lane.b32.xlu0 %v2960_v22, %s3041_s20  ;;  %v2962_v44 = vpop.eup %2961  ;;  %2108 = vrot.lane.b32.xlu1 %v2068_v9, %s3041_s20 }
 0x4ff   :  { %2190 = vrot.lane.b32.xlu2 %v2962_v44, %s3041_s20  ;;  %v2964_v0 = vpop.eup %2963  ;;  %v1851_v40 = vsel %vm1850_vm7, %v2958_v12, %v1847_v58  ;;  %v1985_v58 = vmul.f32 %v4232_v15, %v4009_v3  ;;  %v2698_v3 = vmul.f32 -1.442695, %v4252_v25  ;;  %v1986_v25 = vmul.f32 %v4235_v51, %v4038_v18 }
 0x500   :  { %v1702_v49 = vadd.f32 1.0, %v2964_v0  ;;  %v4289_v27 = vsel %vm1853_vm8, %v1855_v38, %v1851_v40  ;;  %vm2252_vm7 = vcmask 785920  }
 0x502   :  { %v1869_v54 = vand.u32 2147483648, %v1702_v49  ;;  %vm1863_vm10 = vweird.f32 %v1702_v49  ;;  %v1867_v2 = vand.u32 2147483647, %v1702_v49 }
 0x503   :  { %v2097_v36 = vpop.permute.xlu2 %2096 }
 0x504   :  { %v4283_v43 = vadd.f32 %v2097_v36, %v1982_v30  ;;  %v1870_v56 = vor.u32 1.1754944e-38, %v1869_v54  ;;  %vm1868_vm12 = vcmp.eq.f32.partialorder %v1867_v2, 8.507059e+37 }
 0x506   :  { %2965 = vtanh.f32 %v4283_v43 }
 0x507   :  { %2967 = vpow2.f32 %v2696_v35 }
 0x508   :  { %2969 = vrcp.f32 %v1702_v49 }
 0x509   :  { %2971 = vpow2.f32 %v2697_v41 }
 0x50b   :  { %v2031_v8 = vpop.permute.xlu2 %2030 }
 0x50c   :  { %v2966_v5 = vpop.eup %2965  ;;  %v2069_v47 = vmul.f32 %v2031_v8, %v4289_v27 }
 0x50d   :  { %2192 = vrot.lane.b32.xlu2 %v2966_v5, %s3041_s20  ;;  %v2968_v63 = vpop.eup %2967 }
 0x50e   :  { %2110 = vrot.lane.b32.xlu1 %v2069_v47, %s3041_s20  ;;  %v1703_v45 = vadd.f32 1.0, %v2968_v63  ;;  %v2970_v17 = vpop.eup %2969 }
 0x50f   :  { %v2972_v12 = vpop.eup %2971  ;;  %v1859_v22 = vmul.f32 %v2970_v17, %v1702_v49  ;;  %vm1864_vm9 = vweird.f32 %v2970_v17 }
 0x510   :  { %2973 = vrcp.f32 %v1703_v45  ;;  %v4295_v61 = vadd.f32 1.0, %v2972_v12  ;;  %vm1865_vm11 = vmor %vm1863_vm10, %vm1864_vm9  ;;  %v1884_v5 = vand.u32 2147483648, %v1703_v45  ;;  %vm1878_vm14 = vweird.f32 %v1703_v45 }
 0x511   :  { %v1860_v4 = vsub.f32 1.0, %v1859_v22  ;;  %v1882_v47 = vand.u32 2147483647, %v1703_v45 }
 0x512   :  { %2975 = vrcp.f32 %v4295_v61  ;;  %vm1893_vm4 = vweird.f32 %v4295_v61  ;;  %v1897_v18 = vand.u32 2147483647, %v4295_v61 }
 0x513   :  { %v1861_v53 = vmul.f32 %v2970_v17, %v1860_v4  ;;  %vm1883_vm2 = vcmp.eq.f32.partialorder %v1882_v47, 8.507059e+37 }
 0x514   :  { %vm1898_vm6 = vcmp.eq.f32.partialorder %v1897_v18, 8.507059e+37 }
 0x515   :  { %v1862_v48 = vadd.f32 %v2970_v17, %v1861_v53 }
 0x516   :  { %v2974_v37 = vpop.eup %2973 }
 0x517   :  { %v1874_v33 = vmul.f32 %v2974_v37, %v1703_v45  ;;  %v1866_v50 = vsel %vm1865_vm11, %v2970_v17, %v1862_v48  ;;  %vm1879_vm13 = vweird.f32 %v2974_v37  ;;  %v1885_v17 = vor.u32 1.1754944e-38, %v1884_v5 }
 0x518   :  { %v4302_v42 = vpop.eup %2975  ;;  %v2101_v30 = vpop.permute.xlu0 %2100  ;;  %v4315_v40 = vsel %vm1868_vm12, %v1870_v56, %v1866_v50  ;;  %vm1880_vm15 = vmor %vm1878_vm14, %vm1879_vm13  ;;  %v2699_v48 = vmul.f32 -1.442695, %v4260_v46 }
 0x519   :  { %v1875_v55 = vsub.f32 1.0, %v1874_v33  ;;  %v1889_v9 = vmul.f32 %v4302_v42, %v4295_v61  ;;  %v4311_v35 = vadd.f32 %v2101_v30, %v1984_v59  ;;  %vm1894_vm3 = vweird.f32 %v4302_v42 }
 0x51a   :  { %vm1895_vm5 = vmor %vm1893_vm4, %vm1894_vm3 }
 0x51b   :  { %v1876_v44 = vmul.f32 %v2974_v37, %v1875_v55  ;;  %v1890_v8 = vsub.f32 1.0, %v1889_v9 }
 0x51d   :  { %v1877_v49 = vadd.f32 %v2974_v37, %v1876_v44  ;;  %v1891_v63 = vmul.f32 %v4302_v42, %v1890_v8  ;;  %v2700_v44 = vmul.f32 -1.442695, %v4267_v52 }
 0x51f   :  { %v1881_v41 = vsel %vm1880_vm15, %v2974_v37, %v1877_v49  ;;  %v1892_v45 = vadd.f32 %v4302_v42, %v1891_v63 }
 0x520   :  { %v2103_v36 = vpop.permute.xlu2 %2102  ;;  %v4324_v12 = vsel %vm1883_vm2, %v1885_v17, %v1881_v41 }
 0x521   :  { %v4313_v62 = vadd.f32 %v2103_v36, %v1985_v58  ;;  %v1896_v54 = vsel %vm1895_vm5, %v4302_v42, %v1892_v45 }
 0x526   :  { %v2099_v31 = vpop.permute.xlu1 %2098 }
 0x527   :  { %v4300_v32 = vadd.f32 %v2099_v31, %v1983_v13  ;;  %v1899_v31 = vand.u32 2147483648, %v4295_v61 }
 0x529   :  { %2977 = vtanh.f32 %v4300_v32  ;;  %v1900_v2 = vor.u32 1.1754944e-38, %v1899_v31 }
 0x52a   :  { %2979 = vtanh.f32 %v4311_v35 }
 0x52b   :  { %2981 = vtanh.f32 %v4313_v62  ;;  %v4342_v59 = vsel %vm1898_vm6, %v1900_v2, %v1896_v54  ;;  %vm2333_vm6 = vcmask 1048320  }
 0x52c   :  { %2983 = vpow2.f32 %v2698_v3 }
 0x52e   :  { %v2033_v0 = vpop.permute.xlu1 %2032 }
 0x52f   :  { %v2978_v38 = vpop.eup %2977  ;;  %v2070_v28 = vmul.f32 %v2033_v0, %v4315_v40 }
 0x530   :  { %2194 = vrot.lane.b32.xlu2 %v2978_v38, %s3041_s20  ;;  %v2980_v4 = vpop.eup %2979 }
 0x531   :  { %2112 = vrot.lane.b32.xlu1 %v2070_v28, %s3041_s20  ;;  %v2982_v37 = vpop.eup %2981 }
 0x532   :  { %v2984_v55 = vpop.eup %2983 }
 0x533   :  { %v1705_v30 = vadd.f32 1.0, %v2984_v55 }
 0x535   :  { %v1914_v41 = vand.u32 2147483648, %v1705_v30  ;;  %vm1908_vm9 = vweird.f32 %v1705_v30  ;;  %v1912_v63 = vand.u32 2147483647, %v1705_v30 }
 0x536   :  { %v2105_v33 = vpop.permute.xlu1 %2104 }
 0x537   :  { %v2035_v22 = vpop.permute.xlu0 %2034  ;;  %v4331_v13 = vadd.f32 %v2105_v33, %v1986_v25  ;;  %vm1913_vm11 = vcmp.eq.f32.partialorder %v1912_v63, 8.507059e+37 }
 0x538   :  { %v2071_v53 = vmul.f32 %v2035_v22, %v4324_v12  ;;  %2196 = vrot.lane.b32.xlu2 %v2980_v4, %s3041_s20  ;;  %v1915_v4 = vor.u32 1.1754944e-38, %v1914_v41  ;;  %v1988_v41 = vmul.f32 %v4280_v7, %v4098_v29 }
 0x539   :  { %2198 = vrot.lane.b32.xlu1 %v2982_v37, %s3041_s20  ;;  %2985 = vtanh.f32 %v4331_v13 }
 0x53a   :  { %2114 = vrot.lane.b32.xlu0 %v2071_v53, %s3041_s20  ;;  %2987 = vpow2.f32 %v2699_v48  ;;  %v1987_v53 = vmul.f32 %v4257_v20, %v4026_v16 }
 0x53b   :  { %2989 = vrcp.f32 %v1705_v30 }
 0x53c   :  { %2991 = vpow2.f32 %v2700_v44 }
 0x53f   :  { %v2037_v46 = vpop.permute.xlu0 %2036  ;;  %v2986_v50 = vpop.eup %2985 }
 0x540   :  { %v2072_v36 = vmul.f32 %v2037_v46, %v4342_v59  ;;  %v2988_v61 = vpop.eup %2987 }
 0x541   :  { %2200 = vrot.lane.b32.xlu1 %v2986_v50, %s3041_s20  ;;  %v1706_v9 = vadd.f32 1.0, %v2988_v61  ;;  %v2990_v56 = vpop.eup %2989 }
 0x542   :  { %2116 = vrot.lane.b32.xlu0 %v2072_v36, %s3041_s20  ;;  %v2992_v52 = vpop.eup %2991  ;;  %v1904_v0 = vmul.f32 %v2990_v56, %v1705_v30  ;;  %vm1909_vm8 = vweird.f32 %v2990_v56 }
 0x543   :  { %2993 = vrcp.f32 %v1706_v9  ;;  %v1707_v38 = vadd.f32 1.0, %v2992_v52  ;;  %vm1910_vm10 = vmor %vm1908_vm9, %vm1909_vm8  ;;  %v1929_v54 = vand.u32 2147483648, %v1706_v9  ;;  %vm1923_vm13 = vweird.f32 %v1706_v9 }
 0x544   :  { %v1905_v28 = vsub.f32 1.0, %v1904_v0  ;;  %v1927_v2 = vand.u32 2147483647, %v1706_v9 }
 0x545   :  { %2995 = vrcp.f32 %v1707_v38  ;;  %v1930_v50 = vor.u32 1.1754944e-38, %v1929_v54  ;;  %vm1938_vm3 = vweird.f32 %v1707_v38 }
 0x546   :  { %v1906_v8 = vmul.f32 %v2990_v56, %v1905_v28  ;;  %vm1928_vm15 = vcmp.eq.f32.partialorder %v1927_v2, 8.507059e+37 }
 0x547   :  { %v2189_v42 = vpop.permute.xlu2 %2188 }
 0x548   :  { %v2236_v58 = vmul.f32 %v2189_v42, %v4151_v11  ;;  %v1907_v3 = vadd.f32 %v2990_v56, %v1906_v8 }
 0x549   :  { %v2994_v49 = vpop.eup %2993 }
 0x54a   :  { %2372 = vrot.lane.b32.xlu2 %v2236_v58, %s3042_s23  ;;  %2253 = vst.msk [vmem:[%s4770_s4] sm:$0xff] %vm2252_vm7, %v2236_v58  ;;  %v1919_v5 = vmul.f32 %v2994_v49, %v1706_v9  ;;  %v1911_v17 = vsel %vm1910_vm10, %v2990_v56, %v1907_v3  ;;  %vm1924_vm12 = vweird.f32 %v2994_v49  ;;  %v1942_v56 = vand.u32 2147483647, %v1707_v38 }
 0x54b   :  { %v2996_v47 = vpop.eup %2995  ;;  %v4356_v33 = vsel %vm1913_vm11, %v1915_v4, %v1911_v17  ;;  %vm1925_vm14 = vmor %vm1923_vm13, %vm1924_vm12 }
 0x54c   :  { %v1920_v11 = vsub.f32 1.0, %v1919_v5  ;;  %v1934_v25 = vmul.f32 %v2996_v47, %v1707_v38  ;;  %vm1939_vm2 = vweird.f32 %v2996_v47  ;;  %vm1943_vm5 = vcmp.eq.f32.partialorder %v1942_v56, 8.507059e+37 }
 0x54d   :  { %vm1940_vm4 = vmor %vm1938_vm3, %vm1939_vm2 }
 0x54e   :  { %v1921_v22 = vmul.f32 %v2994_v49, %v1920_v11  ;;  %v1935_v55 = vsub.f32 1.0, %v1934_v25  ;;  %v2351_v11 = vld [vmem:[%s4768_s2 + $0x98] sm:$0xff] }
 0x550   :  { %v1922_v18 = vadd.f32 %v2994_v49, %v1921_v22  ;;  %v1936_v36 = vmul.f32 %v2996_v47, %v1935_v55  ;;  %v1989_v22 = vmul.f32 %v4289_v27, %v4102_v34 }
 0x552   :  { %v1926_v46 = vsel %vm1925_vm14, %v2994_v49, %v1922_v18  ;;  %v1937_v58 = vadd.f32 %v2996_v47, %v1936_v36  ;;  %v1990_v18 = vmul.f32 %v4315_v40, %v4113_v26  ;;  %v1992_v26 = vmul.f32 %v4342_v59, %v4128_v21 }
 0x553   :  { %v4369_v44 = vsel %vm1928_vm15, %v1930_v50, %v1926_v46 }
 0x554   :  { %v1941_v28 = vsel %vm1940_vm4, %v2996_v47, %v1937_v58  ;;  %v2350_v47 = vld [vmem:[%s4768_s2 + $0x90] sm:$0xff] }
 0x559   :  { %v2191_v30 = vpop.permute.xlu2 %2190 }
 0x55a   :  { %v2237_v16 = vmul.f32 %v2191_v30, %v4168_v39  ;;  %v1944_v39 = vand.u32 2147483648, %v1707_v38  ;;  %v2352_v38 = vld [vmem:[%s4768_s2 + $0xa0] sm:$0xff] }
 0x55c   :  { %2374 = vrot.lane.b32.xlu2 %v2237_v16, %s3042_s23  ;;  %2254 = vst.msk [vmem:[%s4770_s4 + $0x8] sm:$0xff] %vm2252_vm7, %v2237_v16  ;;  %v1945_v49 = vor.u32 1.1754944e-38, %v1944_v39 }
 0x55e   :  { %v4380_v8 = vsel %vm1943_vm5, %v1945_v49, %v1941_v28 }
 0x560   :  { %v2039_v45 = vpop.permute.xlu0 %2038  ;;  %v2107_v37 = vpop.permute.xlu1 %2106 }
 0x561   :  { %v2073_v31 = vmul.f32 %v2039_v45, %v4356_v33  ;;  %v4359_v48 = vadd.f32 %v2107_v37, %v1987_v53 }
 0x563   :  { %2997 = vtanh.f32 %v4359_v48  ;;  %2118 = vrot.lane.b32.xlu0 %v2073_v31, %s3041_s20 }
 0x567   :  { %v2193_v52 = vpop.permute.xlu2 %2192 }
 0x568   :  { %v2041_v61 = vpop.permute.xlu0 %2040  ;;  %v2238_v0 = vmul.f32 %v2193_v52, %v4200_v19  ;;  %v2353_v19 = vld [vmem:[%s4768_s2 + $0xa8] sm:$0xff] }
 0x569   :  { %v2998_v42 = vpop.eup %2997  ;;  %v2074_v9 = vmul.f32 %v2041_v61, %v4369_v44  ;;  %2448 = vmatpush.msrb.mxu1 %v2353_v19 }
 0x56a   :  { %2202 = vrot.lane.b32.xlu1 %v2998_v42, %s3041_s20  ;;  %2376 = vrot.lane.b32.xlu2 %v2238_v0, %s3042_s23  ;;  %2255 = vst.msk [vmem:[%s4770_s4 + $0x10] sm:$0xff] %vm2252_vm7, %v2238_v0  ;;  %v1994_v0 = vmul.f32 %v4369_v44, %v4147_v60 }
 0x56b   :  { %2120 = vrot.lane.b32.xlu0 %v2074_v9, %s3041_s20  ;;  %2449 = vmatpush.msrb.mxu1 %v2352_v38  ;;  %v1995_v38 = vmul.f32 %v4380_v8, %v4158_v14 }
 0x56d   :  { %2450 = vmatpush.msrb.mxu1 %v2351_v11 }
 0x56f   :  { %2451 = vmatpush.msrb.mxu1 %v2350_v47 }
 0x570   :  { %v2043_v5 = vpop.permute.xlu0 %2042  ;;  %v2109_v63 = vpop.permute.xlu1 %2108 }
 0x571   :  { %v2075_v3 = vmul.f32 %v2043_v5, %v4380_v8  ;;  %v4398_v17 = vadd.f32 %v2109_v63, %v1988_v41 }
 0x573   :  { %2122 = vrot.lane.b32.xlu0 %v2075_v3, %s3041_s20  ;;  %2999 = vtanh.f32 %v4398_v17 }
 0x579   :  { %v3000_v4 = vpop.eup %2999 }
 0x57a   :  { %2204 = vrot.lane.b32.xlu1 %v3000_v4, %s3041_s20 }
 0x580   :  { %v2111_v25 = vpop.permute.xlu1 %2110 }
 0x581   :  { %v4403_v53 = vadd.f32 %v2111_v25, %v1989_v22 }
 0x583   :  { %3001 = vtanh.f32 %v4403_v53 }
 0x589   :  { %v3002_v37 = vpop.eup %3001 }
 0x58a   :  { %v2195_v45 = vpop.permute.xlu2 %2194  ;;  %2206 = vrot.lane.b32.xlu1 %v3002_v37, %s3041_s20 }
 0x58b   :  { %v2239_v29 = vmul.f32 %v2195_v45, %v4211_v1 }
 0x58d   :  { %2378 = vrot.lane.b32.xlu2 %v2239_v29, %s3042_s23  ;;  %2256 = vst.msk [vmem:[%s4770_s4 + $0x18] sm:$0xff] %vm2252_vm7, %v2239_v29 }
 0x592   :  { %v2197_v34 = vpop.permute.xlu2 %2196 }
 0x593   :  { %v2240_v31 = vmul.f32 %v2197_v34, %v4186_v6  ;;  %v1991_v6 = vmul.f32 %v4324_v12, %v4122_v23 }
 0x595   :  { %2380 = vrot.lane.b32.xlu2 %v2240_v31, %s3042_s23  ;;  %2257 = vst.msk [vmem:[%s4770_s4 + $0x20] sm:$0xff] %vm2252_vm7, %v2240_v31  ;;  %v3024_v31 = vld [vmem:[%s4767_s0] sm:$0xff] }
 0x5a3   :  { %v2113_v55 = vpop.permute.xlu1 %2112 }
 0x5a4   :  { %v2373_v1 = vpop.permute.xlu2 %2372  ;;  %v4423_v54 = vadd.f32 %v2113_v55, %v1990_v18 }
 0x5a5   :  { %2701 = vmatmul.msk.f32.vlgmr.msrb.gmra.mxu1 %vm525_vm1, %v2373_v1 }
 0x5a6   :  { %3003 = vtanh.f32 %v4423_v54 }
 0x5ab   :  { %v2199_v30 = vpop.permute.xlu1 %2198 }
 0x5ac   :  { %v2115_v2 = vpop.permute.xlu0 %2114  ;;  %v3004_v16 = vpop.eup %3003  ;;  %v2241_v36 = vmul.f32 %v2199_v30, %v4232_v15 }
 0x5ad   :  { %v4428_v46 = vadd.f32 %v2115_v2, %v1991_v6  ;;  %2208 = vrot.lane.b32.xlu0 %v3004_v16, %s3041_s20 }
 0x5ae   :  { %2382 = vrot.lane.b32.xlu1 %v2241_v36, %s3042_s23  ;;  %2258 = vst.msk [vmem:[%s4770_s4 + $0x28] sm:$0xff] %vm2252_vm7, %v2241_v36 }
 0x5af   :  { %3005 = vtanh.f32 %v4428_v46 }
 0x5b3   :  { %v2201_v50 = vpop.permute.xlu1 %2200 }
 0x5b4   :  { %v2117_v23 = vpop.permute.xlu0 %2116  ;;  %v2242_v15 = vmul.f32 %v2201_v50, %v4235_v51  ;;  %v1993_v51 = vmul.f32 %v4356_v33, %v4141_v24 }
 0x5b5   :  { %v3006_v61 = vpop.eup %3005  ;;  %v4440_v42 = vadd.f32 %v2117_v23, %v1992_v26 }
 0x5b6   :  { %2210 = vrot.lane.b32.xlu2 %v3006_v61, %s3041_s20  ;;  %2384 = vrot.lane.b32.xlu0 %v2242_v15, %s3042_s23  ;;  %2259 = vst.msk [vmem:[%s4770_s4 + $0x30] sm:$0xff] %vm2252_vm7, %v2242_v15  ;;  %v2375_v21 = vpop.permute.xlu2 %2374  ;;  %v3026_v15 = vld [vmem:[%s4767_s0 + $0x10] sm:$0xff] }
 0x5b7   :  { %3007 = vtanh.f32 %v4440_v42  ;;  %2702 = vmatmul.msk.f32.gmra.mxu1 %vm525_vm1, %v2375_v21 }
 0x5bd   :  { %v3008_v9 = vpop.eup %3007 }
 0x5be   :  { %2212 = vrot.lane.b32.xlu1 %v3008_v9, %s3041_s20 }
 0x5c4   :  { %v2377_v58 = vpop.permute.xlu2 %2376 }
 0x5c5   :  { %2703 = vmatmul.msk.f32.gmra.mxu1 %vm525_vm1, %v2377_v58 }
 0x5d5   :  { %v2119_v39 = vpop.permute.xlu0 %2118 }
 0x5d6   :  { %v4455_v56 = vadd.f32 %v2119_v39, %v1993_v51  ;;  %v3027_v51 = vld [vmem:[%s4767_s0 + $0x18] sm:$0xff] }
 0x5d8   :  { %3009 = vtanh.f32 %v4455_v56 }
 0x5dc   :  { %v2203_v52 = vpop.permute.xlu1 %2202 }
 0x5dd   :  { %v2243_v28 = vmul.f32 %v2203_v52, %v4257_v20  ;;  %v2121_v49 = vpop.permute.xlu0 %2120  ;;  %v3028_v52 = vld [vmem:[%s4767_s0 + $0x20] sm:$0xff] }
 0x5de   :  { %v3010_v5 = vpop.eup %3009  ;;  %v4461_v3 = vadd.f32 %v2121_v49, %v1994_v0 }
 0x5df   :  { %2214 = vrot.lane.b32.xlu0 %v3010_v5, %s3041_s20  ;;  %2386 = vrot.lane.b32.xlu2 %v2243_v28, %s3042_s23  ;;  %2260 = vst.msk [vmem:[%s4770_s4 + $0x38] sm:$0xff] %vm2252_vm7, %v2243_v28  ;;  %v3029_v5 = vld [vmem:[%s4767_s0 + $0x28] sm:$0xff] }
 0x5e0   :  { %3011 = vtanh.f32 %v4461_v3 }
 0x5e5   :  { %v2123_v19 = vpop.permute.xlu0 %2122 }
 0x5e6   :  { %v3012_v24 = vpop.eup %3011  ;;  %v4475_v11 = vadd.f32 %v2123_v19, %v1995_v38 }
 0x5e7   :  { %2216 = vrot.lane.b32.xlu2 %v3012_v24, %s3041_s20  ;;  %v2379_v60 = vpop.permute.xlu2 %2378 }
 0x5e8   :  { %2704 = vmatmul.msk.f32.gmra.mxu1 %vm525_vm1, %v2379_v60  ;;  %3013 = vtanh.f32 %v4475_v11 }
 0x5ec   :  { %v2205_v47 = vpop.permute.xlu1 %2204 }
 0x5ed   :  { %v2244_v41 = vmul.f32 %v2205_v47, %v4280_v7 }
 0x5ee   :  { %v3014_v25 = vpop.eup %3013 }
 0x5ef   :  { %v2381_v20 = vpop.permute.xlu2 %2380  ;;  %2388 = vrot.lane.b32.xlu1 %v2244_v41, %s3042_s23  ;;  %2261 = vst.msk [vmem:[%s4770_s4 + $0x40] sm:$0xff] %vm2252_vm7, %v2244_v41 }
 0x5f0   :  { %2705 = vmatmul.msk.f32.gmra.mxu1 %vm525_vm1, %v2381_v20 }
 0x5f7   :  { %2218 = vrot.lane.b32.xlu1 %v3014_v25, %s3041_s20 }
 0x5fc   :  { %v2207_v63 = vpop.permute.xlu1 %2206 }
 0x5fd   :  { %v2245_v22 = vmul.f32 %v2207_v63, %v4289_v27  ;;  %v4500_v27 = vld [vmem:[%s4768_s2 + $0xb0] ss:$0 sm:$0xff] }
 0x5ff   :  { %2390 = vrot.lane.b32.xlu0 %v2245_v22, %s3042_s23  ;;  %2262 = vst.msk [vmem:[%s4770_s4 + $0x48] sm:$0xff] %vm2252_vm7, %v2245_v22  ;;  %v3031_v22 = vld [vmem:[%s4767_s0 + $0x38] sm:$0xff] }
 0x610   :  { %v2211_v14 = vpop.permute.xlu2 %2210 }
 0x611   :  { %v2247_v7 = vmul.f32 %v2211_v14, %v4324_v12 }
 0x613   :  { %2394 = vrot.lane.b32.xlu0 %v2247_v7, %s3042_s23  ;;  %2264 = vst.msk [vmem:[%s4770_s4 + $0x58] sm:$0xff] %vm2252_vm7, %v2247_v7 }
 0x61f   :  { %v2209_v4 = vpop.permute.xlu0 %2208 }
 0x620   :  { %v2246_v45 = vmul.f32 %v2209_v4, %v4315_v40  ;;  %v2383_v29 = vpop.permute.xlu1 %2382 }
 0x621   :  { %2706 = vmatmul.msk.f32.gmra.mxu1 %vm525_vm1, %v2383_v29 }
 0x622   :  { %v2453_v37 = vpop.f32.mrf.mxu1  ;;  %2392 = vrot.lane.b32.xlu2 %v2246_v45, %s3042_s23  ;;  %2263 = vst.msk [vmem:[%s4770_s4 + $0x50] sm:$0xff] %vm2252_vm7, %v2246_v45 }
 0x623   :  { %v2454_v34 = vadd.f32 %v4500_v27, %v2453_v37 }
 0x625   :  { %v2501_v12 = vmul.f32 0.05, %v2454_v34 }
 0x627   :  { %v2517_v1 = vadd.f32 %v3024_v31, %v2501_v12 }
 0x628   :  { %v2385_v40 = vpop.permute.xlu0 %2384 }
 0x629   :  { %2533 = vst.msk [vmem:[%s4771_s3] sm:$0xff] %vm243_vm0, %v2517_v1  ;;  %2707 = vmatmul.msk.f32.gmra.mxu1 %vm525_vm1, %v2385_v40 }
 0x630   :  { %v2213_v18 = vpop.permute.xlu1 %2212 }
 0x631   :  { %v2248_v55 = vmul.f32 %v2213_v18, %v4342_v59  ;;  %v3025_v59 = vld [vmem:[%s4767_s0 + $0x8] sm:$0xff] }
 0x633   :  { %2396 = vrot.lane.b32.xlu1 %v2248_v55, %s3042_s23  ;;  %2265 = vst.msk [vmem:[%s4770_s4 + $0x60] sm:$0xff] %vm2252_vm7, %v2248_v55 }
 0x634   :  { %v2456_v2 = vpop.f32.mrf.mxu1 }
 0x635   :  { %v2457_v30 = vadd.f32 %v4500_v27, %v2456_v2  ;;  %v3032_v2 = vld [vmem:[%s4767_s0 + $0x40] sm:$0xff] }
 0x637   :  { %v2502_v36 = vmul.f32 0.05, %v2457_v30 }
 0x639   :  { %v2387_v6 = vpop.permute.xlu2 %2386  ;;  %v2518_v23 = vadd.f32 %v3025_v59, %v2502_v36 }
 0x63a   :  { %2708 = vmatmul.msk.f32.gmra.mxu1 %vm525_vm1, %v2387_v6 }
 0x63b   :  { %2534 = vst.msk [vmem:[%s4771_s3 + $0x8] sm:$0xff] %vm243_vm0, %v2518_v23  ;;  %v3033_v23 = vld [vmem:[%s4767_s0 + $0x48] sm:$0xff] }
 0x641   :  { %v2217_v16 = vpop.permute.xlu2 %2216 }
 0x642   :  { %v2250_v26 = vmul.f32 %v2217_v16, %v4369_v44  ;;  %v2459_v50 = vpop.f32.mrf.mxu1 }
 0x643   :  { %v2460_v44 = vadd.f32 %v4500_v27, %v2459_v50 }
 0x644   :  { %2400 = vrot.lane.b32.xlu0 %v2250_v26, %s3042_s23  ;;  %2267 = vst.msk [vmem:[%s4770_s4 + $0x70] sm:$0xff] %vm2252_vm7, %v2250_v26 }
 0x645   :  { %v2503_v61 = vmul.f32 0.05, %v2460_v44 }
 0x647   :  { %v2519_v9 = vadd.f32 %v3026_v15, %v2503_v61 }
 0x649   :  { %2535 = vst.msk [vmem:[%s4771_s3 + $0x10] sm:$0xff] %vm243_vm0, %v2519_v9 }
 0x64c   :  { %2287 = vrot.lane.b32.xlu0 %v4274_v10, %s3042_s23 }
 0x651   :  { %v2215_v21 = vpop.permute.xlu0 %2214 }
 0x652   :  { %v2249_v58 = vmul.f32 %v2215_v21, %v4356_v33  ;;  %v3034_v21 = vld [vmem:[%s4767_s0 + $0x50] sm:$0xff] }
 0x654   :  { %2398 = vrot.lane.b32.xlu2 %v2249_v58, %s3042_s23  ;;  %2293 = vrot.lane.b32.xlu0 %v4311_v35, %s3042_s23  ;;  %2266 = vst.msk [vmem:[%s4770_s4 + $0x68] sm:$0xff] %vm2252_vm7, %v2249_v58 }
 0x65c   :  { %2285 = vrot.lane.b32.xlu2 %v4250_v57, %s3042_s23  ;;  %2299 = vrot.lane.b32.xlu0 %v4359_v48, %s3042_s23 }
 0x661   :  { %v2389_v57 = vpop.permute.xlu1 %2388 }
 0x662   :  { %2709 = vmatmul.msk.f32.gmra.mxu1 %vm525_vm1, %v2389_v57 }
 0x664   :  { %2291 = vrot.lane.b32.xlu2 %v4300_v32, %s3042_s23  ;;  %2305 = vrot.lane.b32.xlu0 %v4423_v54, %s3042_s23 }
 0x665   :  { %v2462_v10 = vpop.f32.mrf.mxu1 }
 0x666   :  { %v2463_v35 = vadd.f32 %v4500_v27, %v2462_v10 }
 0x668   :  { %v2504_v33 = vmul.f32 0.05, %v2463_v35 }
 0x669   :  { %v2219_v0 = vpop.permute.xlu1 %2218 }
 0x66a   :  { %v2520_v39 = vadd.f32 %v3027_v51, %v2504_v33  ;;  %v2251_v28 = vmul.f32 %v2219_v0, %v4380_v8 }
 0x66c   :  { %2297 = vrot.lane.b32.xlu2 %v4331_v13, %s3042_s23  ;;  %2311 = vrot.lane.b32.xlu0 %v4455_v56, %s3042_s23  ;;  %2536 = vst.msk [vmem:[%s4771_s3 + $0x18] sm:$0xff] %vm243_vm0, %v2520_v39  ;;  %v3035_v39 = vld [vmem:[%s4767_s0 + $0x58] sm:$0xff] }
 0x66d   :  { %v2465_v32 = vpop.f32.mrf.mxu1  ;;  %2402 = vrot.lane.b32.xlu1 %v2251_v28, %s3042_s23  ;;  %2268 = vst.msk [vmem:[%s4770_s4 + $0x78] sm:$0xff] %vm2252_vm7, %v2251_v28 }
 0x66e   :  { %v2466_v48 = vadd.f32 %v4500_v27, %v2465_v32 }
 0x670   :  { %v2505_v54 = vmul.f32 0.05, %v2466_v48 }
 0x671   :  { %v2391_v56 = vpop.permute.xlu0 %2390 }
 0x672   :  { %v2521_v13 = vadd.f32 %v3028_v52, %v2505_v54  ;;  %2710 = vmatmul.msk.f32.gmra.mxu1 %vm525_vm1, %v2391_v56  ;;  %v3036_v56 = vld [vmem:[%s4767_s0 + $0x60] sm:$0xff] }
 0x674   :  { %2303 = vrot.lane.b32.xlu2 %v4403_v53, %s3042_s23  ;;  %2537 = vst.msk [vmem:[%s4771_s3 + $0x20] sm:$0xff] %vm243_vm0, %v2521_v13 }
 0x675   :  { %2289 = vrot.lane.b32.xlu1 %v4283_v43, %s3042_s23 }
 0x67c   :  { %2309 = vrot.lane.b32.xlu2 %v4440_v42, %s3042_s23  ;;  %v2393_v53 = vpop.permute.xlu2 %2392 }
 0x67d   :  { %2711 = vmatmul.msk.f32.gmra.mxu1 %vm525_vm1, %v2393_v53  ;;  %2295 = vrot.lane.b32.xlu1 %v4313_v62, %s3042_s23 }
 0x684   :  { %2315 = vrot.lane.b32.xlu2 %v4475_v11, %s3042_s23 }
 0x685   :  { %v2395_v8 = vpop.permute.xlu0 %2394  ;;  %2301 = vrot.lane.b32.xlu1 %v4398_v17, %s3042_s23 }
 0x686   :  { %2712 = vmatmul.msk.f32.gmra.mxu1 %vm525_vm1, %v2395_v8 }
 0x68d   :  { %2307 = vrot.lane.b32.xlu1 %v4428_v46, %s3042_s23 }
 0x695   :  { %2313 = vrot.lane.b32.xlu1 %v4461_v3, %s3042_s23  ;;  %v3030_v3 = vld [vmem:[%s4767_s0 + $0x30] sm:$0xff] }
 0x69e   :  { %v2468_v42 = vpop.f32.mrf.mxu1 }
 0x69f   :  { %v2469_v49 = vadd.f32 %v4500_v27, %v2468_v42  ;;  %v3037_v42 = vld [vmem:[%s4767_s0 + $0x68] sm:$0xff] }
 0x6a1   :  { %v2506_v43 = vmul.f32 0.05, %v2469_v49 }
 0x6a3   :  { %v2522_v24 = vadd.f32 %v3029_v5, %v2506_v43 }
 0x6a5   :  { %v2397_v60 = vpop.permute.xlu1 %2396  ;;  %2538 = vst.msk [vmem:[%s4771_s3 + $0x28] sm:$0xff] %vm243_vm0, %v2522_v24 }
 0x6a6   :  { %2713 = vmatmul.msk.f32.gmra.mxu1 %vm525_vm1, %v2397_v60  ;;  %v2471_v62 = vpop.f32.mrf.mxu1  ;;  %v3038_v60 = vld [vmem:[%s4767_s0 + $0x70] sm:$0xff] }
 0x6a7   :  { %v2472_v17 = vadd.f32 %v4500_v27, %v2471_v62 }
 0x6a9   :  { %v2507_v46 = vmul.f32 0.05, %v2472_v17 }
 0x6ab   :  { %v2523_v20 = vadd.f32 %v3030_v3, %v2507_v46 }
 0x6ad   :  { %2539 = vst.msk [vmem:[%s4771_s3 + $0x30] sm:$0xff] %vm243_vm0, %v2523_v20  ;;  %v3039_v20 = vld [vmem:[%s4767_s0 + $0x78] sm:$0xff] }
 0x6ae   :  { %v2399_v19 = vpop.permute.xlu2 %2398 }
 0x6af   :  { %2714 = vmatmul.msk.f32.gmra.mxu1 %vm525_vm1, %v2399_v19 }
 0x6b6   :  { %v2401_v38 = vpop.permute.xlu0 %2400  ;;  %v2286_v11 = vpop.permute.xlu2 %2285 }
 0x6b7   :  { %2334 = vst.msk [vmem:[%s4770_s4] sm:$0xff] %vm2333_vm6, %v2286_v11  ;;  %v2474_v47 = vpop.f32.mrf.mxu1  ;;  %2715 = vmatmul.msk.f32.gmra.mxu1 %vm525_vm1, %v2401_v38 }
 0x6b8   :  { %v2475_v41 = vadd.f32 %v4500_v27, %v2474_v47 }
 0x6ba   :  { %v2508_v63 = vmul.f32 0.05, %v2475_v41 }
 0x6bc   :  { %v2524_v25 = vadd.f32 %v3031_v22, %v2508_v63 }
 0x6be   :  { %2540 = vst.msk [vmem:[%s4771_s3 + $0x38] sm:$0xff] %vm243_vm0, %v2524_v25  ;;  %v2288_v14 = vpop.permute.xlu0 %2287  ;;  %v2292_v7 = vpop.permute.xlu2 %2291 }
 0x6bf   :  { %2335 = vst.msk [vmem:[%s4770_s4 + $0x8] sm:$0xff] %vm2333_vm6, %v2288_v14 }
 0x6c0   :  { %2337 = vst.msk [vmem:[%s4770_s4 + $0x18] sm:$0xff] %vm2333_vm6, %v2292_v7 }
 0x6c6   :  { %v2294_v4 = vpop.permute.xlu0 %2293  ;;  %v2298_v45 = vpop.permute.xlu2 %2297 }
 0x6c7   :  { %2338 = vst.msk [vmem:[%s4770_s4 + $0x20] sm:$0xff] %vm2333_vm6, %v2294_v4 }
 0x6c8   :  { %2340 = vst.msk [vmem:[%s4770_s4 + $0x30] sm:$0xff] %vm2333_vm6, %v2298_v45 }
 0x6ce   :  { %v2300_v29 = vpop.permute.xlu0 %2299  ;;  %v2304_v37 = vpop.permute.xlu2 %2303 }
 0x6cf   :  { %2341 = vst.msk [vmem:[%s4770_s4 + $0x38] sm:$0xff] %vm2333_vm6, %v2300_v29 }
 0x6d0   :  { %2343 = vst.msk [vmem:[%s4770_s4 + $0x48] sm:$0xff] %vm2333_vm6, %v2304_v37 }
 0x6d6   :  { %v2306_v34 = vpop.permute.xlu0 %2305  ;;  %v2310_v12 = vpop.permute.xlu2 %2309 }
 0x6d7   :  { %2344 = vst.msk [vmem:[%s4770_s4 + $0x50] sm:$0xff] %vm2333_vm6, %v2306_v34 }
 0x6d8   :  { %2346 = vst.msk [vmem:[%s4770_s4 + $0x60] sm:$0xff] %vm2333_vm6, %v2310_v12 }
 0x6de   :  { %v2312_v31 = vpop.permute.xlu0 %2311  ;;  %v2316_v1 = vpop.permute.xlu2 %2315 }
 0x6df   :  { %2347 = vst.msk [vmem:[%s4770_s4 + $0x68] sm:$0xff] %vm2333_vm6, %v2312_v31  ;;  %v2403_v40 = vpop.permute.xlu1 %2402  ;;  %v2477_v18 = vpop.f32.mrf.mxu1 }
 0x6e0   :  { %2349 = vst.msk [vmem:[%s4770_s4 + $0x78] sm:$0xff] %vm2333_vm6, %v2316_v1  ;;  %2716 = vmatmul.msk.f32.gmra.mxu1 %vm525_vm1, %v2403_v40  ;;  %v2478_v55 = vadd.f32 %v4500_v27, %v2477_v18 }
 0x6e2   :  { %v2509_v6 = vmul.f32 0.05, %v2478_v55 }
 0x6e4   :  { %v2525_v30 = vadd.f32 %v3032_v2, %v2509_v6 }
 0x6e6   :  { %2541 = vst.msk [vmem:[%s4771_s3 + $0x40] sm:$0xff] %vm243_vm0, %v2525_v30 }
 0x6e7   :  { %v2290_v16 = vpop.permute.xlu1 %2289 }
 0x6e8   :  { %2336 = vst.msk [vmem:[%s4770_s4 + $0x10] sm:$0xff] %vm2333_vm6, %v2290_v16 }
 0x6ef   :  { %v2480_v36 = vpop.f32.mrf.mxu1  ;;  %v2296_v44 = vpop.permute.xlu1 %2295 }
 0x6f0   :  { %v2481_v26 = vadd.f32 %v4500_v27, %v2480_v36  ;;  %2339 = vst.msk [vmem:[%s4770_s4 + $0x28] sm:$0xff] %vm2333_vm6, %v2296_v44 }
 0x6f2   :  { %v2510_v59 = vmul.f32 0.05, %v2481_v26 }
 0x6f4   :  { %v2526_v50 = vadd.f32 %v3033_v23, %v2510_v59 }
 0x6f6   :  { %2542 = vst.msk [vmem:[%s4771_s3 + $0x48] sm:$0xff] %vm243_vm0, %v2526_v50 }
 0x6f7   :  { %v2302_v10 = vpop.permute.xlu1 %2301 }
 0x6f8   :  { %2342 = vst.msk [vmem:[%s4770_s4 + $0x40] sm:$0xff] %vm2333_vm6, %v2302_v10 }
 0x6fa   :  { %v2483_v61 = vpop.f32.mrf.mxu1 }
 0x6fb   :  { %v2484_v15 = vadd.f32 %v4500_v27, %v2483_v61 }
 0x6fd   :  { %v2511_v9 = vmul.f32 0.05, %v2484_v15 }
 0x6ff   :  { %v2527_v58 = vadd.f32 %v3034_v21, %v2511_v9  ;;  %v2308_v32 = vpop.permute.xlu1 %2307 }
 0x700   :  { %2345 = vst.msk [vmem:[%s4770_s4 + $0x58] sm:$0xff] %vm2333_vm6, %v2308_v32 }
 0x701   :  { %2543 = vst.msk [vmem:[%s4771_s3 + $0x50] sm:$0xff] %vm243_vm0, %v2527_v58 }
 0x703   :  { %v2486_v35 = vpop.f32.mrf.mxu1 }
 0x704   :  { %v2487_v33 = vadd.f32 %v4500_v27, %v2486_v35 }
 0x706   :  { %v2512_v51 = vmul.f32 0.05, %v2487_v33 }
 0x707   :  { %v2314_v48 = vpop.permute.xlu1 %2313 }
 0x708   :  { %v2528_v57 = vadd.f32 %v3035_v39, %v2512_v51  ;;  %2348 = vst.msk [vmem:[%s4770_s4 + $0x70] sm:$0xff] %vm2333_vm6, %v2314_v48 }
 0x70a   :  { %2544 = vst.msk [vmem:[%s4771_s3 + $0x58] sm:$0xff] %vm243_vm0, %v2528_v57 }
 0x723   :  { %v2489_v54 = vpop.f32.mrf.mxu1 }
 0x724   :  { %v2490_v52 = vadd.f32 %v4500_v27, %v2489_v54 }
 0x726   :  { %v2513_v13 = vmul.f32 0.05, %v2490_v52 }
 0x728   :  { %v2529_v0 = vadd.f32 %v3036_v56, %v2513_v13 }
 0x72a   :  { %2545 = vst.msk [vmem:[%s4771_s3 + $0x60] sm:$0xff] %vm243_vm0, %v2529_v0 }
 0x72c   :  { %v2492_v28 = vpop.f32.mrf.mxu1 }
 0x72d   :  { %v2493_v53 = vadd.f32 %v4500_v27, %v2492_v28 }
 0x72f   :  { %v2514_v8 = vmul.f32 0.05, %v2493_v53 }
 0x731   :  { %v2530_v49 = vadd.f32 %v3037_v42, %v2514_v8 }
 0x733   :  { %2546 = vst.msk [vmem:[%s4771_s3 + $0x68] sm:$0xff] %vm243_vm0, %v2530_v49 }
 0x734   :  { %v2495_v43 = vpop.f32.mrf.mxu1 }
 0x735   :  { %v2496_v5 = vadd.f32 %v4500_v27, %v2495_v43 }
 0x737   :  { %v2515_v24 = vmul.f32 0.05, %v2496_v5 }
 0x739   :  { %v2531_v62 = vadd.f32 %v3038_v60, %v2515_v24 }
 0x73b   :  { %2547 = vst.msk [vmem:[%s4771_s3 + $0x70] sm:$0xff] %vm243_vm0, %v2531_v62 }
 0x75d   :  { %v2498_v17 = vpop.f32.mrf.mxu1 }
 0x75e   :  { %v2499_v46 = vadd.f32 %v4500_v27, %v2498_v17 }
 0x760   :  { %v2516_v3 = vmul.f32 0.05, %v2499_v46 }
 0x762   :  { %v2532_v19 = vadd.f32 %v3039_v20, %v2516_v3 }
 0x764   :  { %2548 = vst.msk [vmem:[%s4771_s3 + $0x78] sm:$0xff] %vm243_vm0, %v2532_v19 }

</bundles_post_ra>
